<compile_context>
chip_gen: v6e
topology: v6e:2x2x1
jax: 0.10.0
libtpu: 0.0.40
codegen_flags: <defaults>
</compile_context>

<pallas_src>
import functools

import jax
import jax.numpy as jnp
from jax.experimental import pallas as pl
from jax.experimental.pallas import tpu as pltpu  # noqa: F401  (TPU backend)

NEG_SLOPE = 0.2
EPS = 1e-5


# ------------------------------------------------------------------ kernels --

def _conv_kernel(p_ref, w_ref, bm_ref, o_ref, *, norm, act):
    """Single grid step; all items resident in VMEM.

    For each item i (static unroll, 2-4 items): (Cout,K)@(K,HW) MXU matmul in
    bf16 with f32 accumulation, + per-conv bias map (coord channels folded in),
    optional per-item-per-channel InstanceNorm and LeakyReLU epilogue in f32.
    Lane axis = HW, so stores land in the final (item, Cout, HW) layout.
    """
    w = w_ref[...]                               # (Cout, K)  bf16
    bm = bm_ref[...]                             # (Cout, HW) f32
    n_items = p_ref.shape[0]
    for i in range(n_items):                     # static unroll
        y = jnp.dot(w, p_ref[i], preferred_element_type=jnp.float32) + bm
        if norm:
            # InstanceNorm2d(affine=False): stats per (item, channel) over HW.
            mean = jnp.mean(y, axis=1, keepdims=True)
            var = jnp.mean((y - mean) ** 2, axis=1, keepdims=True)
            y = (y - mean) * jax.lax.rsqrt(var + EPS)
        if act:
            y = jnp.where(y >= 0, y, NEG_SLOPE * y)
        o_ref[i] = y.astype(o_ref.dtype)


def conv_call(patches, wmat, bias_map, *, norm, act, out_dtype):
    """patches: (items, K, HW); wmat: (Cout, K); bias_map: (Cout, HW)."""
    n, K, HW = patches.shape
    Cout = wmat.shape[0]
    kernel = functools.partial(_conv_kernel, norm=norm, act=act)
    return pl.pallas_call(
        kernel,
        out_shape=jax.ShapeDtypeStruct((n, Cout, HW), out_dtype),
        grid=(1,),
        in_specs=[
            pl.BlockSpec((n, K, HW), lambda i: (0, 0, 0)),
            pl.BlockSpec((Cout, K), lambda i: (0, 0)),
            pl.BlockSpec((Cout, HW), lambda i: (0, 0)),
        ],
        out_specs=pl.BlockSpec((n, Cout, HW), lambda i: (0, 0, 0)),
    )(patches.astype(jnp.bfloat16), wmat.astype(jnp.bfloat16),
      bias_map.astype(jnp.float32))


# ----------------------------------------------------------------- JAX glue --

def instance_norm(x, axes):
    mean = jnp.mean(x, axis=axes, keepdims=True)
    var = jnp.mean((x - mean) ** 2, axis=axes, keepdims=True)
    return (x - mean) * jax.lax.rsqrt(var + EPS)


def leaky(x):
    return jnp.where(x >= 0, x, NEG_SLOPE * x)


def preact(x):
    """InstanceNorm(affine=False) + LeakyReLU(0.2); fused by XLA."""
    return leaky(instance_norm(x.astype(jnp.float32), (2, 3)))


def down2(x):
    # nn.Upsample(scale_factor=0.5, mode='nearest'): src = 2*dst
    return x[:, :, ::2, ::2]


def up2(x):
    # nn.Upsample(scale_factor=2, mode='nearest'): src = dst // 2
    return jnp.repeat(jnp.repeat(x, 2, axis=2), 2, axis=3)


def im2col3x3(x):
    """(B,C,H,W) -> (B, C*9, H*W); row = c*9 + di*3 + dj (matches w.reshape).

    Cast x to bf16 BEFORE calling this for the large ResBlock convs so the
    9x-expanded patch tensor is written/read at half the bytes.
    """
    B, C, H, W = x.shape
    xp = jnp.pad(x, ((0, 0), (0, 0), (1, 1), (1, 1)))
    cols = [xp[:, :, di:di + H, dj:dj + W] for di in range(3) for dj in range(3)]
    p = jnp.stack(cols, axis=2)                 # (B, C, 9, H, W)
    return p.reshape(B, C * 9, H * W)


def coord_maps(H, W):
    """AddCoords channels, constant per resolution: (2, H, W) with [-1,1] grids."""
    xx = (jnp.arange(W, dtype=jnp.float32) / (W - 1)) * 2.0 - 1.0
    yy = (jnp.arange(H, dtype=jnp.float32) / (H - 1)) * 2.0 - 1.0
    xx_map = jnp.broadcast_to(xx[None, :], (H, W))
    yy_map = jnp.broadcast_to(yy[:, None], (H, W))
    return jnp.stack([xx_map, yy_map], axis=0)


def small_conv_block(x, w, b):
    """Conv2d(3x3,pad=1) + IN(affine=False) + LReLU + down2 for the 1-/2-channel
    share/mask branches. Left to XLA on purpose: a (1-2,Cin*9)@(Cin*9,HW)
    matmul uses <1% of the MXU and a pallas_call here is pure overhead."""
    y = jax.lax.conv_general_dilated(
        x, w, window_strides=(1, 1), padding="SAME",
        dimension_numbers=("NCHW", "OIHW", "NCHW"))
    y = y + b.reshape(1, -1, 1, 1)
    return down2(leaky(instance_norm(y, (2, 3))))


def stage(bfeat, a1v, a2v, maskv, bias=None):
    """out = (B @ (a1 a2^T) [+ bias]) * mask, using B@(a1 a2^T) == (B@a1) a2^T.

    ~8 KB of VPU work per item at HW=64 — plain jnp so XLA fuses it with the
    surrounding down2 / up2 / ResBlock outputs (no pallas_call, no HBM trip)."""
    bfeat = bfeat.astype(jnp.float32)
    v = jnp.sum(bfeat * a1v, axis=(2, 3), keepdims=True)   # (B,C,1,1) == B @ a1
    out = v * a2v
    if bias is not None:
        out = out + bias.astype(jnp.float32)
    return out * maskv


def resblock(x, p):
    """GFLA ResBlock: IN->LReLU->CoordConv3x3->IN->LReLU->CoordConv3x3 plus a
    learnable 1x1 CoordConv shortcut.  Two Pallas calls: conv1 (IN+LReLU fused
    into the epilogue) and conv2+shortcut fused into one matmul; coordinate
    channels are folded into the bias maps.  Outputs bf16 (consumed only by
    bf16 matmuls / VPU stage math downstream)."""
    B, Cin, H, W = x.shape
    HW = H * W
    hidden = p["c1_w"].shape[0]
    Cout = p["c2_w"].shape[0]

    coords = coord_maps(H, W)                           # (2, H, W)
    coord_flat = coords.reshape(2, HW)                  # for the 1x1 shortcut
    coord_patch = im2col3x3(coords[None])[0]            # (18, HW) for 3x3 convs

    # ---- conv1 on add_coords(lrelu(IN(x))), fused IN+LReLU epilogue -> h1
    h0 = preact(x)
    pA = im2col3x3(h0.astype(jnp.bfloat16))             # (B, Cin*9, HW) bf16
    w1x = p["c1_w"][:, :Cin].reshape(hidden, Cin * 9)
    w1c = p["c1_w"][:, Cin:].reshape(hidden, 18)
    bmA = p["c1_b"][:, None] + jnp.dot(w1c, coord_patch)
    h1 = conv_call(pA, w1x, bmA, norm=True, act=True,
                   out_dtype=jnp.bfloat16)              # (B, hidden, HW) bf16

    # ---- conv2 on add_coords(h1) + 1x1 shortcut on add_coords(x): one matmul
    # TODO(synk): the 9x im2col expansion could be removed entirely by doing 9
    #             shifted (Cout,Cin)@(Cin,HW) matmuls inside the kernel.
    pB = jnp.concatenate(
        [im2col3x3(h1.reshape(B, hidden, H, W)),
         x.reshape(B, Cin, HW).astype(jnp.bfloat16)], axis=1)
    w2x = p["c2_w"][:, :hidden].reshape(Cout, hidden * 9)
    w2c = p["c2_w"][:, hidden:].reshape(Cout, 18)
    scw = p["sc_w"].reshape(Cout, Cin + 2)
    wB = jnp.concatenate([w2x, scw[:, :Cin]], axis=1)   # (Cout, hidden*9+Cin)
    bmB = ((p["c2_b"] + p["sc_b"])[:, None]
           + jnp.dot(w2c, coord_patch) + jnp.dot(scw[:, Cin:], coord_flat))
    out = conv_call(pB, wB, bmB, norm=False, act=False,
                    out_dtype=jnp.bfloat16)             # (B, Cout, HW) bf16
    return out.reshape(B, Cout, H, W)


# --------------------------------------------------------------- full forward --

def refine_parsing_net_forward(a1, b1, a2, params):
    B, _, H, W = a1.shape
    HW = H * W

    a1s = jnp.sum(a1, axis=1, keepdims=True)            # torch.sum(a1,1).reshape
    a2s = jnp.sum(a2, axis=1, keepdims=True)

    # -- stage-0 share/mask convs (1 channel): XLA.
    a1_0 = small_conv_block(a1s, params["share1_w"], params["share1_b"])
    a2_0 = small_conv_block(a2s, params["share1_w"], params["share1_b"])
    mask_0 = small_conv_block(a2s, params["mask1_w"], params["mask1_b"])

    # -- conv_b_1 (ResBlock 8->32, Pallas) + down2; stage-0 bmm in XLA.
    b1_0 = down2(resblock(b1, params["b1"]))             # (B,32,H/2,W/2) bf16
    out_0 = up2(stage(b1_0, a1_0, a2_0, mask_0))         # (B,32,H,W) f32

    # -- stage-1 share/mask convs (2 channels): XLA.
    a1_1 = small_conv_block(jnp.concatenate([a1s, up2(a1_0)], axis=1),
                            params["share2_w"], params["share2_b"])
    a2_1 = small_conv_block(jnp.concatenate([a2s, up2(a2_0)], axis=1),
                            params["share2_w"], params["share2_b"])
    mask_1 = small_conv_block(jnp.concatenate([a2s, up2(mask_0)], axis=1),
                              params["mask2_w"], params["mask2_b"])

    # -- conv_b_2 / conv_b_cut_1 (ResBlocks, Pallas); stage-1 bmm in XLA.
    b1_1 = down2(resblock(out_0, params["b2"]))           # (B,32,H/2,W/2) bf16
    bias_1 = resblock(b1_0, params["bcut1"])              # (B,32,H/2,W/2) bf16
    out_1 = up2(stage(b1_1, a1_1, a2_1, mask_1, bias=bias_1))   # (B,32,H,W)

    # -- parout(out_0) + parout(out_1): ONE Pallas call, 2B items in the block.
    pp = im2col3x3(jnp.concatenate([out_0, out_1], axis=0).astype(jnp.bfloat16))
    wpo = params["parout_w"].reshape(8, 32 * 9)
    bmpo = jnp.broadcast_to(params["parout_b"][:, None], (8, HW))
    yo = conv_call(pp, wpo, bmpo, norm=True, act=True,
                   out_dtype=jnp.float32)                 # (2B, 8, HW)
    yo = yo.reshape(2, B, 8, H, W)
    return 0.5 * (yo[0] + yo[1])


# ------------------------------------------------------------------- params --

def init_params(key):
    keys = iter(jax.random.split(key, 64))

    def rnd(shape, scale=0.1):
        return scale * jax.random.normal(next(keys), shape, dtype=jnp.float32)

    def res_params(cin, hidden, cout):
        return {
            "c1_w": rnd((hidden, cin + 2, 3, 3)),
            "c1_b": rnd((hidden,)),
            "c2_w": rnd((cout, hidden + 2, 3, 3)),
            "c2_b": rnd((cout,)),
            "sc_w": rnd((cout, cin + 2, 1, 1)),
            "sc_b": rnd((cout,)),
        }

    return {
        "share1_w": rnd((1, 1, 3, 3)), "share1_b": rnd((1,)),
        "share2_w": rnd((1, 2, 3, 3)), "share2_b": rnd((1,)),
        "mask1_w": rnd((1, 1, 3, 3)), "mask1_b": rnd((1,)),
        "mask2_w": rnd((1, 2, 3, 3)), "mask2_b": rnd((1,)),
        "b1": res_params(8, 8, 32),       # conv_b_1: ResBlock(8, 32), hidden=8
        "b2": res_params(32, 32, 32),     # conv_b_2: ResBlock(32, 32)
        "bcut1": res_params(32, 32, 32),  # conv_b_cut_1: ResBlock(32, 32)
        "parout_w": rnd((8, 32, 3, 3)), "parout_b": rnd((8,)),
    }


# --------------------------------------------------------------------- main --

if __name__ == "__main__":
    key = jax.random.PRNGKey(0)
    k1, k2, k3, kp = jax.random.split(key, 4)
    B, C, H, W = 2, 8, 16, 16
    a1 = jax.random.normal(k1, (B, C, H, W), dtype=jnp.float32)
    b1 = jax.random.normal(k2, (B, C, H, W), dtype=jnp.float32)
    a2 = jax.random.normal(k3, (B, C, H, W), dtype=jnp.float32)
    params = init_params(kp)

    fwd = jax.jit(refine_parsing_net_forward)
    out = fwd(a1, b1, a2, params)
    out = jax.block_until_ready(out)

    assert out.shape == (B, 8, H, W), out.shape
    assert bool(jnp.all(jnp.isfinite(out)))
    print("KERNEL_OK")
</pallas_src>

<mosaic_0001>
module attributes {stable_mosaic.version = 11 : i64} {
  func.func @_conv_kernel(%arg0: i32, %arg1: memref<2x72x256xbf16, #tpu.memory_space<vmem>>, %arg2: memref<8x72xbf16, #tpu.memory_space<vmem>>, %arg3: memref<8x256xf32, #tpu.memory_space<vmem>>, %arg4: memref<2x8x256xbf16, #tpu.memory_space<vmem>>) attributes {dimension_semantics = [#tpu.dimension_semantics<arbitrary>], iteration_bounds = array<i64: 1>, scalar_prefetch = 0 : i64, scratch_operands = 0 : i64, tpu.core_type = #tpu.core_type<tc>, window_params = [{pipeline_mode = #tpu.pipeline_mode<synchronous>, transform_indices = @transform_0, window_bounds = array<i64: 2, 72, 256>}, {pipeline_mode = #tpu.pipeline_mode<synchronous>, transform_indices = @transform_1, window_bounds = array<i64: 8, 72>}, {pipeline_mode = #tpu.pipeline_mode<synchronous>, transform_indices = @transform_2, window_bounds = array<i64: 8, 256>}, {pipeline_mode = #tpu.pipeline_mode<synchronous>, transform_indices = @transform_3, window_bounds = array<i64: 2, 8, 256>}]} {
    %c0 = arith.constant 0 : index
    %c0_0 = arith.constant 0 : index
    %0 = vector.load %arg2[%c0, %c0_0] : memref<8x72xbf16, #tpu.memory_space<vmem>>, vector<8x72xbf16>
    %c0_1 = arith.constant 0 : index
    %c0_2 = arith.constant 0 : index
    %1 = vector.load %arg3[%c0_1, %c0_2] : memref<8x256xf32, #tpu.memory_space<vmem>>, vector<8x256xf32>
    %c0_3 = arith.constant 0 : index
    %c0_4 = arith.constant 0 : index
    %c0_5 = arith.constant 0 : index
    %2 = vector.load %arg1[%c0_3, %c0_4, %c0_5] : memref<2x72x256xbf16, #tpu.memory_space<vmem>>, vector<1x72x256xbf16>
    %3 = vector.shape_cast %2 : vector<1x72x256xbf16> to vector<72x256xbf16>
    %cst = arith.constant dense<0.000000e+00> : vector<8x256xf32>
    %4 = tpu.matmul %0, %3, %cst {dimension_numbers = #tpu.dot_dimension_numbers<[1], [0], [0], [1], [0, 0, 1, 1], [], []>} : vector<8x72xbf16>, vector<72x256xbf16>, vector<8x256xf32> -> vector<8x256xf32>
    %5 = arith.addf %4, %1 : vector<8x256xf32>
    %cst_6 = arith.constant dense<0.000000e+00> : vector<8xf32>
    %6 = vector.multi_reduction <add>, %5, %cst_6 [1] : vector<8x256xf32> to vector<8xf32>
    %7 = vector.shape_cast %6 : vector<8xf32> to vector<8x1xf32>
    %cst_7 = arith.constant 2.560000e+02 : f32
    %8 = vector.broadcast %cst_7 : f32 to vector<8x1xf32>
    %9 = arith.divf %7, %8 : vector<8x1xf32>
    %10 = vector.broadcast %9 : vector<8x1xf32> to vector<8x256xf32>
    %11 = arith.subf %5, %10 : vector<8x256xf32>
    %12 = arith.mulf %11, %11 : vector<8x256xf32>
    %cst_8 = arith.constant dense<0.000000e+00> : vector<8xf32>
    %13 = vector.multi_reduction <add>, %12, %cst_8 [1] : vector<8x256xf32> to vector<8xf32>
    %14 = vector.shape_cast %13 : vector<8xf32> to vector<8x1xf32>
    %cst_9 = arith.constant 2.560000e+02 : f32
    %15 = vector.broadcast %cst_9 : f32 to vector<8x1xf32>
    %16 = arith.divf %14, %15 : vector<8x1xf32>
    %17 = vector.broadcast %9 : vector<8x1xf32> to vector<8x256xf32>
    %18 = arith.subf %5, %17 : vector<8x256xf32>
    %cst_10 = arith.constant 9.99999974E-6 : f32
    %19 = vector.broadcast %cst_10 : f32 to vector<8x1xf32>
    %20 = arith.addf %16, %19 : vector<8x1xf32>
    %21 = math.rsqrt %20 : vector<8x1xf32>
    %22 = vector.broadcast %21 : vector<8x1xf32> to vector<8x256xf32>
    %23 = arith.mulf %18, %22 : vector<8x256xf32>
    %cst_11 = arith.constant 0.000000e+00 : f32
    %24 = vector.broadcast %cst_11 : f32 to vector<8x256xf32>
    %25 = arith.cmpf oge, %23, %24 : vector<8x256xf32>
    %cst_12 = arith.constant 2.000000e-01 : f32
    %26 = vector.broadcast %cst_12 : f32 to vector<8x256xf32>
    %27 = arith.mulf %26, %23 : vector<8x256xf32>
    %28 = arith.select %25, %23, %27 : vector<8x256xi1>, vector<8x256xf32>
    %29 = arith.truncf %28 : vector<8x256xf32> to vector<8x256xbf16>
    %c0_13 = arith.constant 0 : index
    %c0_14 = arith.constant 0 : index
    %c0_15 = arith.constant 0 : index
    %30 = vector.load %arg4[%c0_13, %c0_14, %c0_15] : memref<2x8x256xbf16, #tpu.memory_space<vmem>>, vector<1x8x256xbf16>
    %31 = vector.shape_cast %30 : vector<1x8x256xbf16> to vector<8x256xbf16>
    %32 = vector.shape_cast %29 : vector<8x256xbf16> to vector<1x8x256xbf16>
    tpu.vector_store %arg4[%c0_13, %c0_14, %c0_15], %32 {strides = array<i32>} : memref<2x8x256xbf16, #tpu.memory_space<vmem>>, vector<1x8x256xbf16>,
    %c1 = arith.constant 1 : index
    %c0_16 = arith.constant 0 : index
    %c0_17 = arith.constant 0 : index
    %33 = vector.load %arg1[%c1, %c0_16, %c0_17] : memref<2x72x256xbf16, #tpu.memory_space<vmem>>, vector<1x72x256xbf16>
    %34 = vector.shape_cast %33 : vector<1x72x256xbf16> to vector<72x256xbf16>
    %cst_18 = arith.constant dense<0.000000e+00> : vector<8x256xf32>
    %35 = tpu.matmul %0, %34, %cst_18 {dimension_numbers = #tpu.dot_dimension_numbers<[1], [0], [0], [1], [0, 0, 1, 1], [], []>} : vector<8x72xbf16>, vector<72x256xbf16>, vector<8x256xf32> -> vector<8x256xf32>
    %36 = arith.addf %35, %1 : vector<8x256xf32>
    %cst_19 = arith.constant dense<0.000000e+00> : vector<8xf32>
    %37 = vector.multi_reduction <add>, %36, %cst_19 [1] : vector<8x256xf32> to vector<8xf32>
    %38 = vector.shape_cast %37 : vector<8xf32> to vector<8x1xf32>
    %cst_20 = arith.constant 2.560000e+02 : f32
    %39 = vector.broadcast %cst_20 : f32 to vector<8x1xf32>
    %40 = arith.divf %38, %39 : vector<8x1xf32>
    %41 = vector.broadcast %40 : vector<8x1xf32> to vector<8x256xf32>
    %42 = arith.subf %36, %41 : vector<8x256xf32>
    %43 = arith.mulf %42, %42 : vector<8x256xf32>
    %cst_21 = arith.constant dense<0.000000e+00> : vector<8xf32>
    %44 = vector.multi_reduction <add>, %43, %cst_21 [1] : vector<8x256xf32> to vector<8xf32>
    %45 = vector.shape_cast %44 : vector<8xf32> to vector<8x1xf32>
    %cst_22 = arith.constant 2.560000e+02 : f32
    %46 = vector.broadcast %cst_22 : f32 to vector<8x1xf32>
    %47 = arith.divf %45, %46 : vector<8x1xf32>
    %48 = vector.broadcast %40 : vector<8x1xf32> to vector<8x256xf32>
    %49 = arith.subf %36, %48 : vector<8x256xf32>
    %cst_23 = arith.constant 9.99999974E-6 : f32
    %50 = vector.broadcast %cst_23 : f32 to vector<8x1xf32>
    %51 = arith.addf %47, %50 : vector<8x1xf32>
    %52 = math.rsqrt %51 : vector<8x1xf32>
    %53 = vector.broadcast %52 : vector<8x1xf32> to vector<8x256xf32>
    %54 = arith.mulf %49, %53 : vector<8x256xf32>
    %cst_24 = arith.constant 0.000000e+00 : f32
    %55 = vector.broadcast %cst_24 : f32 to vector<8x256xf32>
    %56 = arith.cmpf oge, %54, %55 : vector<8x256xf32>
    %cst_25 = arith.constant 2.000000e-01 : f32
    %57 = vector.broadcast %cst_25 : f32 to vector<8x256xf32>
    %58 = arith.mulf %57, %54 : vector<8x256xf32>
    %59 = arith.select %56, %54, %58 : vector<8x256xi1>, vector<8x256xf32>
    %60 = arith.truncf %59 : vector<8x256xf32> to vector<8x256xbf16>
    %c1_26 = arith.constant 1 : index
    %c0_27 = arith.constant 0 : index
    %c0_28 = arith.constant 0 : index
    %61 = vector.load %arg4[%c1_26, %c0_27, %c0_28] : memref<2x8x256xbf16, #tpu.memory_space<vmem>>, vector<1x8x256xbf16>
    %62 = vector.shape_cast %61 : vector<1x8x256xbf16> to vector<8x256xbf16>
    %63 = vector.shape_cast %60 : vector<8x256xbf16> to vector<1x8x256xbf16>
    tpu.vector_store %arg4[%c1_26, %c0_27, %c0_28], %63 {strides = array<i32>} : memref<2x8x256xbf16, #tpu.memory_space<vmem>>, vector<1x8x256xbf16>,
    return
  }
  func.func @transform_0(%arg0: i32) -> (i32, i32, i32) {
    %c0_i32 = arith.constant 0 : i32
    %c0_i32_0 = arith.constant 0 : i32
    %c0_i32_1 = arith.constant 0 : i32
    %c0_i32_2 = arith.constant 0 : i32
    return %c0_i32, %c0_i32_0, %c0_i32_1 : i32, i32, i32
  }
  func.func @transform_1(%arg0: i32) -> (i32, i32) {
    %c0_i32 = arith.constant 0 : i32
    %c0_i32_0 = arith.constant 0 : i32
    %c0_i32_1 = arith.constant 0 : i32
    return %c0_i32, %c0_i32_0 : i32, i32
  }
  func.func @transform_2(%arg0: i32) -> (i32, i32) {
    %c0_i32 = arith.constant 0 : i32
    %c0_i32_0 = arith.constant 0 : i32
    %c0_i32_1 = arith.constant 0 : i32
    return %c0_i32, %c0_i32_0 : i32, i32
  }
  func.func @transform_3(%arg0: i32) -> (i32, i32, i32) {
    %c0_i32 = arith.constant 0 : i32
    %c0_i32_0 = arith.constant 0 : i32
    %c0_i32_1 = arith.constant 0 : i32
    %c0_i32_2 = arith.constant 0 : i32
    return %c0_i32, %c0_i32_0, %c0_i32_1 : i32, i32, i32
  }
}

module attributes {stable_mosaic.version = 11 : i64} {
  func.func @_conv_kernel(%arg0: i32, %arg1: memref<2x80x256xbf16, #tpu.memory_space<vmem>>, %arg2: memref<32x80xbf16, #tpu.memory_space<vmem>>, %arg3: memref<32x256xf32, #tpu.memory_space<vmem>>, %arg4: memref<2x32x256xbf16, #tpu.memory_space<vmem>>) attributes {dimension_semantics = [#tpu.dimension_semantics<arbitrary>], iteration_bounds = array<i64: 1>, scalar_prefetch = 0 : i64, scratch_operands = 0 : i64, tpu.core_type = #tpu.core_type<tc>, window_params = [{pipeline_mode = #tpu.pipeline_mode<synchronous>, transform_indices = @transform_0, window_bounds = array<i64: 2, 80, 256>}, {pipeline_mode = #tpu.pipeline_mode<synchronous>, transform_indices = @transform_1, window_bounds = array<i64: 32, 80>}, {pipeline_mode = #tpu.pipeline_mode<synchronous>, transform_indices = @transform_2, window_bounds = array<i64: 32, 256>}, {pipeline_mode = #tpu.pipeline_mode<synchronous>, transform_indices = @transform_3, window_bounds = array<i64: 2, 32, 256>}]} {
    %c0 = arith.constant 0 : index
    %c0_0 = arith.constant 0 : index
    %0 = vector.load %arg2[%c0, %c0_0] : memref<32x80xbf16, #tpu.memory_space<vmem>>, vector<32x80xbf16>
    %c0_1 = arith.constant 0 : index
    %c0_2 = arith.constant 0 : index
    %1 = vector.load %arg3[%c0_1, %c0_2] : memref<32x256xf32, #tpu.memory_space<vmem>>, vector<32x256xf32>
    %c0_3 = arith.constant 0 : index
    %c0_4 = arith.constant 0 : index
    %c0_5 = arith.constant 0 : index
    %2 = vector.load %arg1[%c0_3, %c0_4, %c0_5] : memref<2x80x256xbf16, #tpu.memory_space<vmem>>, vector<1x80x256xbf16>
    %3 = vector.shape_cast %2 : vector<1x80x256xbf16> to vector<80x256xbf16>
    %cst = arith.constant dense<0.000000e+00> : vector<32x256xf32>
    %4 = tpu.matmul %0, %3, %cst {dimension_numbers = #tpu.dot_dimension_numbers<[1], [0], [0], [1], [0, 0, 1, 1], [], []>} : vector<32x80xbf16>, vector<80x256xbf16>, vector<32x256xf32> -> vector<32x256xf32>
    %5 = arith.addf %4, %1 : vector<32x256xf32>
    %6 = arith.truncf %5 : vector<32x256xf32> to vector<32x256xbf16>
    %c0_6 = arith.constant 0 : index
    %c0_7 = arith.constant 0 : index
    %c0_8 = arith.constant 0 : index
    %7 = vector.load %arg4[%c0_6, %c0_7, %c0_8] : memref<2x32x256xbf16, #tpu.memory_space<vmem>>, vector<1x32x256xbf16>
    %8 = vector.shape_cast %7 : vector<1x32x256xbf16> to vector<32x256xbf16>
    %9 = vector.shape_cast %6 : vector<32x256xbf16> to vector<1x32x256xbf16>
    tpu.vector_store %arg4[%c0_6, %c0_7, %c0_8], %9 {strides = array<i32>} : memref<2x32x256xbf16, #tpu.memory_space<vmem>>, vector<1x32x256xbf16>,
    %c1 = arith.constant 1 : index
    %c0_9 = arith.constant 0 : index
    %c0_10 = arith.constant 0 : index
    %10 = vector.load %arg1[%c1, %c0_9, %c0_10] : memref<2x80x256xbf16, #tpu.memory_space<vmem>>, vector<1x80x256xbf16>
    %11 = vector.shape_cast %10 : vector<1x80x256xbf16> to vector<80x256xbf16>
    %cst_11 = arith.constant dense<0.000000e+00> : vector<32x256xf32>
    %12 = tpu.matmul %0, %11, %cst_11 {dimension_numbers = #tpu.dot_dimension_numbers<[1], [0], [0], [1], [0, 0, 1, 1], [], []>} : vector<32x80xbf16>, vector<80x256xbf16>, vector<32x256xf32> -> vector<32x256xf32>
    %13 = arith.addf %12, %1 : vector<32x256xf32>
    %14 = arith.truncf %13 : vector<32x256xf32> to vector<32x256xbf16>
    %c1_12 = arith.constant 1 : index
    %c0_13 = arith.constant 0 : index
    %c0_14 = arith.constant 0 : index
    %15 = vector.load %arg4[%c1_12, %c0_13, %c0_14] : memref<2x32x256xbf16, #tpu.memory_space<vmem>>, vector<1x32x256xbf16>
    %16 = vector.shape_cast %15 : vector<1x32x256xbf16> to vector<32x256xbf16>
    %17 = vector.shape_cast %14 : vector<32x256xbf16> to vector<1x32x256xbf16>
    tpu.vector_store %arg4[%c1_12, %c0_13, %c0_14], %17 {strides = array<i32>} : memref<2x32x256xbf16, #tpu.memory_space<vmem>>, vector<1x32x256xbf16>,
    return
  }
  func.func @transform_0(%arg0: i32) -> (i32, i32, i32) {
    %c0_i32 = arith.constant 0 : i32
    %c0_i32_0 = arith.constant 0 : i32
    %c0_i32_1 = arith.constant 0 : i32
    %c0_i32_2 = arith.constant 0 : i32
    return %c0_i32, %c0_i32_0, %c0_i32_1 : i32, i32, i32
  }
  func.func @transform_1(%arg0: i32) -> (i32, i32) {
    %c0_i32 = arith.constant 0 : i32
    %c0_i32_0 = arith.constant 0 : i32
    %c0_i32_1 = arith.constant 0 : i32
    return %c0_i32, %c0_i32_0 : i32, i32
  }
  func.func @transform_2(%arg0: i32) -> (i32, i32) {
    %c0_i32 = arith.constant 0 : i32
    %c0_i32_0 = arith.constant 0 : i32
    %c0_i32_1 = arith.constant 0 : i32
    return %c0_i32, %c0_i32_0 : i32, i32
  }
  func.func @transform_3(%arg0: i32) -> (i32, i32, i32) {
    %c0_i32 = arith.constant 0 : i32
    %c0_i32_0 = arith.constant 0 : i32
    %c0_i32_1 = arith.constant 0 : i32
    %c0_i32_2 = arith.constant 0 : i32
    return %c0_i32, %c0_i32_0, %c0_i32_1 : i32, i32, i32
  }
}

module attributes {stable_mosaic.version = 11 : i64} {
  func.func @_conv_kernel(%arg0: i32, %arg1: memref<2x288x256xbf16, #tpu.memory_space<vmem>>, %arg2: memref<32x288xbf16, #tpu.memory_space<vmem>>, %arg3: memref<32x256xf32, #tpu.memory_space<vmem>>, %arg4: memref<2x32x256xbf16, #tpu.memory_space<vmem>>) attributes {dimension_semantics = [#tpu.dimension_semantics<arbitrary>], iteration_bounds = array<i64: 1>, scalar_prefetch = 0 : i64, scratch_operands = 0 : i64, tpu.core_type = #tpu.core_type<tc>, window_params = [{pipeline_mode = #tpu.pipeline_mode<synchronous>, transform_indices = @transform_0, window_bounds = array<i64: 2, 288, 256>}, {pipeline_mode = #tpu.pipeline_mode<synchronous>, transform_indices = @transform_1, window_bounds = array<i64: 32, 288>}, {pipeline_mode = #tpu.pipeline_mode<synchronous>, transform_indices = @transform_2, window_bounds = array<i64: 32, 256>}, {pipeline_mode = #tpu.pipeline_mode<synchronous>, transform_indices = @transform_3, window_bounds = array<i64: 2, 32, 256>}]} {
    %c0 = arith.constant 0 : index
    %c0_0 = arith.constant 0 : index
    %0 = vector.load %arg2[%c0, %c0_0] : memref<32x288xbf16, #tpu.memory_space<vmem>>, vector<32x288xbf16>
    %c0_1 = arith.constant 0 : index
    %c0_2 = arith.constant 0 : index
    %1 = vector.load %arg3[%c0_1, %c0_2] : memref<32x256xf32, #tpu.memory_space<vmem>>, vector<32x256xf32>
    %c0_3 = arith.constant 0 : index
    %c0_4 = arith.constant 0 : index
    %c0_5 = arith.constant 0 : index
    %2 = vector.load %arg1[%c0_3, %c0_4, %c0_5] : memref<2x288x256xbf16, #tpu.memory_space<vmem>>, vector<1x288x256xbf16>
    %3 = vector.shape_cast %2 : vector<1x288x256xbf16> to vector<288x256xbf16>
    %cst = arith.constant dense<0.000000e+00> : vector<32x256xf32>
    %4 = tpu.matmul %0, %3, %cst {dimension_numbers = #tpu.dot_dimension_numbers<[1], [0], [0], [1], [0, 0, 1, 1], [], []>} : vector<32x288xbf16>, vector<288x256xbf16>, vector<32x256xf32> -> vector<32x256xf32>
    %5 = arith.addf %4, %1 : vector<32x256xf32>
    %cst_6 = arith.constant dense<0.000000e+00> : vector<32xf32>
    %6 = vector.multi_reduction <add>, %5, %cst_6 [1] : vector<32x256xf32> to vector<32xf32>
    %7 = vector.shape_cast %6 : vector<32xf32> to vector<32x1xf32>
    %cst_7 = arith.constant 2.560000e+02 : f32
    %8 = vector.broadcast %cst_7 : f32 to vector<32x1xf32>
    %9 = arith.divf %7, %8 : vector<32x1xf32>
    %10 = vector.broadcast %9 : vector<32x1xf32> to vector<32x256xf32>
    %11 = arith.subf %5, %10 : vector<32x256xf32>
    %12 = arith.mulf %11, %11 : vector<32x256xf32>
    %cst_8 = arith.constant dense<0.000000e+00> : vector<32xf32>
    %13 = vector.multi_reduction <add>, %12, %cst_8 [1] : vector<32x256xf32> to vector<32xf32>
    %14 = vector.shape_cast %13 : vector<32xf32> to vector<32x1xf32>
    %cst_9 = arith.constant 2.560000e+02 : f32
    %15 = vector.broadcast %cst_9 : f32 to vector<32x1xf32>
    %16 = arith.divf %14, %15 : vector<32x1xf32>
    %17 = vector.broadcast %9 : vector<32x1xf32> to vector<32x256xf32>
    %18 = arith.subf %5, %17 : vector<32x256xf32>
    %cst_10 = arith.constant 9.99999974E-6 : f32
    %19 = vector.broadcast %cst_10 : f32 to vector<32x1xf32>
    %20 = arith.addf %16, %19 : vector<32x1xf32>
    %21 = math.rsqrt %20 : vector<32x1xf32>
    %22 = vector.broadcast %21 : vector<32x1xf32> to vector<32x256xf32>
    %23 = arith.mulf %18, %22 : vector<32x256xf32>
    %cst_11 = arith.constant 0.000000e+00 : f32
    %24 = vector.broadcast %cst_11 : f32 to vector<32x256xf32>
    %25 = arith.cmpf oge, %23, %24 : vector<32x256xf32>
    %cst_12 = arith.constant 2.000000e-01 : f32
    %26 = vector.broadcast %cst_12 : f32 to vector<32x256xf32>
    %27 = arith.mulf %26, %23 : vector<32x256xf32>
    %28 = arith.select %25, %23, %27 : vector<32x256xi1>, vector<32x256xf32>
    %29 = arith.truncf %28 : vector<32x256xf32> to vector<32x256xbf16>
    %c0_13 = arith.constant 0 : index
    %c0_14 = arith.constant 0 : index
    %c0_15 = arith.constant 0 : index
    %30 = vector.load %arg4[%c0_13, %c0_14, %c0_15] : memref<2x32x256xbf16, #tpu.memory_space<vmem>>, vector<1x32x256xbf16>
    %31 = vector.shape_cast %30 : vector<1x32x256xbf16> to vector<32x256xbf16>
    %32 = vector.shape_cast %29 : vector<32x256xbf16> to vector<1x32x256xbf16>
    tpu.vector_store %arg4[%c0_13, %c0_14, %c0_15], %32 {strides = array<i32>} : memref<2x32x256xbf16, #tpu.memory_space<vmem>>, vector<1x32x256xbf16>,
    %c1 = arith.constant 1 : index
    %c0_16 = arith.constant 0 : index
    %c0_17 = arith.constant 0 : index
    %33 = vector.load %arg1[%c1, %c0_16, %c0_17] : memref<2x288x256xbf16, #tpu.memory_space<vmem>>, vector<1x288x256xbf16>
    %34 = vector.shape_cast %33 : vector<1x288x256xbf16> to vector<288x256xbf16>
    %cst_18 = arith.constant dense<0.000000e+00> : vector<32x256xf32>
    %35 = tpu.matmul %0, %34, %cst_18 {dimension_numbers = #tpu.dot_dimension_numbers<[1], [0], [0], [1], [0, 0, 1, 1], [], []>} : vector<32x288xbf16>, vector<288x256xbf16>, vector<32x256xf32> -> vector<32x256xf32>
    %36 = arith.addf %35, %1 : vector<32x256xf32>
    %cst_19 = arith.constant dense<0.000000e+00> : vector<32xf32>
    %37 = vector.multi_reduction <add>, %36, %cst_19 [1] : vector<32x256xf32> to vector<32xf32>
    %38 = vector.shape_cast %37 : vector<32xf32> to vector<32x1xf32>
    %cst_20 = arith.constant 2.560000e+02 : f32
    %39 = vector.broadcast %cst_20 : f32 to vector<32x1xf32>
    %40 = arith.divf %38, %39 : vector<32x1xf32>
    %41 = vector.broadcast %40 : vector<32x1xf32> to vector<32x256xf32>
    %42 = arith.subf %36, %41 : vector<32x256xf32>
    %43 = arith.mulf %42, %42 : vector<32x256xf32>
    %cst_21 = arith.constant dense<0.000000e+00> : vector<32xf32>
    %44 = vector.multi_reduction <add>, %43, %cst_21 [1] : vector<32x256xf32> to vector<32xf32>
    %45 = vector.shape_cast %44 : vector<32xf32> to vector<32x1xf32>
    %cst_22 = arith.constant 2.560000e+02 : f32
    %46 = vector.broadcast %cst_22 : f32 to vector<32x1xf32>
    %47 = arith.divf %45, %46 : vector<32x1xf32>
    %48 = vector.broadcast %40 : vector<32x1xf32> to vector<32x256xf32>
    %49 = arith.subf %36, %48 : vector<32x256xf32>
    %cst_23 = arith.constant 9.99999974E-6 : f32
    %50 = vector.broadcast %cst_23 : f32 to vector<32x1xf32>
    %51 = arith.addf %47, %50 : vector<32x1xf32>
    %52 = math.rsqrt %51 : vector<32x1xf32>
    %53 = vector.broadcast %52 : vector<32x1xf32> to vector<32x256xf32>
    %54 = arith.mulf %49, %53 : vector<32x256xf32>
    %cst_24 = arith.constant 0.000000e+00 : f32
    %55 = vector.broadcast %cst_24 : f32 to vector<32x256xf32>
    %56 = arith.cmpf oge, %54, %55 : vector<32x256xf32>
    %cst_25 = arith.constant 2.000000e-01 : f32
    %57 = vector.broadcast %cst_25 : f32 to vector<32x256xf32>
    %58 = arith.mulf %57, %54 : vector<32x256xf32>
    %59 = arith.select %56, %54, %58 : vector<32x256xi1>, vector<32x256xf32>
    %60 = arith.truncf %59 : vector<32x256xf32> to vector<32x256xbf16>
    %c1_26 = arith.constant 1 : index
    %c0_27 = arith.constant 0 : index
    %c0_28 = arith.constant 0 : index
    %61 = vector.load %arg4[%c1_26, %c0_27, %c0_28] : memref<2x32x256xbf16, #tpu.memory_space<vmem>>, vector<1x32x256xbf16>
    %62 = vector.shape_cast %61 : vector<1x32x256xbf16> to vector<32x256xbf16>
    %63 = vector.shape_cast %60 : vector<32x256xbf16> to vector<1x32x256xbf16>
    tpu.vector_store %arg4[%c1_26, %c0_27, %c0_28], %63 {strides = array<i32>} : memref<2x32x256xbf16, #tpu.memory_space<vmem>>, vector<1x32x256xbf16>,
    return
  }
  func.func @transform_0(%arg0: i32) -> (i32, i32, i32) {
    %c0_i32 = arith.constant 0 : i32
    %c0_i32_0 = arith.constant 0 : i32
    %c0_i32_1 = arith.constant 0 : i32
    %c0_i32_2 = arith.constant 0 : i32
    return %c0_i32, %c0_i32_0, %c0_i32_1 : i32, i32, i32
  }
  func.func @transform_1(%arg0: i32) -> (i32, i32) {
    %c0_i32 = arith.constant 0 : i32
    %c0_i32_0 = arith.constant 0 : i32
    %c0_i32_1 = arith.constant 0 : i32
    return %c0_i32, %c0_i32_0 : i32, i32
  }
  func.func @transform_2(%arg0: i32) -> (i32, i32) {
    %c0_i32 = arith.constant 0 : i32
    %c0_i32_0 = arith.constant 0 : i32
    %c0_i32_1 = arith.constant 0 : i32
    return %c0_i32, %c0_i32_0 : i32, i32
  }
  func.func @transform_3(%arg0: i32) -> (i32, i32, i32) {
    %c0_i32 = arith.constant 0 : i32
    %c0_i32_0 = arith.constant 0 : i32
    %c0_i32_1 = arith.constant 0 : i32
    %c0_i32_2 = arith.constant 0 : i32
    return %c0_i32, %c0_i32_0, %c0_i32_1 : i32, i32, i32
  }
}

module attributes {stable_mosaic.version = 11 : i64} {
  func.func @_conv_kernel(%arg0: i32, %arg1: memref<2x320x256xbf16, #tpu.memory_space<vmem>>, %arg2: memref<32x320xbf16, #tpu.memory_space<vmem>>, %arg3: memref<32x256xf32, #tpu.memory_space<vmem>>, %arg4: memref<2x32x256xbf16, #tpu.memory_space<vmem>>) attributes {dimension_semantics = [#tpu.dimension_semantics<arbitrary>], iteration_bounds = array<i64: 1>, scalar_prefetch = 0 : i64, scratch_operands = 0 : i64, tpu.core_type = #tpu.core_type<tc>, window_params = [{pipeline_mode = #tpu.pipeline_mode<synchronous>, transform_indices = @transform_0, window_bounds = array<i64: 2, 320, 256>}, {pipeline_mode = #tpu.pipeline_mode<synchronous>, transform_indices = @transform_1, window_bounds = array<i64: 32, 320>}, {pipeline_mode = #tpu.pipeline_mode<synchronous>, transform_indices = @transform_2, window_bounds = array<i64: 32, 256>}, {pipeline_mode = #tpu.pipeline_mode<synchronous>, transform_indices = @transform_3, window_bounds = array<i64: 2, 32, 256>}]} {
    %c0 = arith.constant 0 : index
    %c0_0 = arith.constant 0 : index
    %0 = vector.load %arg2[%c0, %c0_0] : memref<32x320xbf16, #tpu.memory_space<vmem>>, vector<32x320xbf16>
    %c0_1 = arith.constant 0 : index
    %c0_2 = arith.constant 0 : index
    %1 = vector.load %arg3[%c0_1, %c0_2] : memref<32x256xf32, #tpu.memory_space<vmem>>, vector<32x256xf32>
    %c0_3 = arith.constant 0 : index
    %c0_4 = arith.constant 0 : index
    %c0_5 = arith.constant 0 : index
    %2 = vector.load %arg1[%c0_3, %c0_4, %c0_5] : memref<2x320x256xbf16, #tpu.memory_space<vmem>>, vector<1x320x256xbf16>
    %3 = vector.shape_cast %2 : vector<1x320x256xbf16> to vector<320x256xbf16>
    %cst = arith.constant dense<0.000000e+00> : vector<32x256xf32>
    %4 = tpu.matmul %0, %3, %cst {dimension_numbers = #tpu.dot_dimension_numbers<[1], [0], [0], [1], [0, 0, 1, 1], [], []>} : vector<32x320xbf16>, vector<320x256xbf16>, vector<32x256xf32> -> vector<32x256xf32>
    %5 = arith.addf %4, %1 : vector<32x256xf32>
    %6 = arith.truncf %5 : vector<32x256xf32> to vector<32x256xbf16>
    %c0_6 = arith.constant 0 : index
    %c0_7 = arith.constant 0 : index
    %c0_8 = arith.constant 0 : index
    %7 = vector.load %arg4[%c0_6, %c0_7, %c0_8] : memref<2x32x256xbf16, #tpu.memory_space<vmem>>, vector<1x32x256xbf16>
    %8 = vector.shape_cast %7 : vector<1x32x256xbf16> to vector<32x256xbf16>
    %9 = vector.shape_cast %6 : vector<32x256xbf16> to vector<1x32x256xbf16>
    tpu.vector_store %arg4[%c0_6, %c0_7, %c0_8], %9 {strides = array<i32>} : memref<2x32x256xbf16, #tpu.memory_space<vmem>>, vector<1x32x256xbf16>,
    %c1 = arith.constant 1 : index
    %c0_9 = arith.constant 0 : index
    %c0_10 = arith.constant 0 : index
    %10 = vector.load %arg1[%c1, %c0_9, %c0_10] : memref<2x320x256xbf16, #tpu.memory_space<vmem>>, vector<1x320x256xbf16>
    %11 = vector.shape_cast %10 : vector<1x320x256xbf16> to vector<320x256xbf16>
    %cst_11 = arith.constant dense<0.000000e+00> : vector<32x256xf32>
    %12 = tpu.matmul %0, %11, %cst_11 {dimension_numbers = #tpu.dot_dimension_numbers<[1], [0], [0], [1], [0, 0, 1, 1], [], []>} : vector<32x320xbf16>, vector<320x256xbf16>, vector<32x256xf32> -> vector<32x256xf32>
    %13 = arith.addf %12, %1 : vector<32x256xf32>
    %14 = arith.truncf %13 : vector<32x256xf32> to vector<32x256xbf16>
    %c1_12 = arith.constant 1 : index
    %c0_13 = arith.constant 0 : index
    %c0_14 = arith.constant 0 : index
    %15 = vector.load %arg4[%c1_12, %c0_13, %c0_14] : memref<2x32x256xbf16, #tpu.memory_space<vmem>>, vector<1x32x256xbf16>
    %16 = vector.shape_cast %15 : vector<1x32x256xbf16> to vector<32x256xbf16>
    %17 = vector.shape_cast %14 : vector<32x256xbf16> to vector<1x32x256xbf16>
    tpu.vector_store %arg4[%c1_12, %c0_13, %c0_14], %17 {strides = array<i32>} : memref<2x32x256xbf16, #tpu.memory_space<vmem>>, vector<1x32x256xbf16>,
    return
  }
  func.func @transform_0(%arg0: i32) -> (i32, i32, i32) {
    %c0_i32 = arith.constant 0 : i32
    %c0_i32_0 = arith.constant 0 : i32
    %c0_i32_1 = arith.constant 0 : i32
    %c0_i32_2 = arith.constant 0 : i32
    return %c0_i32, %c0_i32_0, %c0_i32_1 : i32, i32, i32
  }
  func.func @transform_1(%arg0: i32) -> (i32, i32) {
    %c0_i32 = arith.constant 0 : i32
    %c0_i32_0 = arith.constant 0 : i32
    %c0_i32_1 = arith.constant 0 : i32
    return %c0_i32, %c0_i32_0 : i32, i32
  }
  func.func @transform_2(%arg0: i32) -> (i32, i32) {
    %c0_i32 = arith.constant 0 : i32
    %c0_i32_0 = arith.constant 0 : i32
    %c0_i32_1 = arith.constant 0 : i32
    return %c0_i32, %c0_i32_0 : i32, i32
  }
  func.func @transform_3(%arg0: i32) -> (i32, i32, i32) {
    %c0_i32 = arith.constant 0 : i32
    %c0_i32_0 = arith.constant 0 : i32
    %c0_i32_1 = arith.constant 0 : i32
    %c0_i32_2 = arith.constant 0 : i32
    return %c0_i32, %c0_i32_0, %c0_i32_1 : i32, i32, i32
  }
}

module attributes {stable_mosaic.version = 11 : i64} {
  func.func @_conv_kernel(%arg0: i32, %arg1: memref<2x288x64xbf16, #tpu.memory_space<vmem>>, %arg2: memref<32x288xbf16, #tpu.memory_space<vmem>>, %arg3: memref<32x64xf32, #tpu.memory_space<vmem>>, %arg4: memref<2x32x64xbf16, #tpu.memory_space<vmem>>) attributes {dimension_semantics = [#tpu.dimension_semantics<arbitrary>], iteration_bounds = array<i64: 1>, scalar_prefetch = 0 : i64, scratch_operands = 0 : i64, tpu.core_type = #tpu.core_type<tc>, window_params = [{pipeline_mode = #tpu.pipeline_mode<synchronous>, transform_indices = @transform_0, window_bounds = array<i64: 2, 288, 64>}, {pipeline_mode = #tpu.pipeline_mode<synchronous>, transform_indices = @transform_1, window_bounds = array<i64: 32, 288>}, {pipeline_mode = #tpu.pipeline_mode<synchronous>, transform_indices = @transform_2, window_bounds = array<i64: 32, 64>}, {pipeline_mode = #tpu.pipeline_mode<synchronous>, transform_indices = @transform_3, window_bounds = array<i64: 2, 32, 64>}]} {
    %c0 = arith.constant 0 : index
    %c0_0 = arith.constant 0 : index
    %0 = vector.load %arg2[%c0, %c0_0] : memref<32x288xbf16, #tpu.memory_space<vmem>>, vector<32x288xbf16>
    %c0_1 = arith.constant 0 : index
    %c0_2 = arith.constant 0 : index
    %1 = vector.load %arg3[%c0_1, %c0_2] : memref<32x64xf32, #tpu.memory_space<vmem>>, vector<32x64xf32>
    %c0_3 = arith.constant 0 : index
    %c0_4 = arith.constant 0 : index
    %c0_5 = arith.constant 0 : index
    %2 = vector.load %arg1[%c0_3, %c0_4, %c0_5] : memref<2x288x64xbf16, #tpu.memory_space<vmem>>, vector<1x288x64xbf16>
    %3 = vector.shape_cast %2 : vector<1x288x64xbf16> to vector<288x64xbf16>
    %cst = arith.constant dense<0.000000e+00> : vector<32x64xf32>
    %4 = tpu.matmul %0, %3, %cst {dimension_numbers = #tpu.dot_dimension_numbers<[1], [0], [0], [1], [0, 0, 1, 1], [], []>} : vector<32x288xbf16>, vector<288x64xbf16>, vector<32x64xf32> -> vector<32x64xf32>
    %5 = arith.addf %4, %1 : vector<32x64xf32>
    %cst_6 = arith.constant dense<0.000000e+00> : vector<32xf32>
    %6 = vector.multi_reduction <add>, %5, %cst_6 [1] : vector<32x64xf32> to vector<32xf32>
    %7 = vector.shape_cast %6 : vector<32xf32> to vector<32x1xf32>
    %cst_7 = arith.constant 6.400000e+01 : f32
    %8 = vector.broadcast %cst_7 : f32 to vector<32x1xf32>
    %9 = arith.divf %7, %8 : vector<32x1xf32>
    %10 = vector.broadcast %9 : vector<32x1xf32> to vector<32x64xf32>
    %11 = arith.subf %5, %10 : vector<32x64xf32>
    %12 = arith.mulf %11, %11 : vector<32x64xf32>
    %cst_8 = arith.constant dense<0.000000e+00> : vector<32xf32>
    %13 = vector.multi_reduction <add>, %12, %cst_8 [1] : vector<32x64xf32> to vector<32xf32>
    %14 = vector.shape_cast %13 : vector<32xf32> to vector<32x1xf32>
    %cst_9 = arith.constant 6.400000e+01 : f32
    %15 = vector.broadcast %cst_9 : f32 to vector<32x1xf32>
    %16 = arith.divf %14, %15 : vector<32x1xf32>
    %17 = vector.broadcast %9 : vector<32x1xf32> to vector<32x64xf32>
    %18 = arith.subf %5, %17 : vector<32x64xf32>
    %cst_10 = arith.constant 9.99999974E-6 : f32
    %19 = vector.broadcast %cst_10 : f32 to vector<32x1xf32>
    %20 = arith.addf %16, %19 : vector<32x1xf32>
    %21 = math.rsqrt %20 : vector<32x1xf32>
    %22 = vector.broadcast %21 : vector<32x1xf32> to vector<32x64xf32>
    %23 = arith.mulf %18, %22 : vector<32x64xf32>
    %cst_11 = arith.constant 0.000000e+00 : f32
    %24 = vector.broadcast %cst_11 : f32 to vector<32x64xf32>
    %25 = arith.cmpf oge, %23, %24 : vector<32x64xf32>
    %cst_12 = arith.constant 2.000000e-01 : f32
    %26 = vector.broadcast %cst_12 : f32 to vector<32x64xf32>
    %27 = arith.mulf %26, %23 : vector<32x64xf32>
    %28 = arith.select %25, %23, %27 : vector<32x64xi1>, vector<32x64xf32>
    %29 = arith.truncf %28 : vector<32x64xf32> to vector<32x64xbf16>
    %c0_13 = arith.constant 0 : index
    %c0_14 = arith.constant 0 : index
    %c0_15 = arith.constant 0 : index
    %30 = vector.load %arg4[%c0_13, %c0_14, %c0_15] : memref<2x32x64xbf16, #tpu.memory_space<vmem>>, vector<1x32x64xbf16>
    %31 = vector.shape_cast %30 : vector<1x32x64xbf16> to vector<32x64xbf16>
    %32 = vector.shape_cast %29 : vector<32x64xbf16> to vector<1x32x64xbf16>
    tpu.vector_store %arg4[%c0_13, %c0_14, %c0_15], %32 {strides = array<i32>} : memref<2x32x64xbf16, #tpu.memory_space<vmem>>, vector<1x32x64xbf16>,
    %c1 = arith.constant 1 : index
    %c0_16 = arith.constant 0 : index
    %c0_17 = arith.constant 0 : index
    %33 = vector.load %arg1[%c1, %c0_16, %c0_17] : memref<2x288x64xbf16, #tpu.memory_space<vmem>>, vector<1x288x64xbf16>
    %34 = vector.shape_cast %33 : vector<1x288x64xbf16> to vector<288x64xbf16>
    %cst_18 = arith.constant dense<0.000000e+00> : vector<32x64xf32>
    %35 = tpu.matmul %0, %34, %cst_18 {dimension_numbers = #tpu.dot_dimension_numbers<[1], [0], [0], [1], [0, 0, 1, 1], [], []>} : vector<32x288xbf16>, vector<288x64xbf16>, vector<32x64xf32> -> vector<32x64xf32>
    %36 = arith.addf %35, %1 : vector<32x64xf32>
    %cst_19 = arith.constant dense<0.000000e+00> : vector<32xf32>
    %37 = vector.multi_reduction <add>, %36, %cst_19 [1] : vector<32x64xf32> to vector<32xf32>
    %38 = vector.shape_cast %37 : vector<32xf32> to vector<32x1xf32>
    %cst_20 = arith.constant 6.400000e+01 : f32
    %39 = vector.broadcast %cst_20 : f32 to vector<32x1xf32>
    %40 = arith.divf %38, %39 : vector<32x1xf32>
    %41 = vector.broadcast %40 : vector<32x1xf32> to vector<32x64xf32>
    %42 = arith.subf %36, %41 : vector<32x64xf32>
    %43 = arith.mulf %42, %42 : vector<32x64xf32>
    %cst_21 = arith.constant dense<0.000000e+00> : vector<32xf32>
    %44 = vector.multi_reduction <add>, %43, %cst_21 [1] : vector<32x64xf32> to vector<32xf32>
    %45 = vector.shape_cast %44 : vector<32xf32> to vector<32x1xf32>
    %cst_22 = arith.constant 6.400000e+01 : f32
    %46 = vector.broadcast %cst_22 : f32 to vector<32x1xf32>
    %47 = arith.divf %45, %46 : vector<32x1xf32>
    %48 = vector.broadcast %40 : vector<32x1xf32> to vector<32x64xf32>
    %49 = arith.subf %36, %48 : vector<32x64xf32>
    %cst_23 = arith.constant 9.99999974E-6 : f32
    %50 = vector.broadcast %cst_23 : f32 to vector<32x1xf32>
    %51 = arith.addf %47, %50 : vector<32x1xf32>
    %52 = math.rsqrt %51 : vector<32x1xf32>
    %53 = vector.broadcast %52 : vector<32x1xf32> to vector<32x64xf32>
    %54 = arith.mulf %49, %53 : vector<32x64xf32>
    %cst_24 = arith.constant 0.000000e+00 : f32
    %55 = vector.broadcast %cst_24 : f32 to vector<32x64xf32>
    %56 = arith.cmpf oge, %54, %55 : vector<32x64xf32>
    %cst_25 = arith.constant 2.000000e-01 : f32
    %57 = vector.broadcast %cst_25 : f32 to vector<32x64xf32>
    %58 = arith.mulf %57, %54 : vector<32x64xf32>
    %59 = arith.select %56, %54, %58 : vector<32x64xi1>, vector<32x64xf32>
    %60 = arith.truncf %59 : vector<32x64xf32> to vector<32x64xbf16>
    %c1_26 = arith.constant 1 : index
    %c0_27 = arith.constant 0 : index
    %c0_28 = arith.constant 0 : index
    %61 = vector.load %arg4[%c1_26, %c0_27, %c0_28] : memref<2x32x64xbf16, #tpu.memory_space<vmem>>, vector<1x32x64xbf16>
    %62 = vector.shape_cast %61 : vector<1x32x64xbf16> to vector<32x64xbf16>
    %63 = vector.shape_cast %60 : vector<32x64xbf16> to vector<1x32x64xbf16>
    tpu.vector_store %arg4[%c1_26, %c0_27, %c0_28], %63 {strides = array<i32>} : memref<2x32x64xbf16, #tpu.memory_space<vmem>>, vector<1x32x64xbf16>,
    return
  }
  func.func @transform_0(%arg0: i32) -> (i32, i32, i32) {
    %c0_i32 = arith.constant 0 : i32
    %c0_i32_0 = arith.constant 0 : i32
    %c0_i32_1 = arith.constant 0 : i32
    %c0_i32_2 = arith.constant 0 : i32
    return %c0_i32, %c0_i32_0, %c0_i32_1 : i32, i32, i32
  }
  func.func @transform_1(%arg0: i32) -> (i32, i32) {
    %c0_i32 = arith.constant 0 : i32
    %c0_i32_0 = arith.constant 0 : i32
    %c0_i32_1 = arith.constant 0 : i32
    return %c0_i32, %c0_i32_0 : i32, i32
  }
  func.func @transform_2(%arg0: i32) -> (i32, i32) {
    %c0_i32 = arith.constant 0 : i32
    %c0_i32_0 = arith.constant 0 : i32
    %c0_i32_1 = arith.constant 0 : i32
    return %c0_i32, %c0_i32_0 : i32, i32
  }
  func.func @transform_3(%arg0: i32) -> (i32, i32, i32) {
    %c0_i32 = arith.constant 0 : i32
    %c0_i32_0 = arith.constant 0 : i32
    %c0_i32_1 = arith.constant 0 : i32
    %c0_i32_2 = arith.constant 0 : i32
    return %c0_i32, %c0_i32_0, %c0_i32_1 : i32, i32, i32
  }
}

module attributes {stable_mosaic.version = 11 : i64} {
  func.func @_conv_kernel(%arg0: i32, %arg1: memref<2x320x64xbf16, #tpu.memory_space<vmem>>, %arg2: memref<32x320xbf16, #tpu.memory_space<vmem>>, %arg3: memref<32x64xf32, #tpu.memory_space<vmem>>, %arg4: memref<2x32x64xbf16, #tpu.memory_space<vmem>>) attributes {dimension_semantics = [#tpu.dimension_semantics<arbitrary>], iteration_bounds = array<i64: 1>, scalar_prefetch = 0 : i64, scratch_operands = 0 : i64, tpu.core_type = #tpu.core_type<tc>, window_params = [{pipeline_mode = #tpu.pipeline_mode<synchronous>, transform_indices = @transform_0, window_bounds = array<i64: 2, 320, 64>}, {pipeline_mode = #tpu.pipeline_mode<synchronous>, transform_indices = @transform_1, window_bounds = array<i64: 32, 320>}, {pipeline_mode = #tpu.pipeline_mode<synchronous>, transform_indices = @transform_2, window_bounds = array<i64: 32, 64>}, {pipeline_mode = #tpu.pipeline_mode<synchronous>, transform_indices = @transform_3, window_bounds = array<i64: 2, 32, 64>}]} {
    %c0 = arith.constant 0 : index
    %c0_0 = arith.constant 0 : index
    %0 = vector.load %arg2[%c0, %c0_0] : memref<32x320xbf16, #tpu.memory_space<vmem>>, vector<32x320xbf16>
    %c0_1 = arith.constant 0 : index
    %c0_2 = arith.constant 0 : index
    %1 = vector.load %arg3[%c0_1, %c0_2] : memref<32x64xf32, #tpu.memory_space<vmem>>, vector<32x64xf32>
    %c0_3 = arith.constant 0 : index
    %c0_4 = arith.constant 0 : index
    %c0_5 = arith.constant 0 : index
    %2 = vector.load %arg1[%c0_3, %c0_4, %c0_5] : memref<2x320x64xbf16, #tpu.memory_space<vmem>>, vector<1x320x64xbf16>
    %3 = vector.shape_cast %2 : vector<1x320x64xbf16> to vector<320x64xbf16>
    %cst = arith.constant dense<0.000000e+00> : vector<32x64xf32>
    %4 = tpu.matmul %0, %3, %cst {dimension_numbers = #tpu.dot_dimension_numbers<[1], [0], [0], [1], [0, 0, 1, 1], [], []>} : vector<32x320xbf16>, vector<320x64xbf16>, vector<32x64xf32> -> vector<32x64xf32>
    %5 = arith.addf %4, %1 : vector<32x64xf32>
    %6 = arith.truncf %5 : vector<32x64xf32> to vector<32x64xbf16>
    %c0_6 = arith.constant 0 : index
    %c0_7 = arith.constant 0 : index
    %c0_8 = arith.constant 0 : index
    %7 = vector.load %arg4[%c0_6, %c0_7, %c0_8] : memref<2x32x64xbf16, #tpu.memory_space<vmem>>, vector<1x32x64xbf16>
    %8 = vector.shape_cast %7 : vector<1x32x64xbf16> to vector<32x64xbf16>
    %9 = vector.shape_cast %6 : vector<32x64xbf16> to vector<1x32x64xbf16>
    tpu.vector_store %arg4[%c0_6, %c0_7, %c0_8], %9 {strides = array<i32>} : memref<2x32x64xbf16, #tpu.memory_space<vmem>>, vector<1x32x64xbf16>,
    %c1 = arith.constant 1 : index
    %c0_9 = arith.constant 0 : index
    %c0_10 = arith.constant 0 : index
    %10 = vector.load %arg1[%c1, %c0_9, %c0_10] : memref<2x320x64xbf16, #tpu.memory_space<vmem>>, vector<1x320x64xbf16>
    %11 = vector.shape_cast %10 : vector<1x320x64xbf16> to vector<320x64xbf16>
    %cst_11 = arith.constant dense<0.000000e+00> : vector<32x64xf32>
    %12 = tpu.matmul %0, %11, %cst_11 {dimension_numbers = #tpu.dot_dimension_numbers<[1], [0], [0], [1], [0, 0, 1, 1], [], []>} : vector<32x320xbf16>, vector<320x64xbf16>, vector<32x64xf32> -> vector<32x64xf32>
    %13 = arith.addf %12, %1 : vector<32x64xf32>
    %14 = arith.truncf %13 : vector<32x64xf32> to vector<32x64xbf16>
    %c1_12 = arith.constant 1 : index
    %c0_13 = arith.constant 0 : index
    %c0_14 = arith.constant 0 : index
    %15 = vector.load %arg4[%c1_12, %c0_13, %c0_14] : memref<2x32x64xbf16, #tpu.memory_space<vmem>>, vector<1x32x64xbf16>
    %16 = vector.shape_cast %15 : vector<1x32x64xbf16> to vector<32x64xbf16>
    %17 = vector.shape_cast %14 : vector<32x64xbf16> to vector<1x32x64xbf16>
    tpu.vector_store %arg4[%c1_12, %c0_13, %c0_14], %17 {strides = array<i32>} : memref<2x32x64xbf16, #tpu.memory_space<vmem>>, vector<1x32x64xbf16>,
    return
  }
  func.func @transform_0(%arg0: i32) -> (i32, i32, i32) {
    %c0_i32 = arith.constant 0 : i32
    %c0_i32_0 = arith.constant 0 : i32
    %c0_i32_1 = arith.constant 0 : i32
    %c0_i32_2 = arith.constant 0 : i32
    return %c0_i32, %c0_i32_0, %c0_i32_1 : i32, i32, i32
  }
  func.func @transform_1(%arg0: i32) -> (i32, i32) {
    %c0_i32 = arith.constant 0 : i32
    %c0_i32_0 = arith.constant 0 : i32
    %c0_i32_1 = arith.constant 0 : i32
    return %c0_i32, %c0_i32_0 : i32, i32
  }
  func.func @transform_2(%arg0: i32) -> (i32, i32) {
    %c0_i32 = arith.constant 0 : i32
    %c0_i32_0 = arith.constant 0 : i32
    %c0_i32_1 = arith.constant 0 : i32
    return %c0_i32, %c0_i32_0 : i32, i32
  }
  func.func @transform_3(%arg0: i32) -> (i32, i32, i32) {
    %c0_i32 = arith.constant 0 : i32
    %c0_i32_0 = arith.constant 0 : i32
    %c0_i32_1 = arith.constant 0 : i32
    %c0_i32_2 = arith.constant 0 : i32
    return %c0_i32, %c0_i32_0, %c0_i32_1 : i32, i32, i32
  }
}

module attributes {stable_mosaic.version = 11 : i64} {
  func.func @_conv_kernel(%arg0: i32, %arg1: memref<4x288x256xbf16, #tpu.memory_space<vmem>>, %arg2: memref<8x288xbf16, #tpu.memory_space<vmem>>, %arg3: memref<8x256xf32, #tpu.memory_space<vmem>>, %arg4: memref<4x8x256xf32, #tpu.memory_space<vmem>>) attributes {dimension_semantics = [#tpu.dimension_semantics<arbitrary>], iteration_bounds = array<i64: 1>, scalar_prefetch = 0 : i64, scratch_operands = 0 : i64, tpu.core_type = #tpu.core_type<tc>, window_params = [{pipeline_mode = #tpu.pipeline_mode<synchronous>, transform_indices = @transform_0, window_bounds = array<i64: 4, 288, 256>}, {pipeline_mode = #tpu.pipeline_mode<synchronous>, transform_indices = @transform_1, window_bounds = array<i64: 8, 288>}, {pipeline_mode = #tpu.pipeline_mode<synchronous>, transform_indices = @transform_2, window_bounds = array<i64: 8, 256>}, {pipeline_mode = #tpu.pipeline_mode<synchronous>, transform_indices = @transform_3, window_bounds = array<i64: 4, 8, 256>}]} {
    %c0 = arith.constant 0 : index
    %c0_0 = arith.constant 0 : index
    %0 = vector.load %arg2[%c0, %c0_0] : memref<8x288xbf16, #tpu.memory_space<vmem>>, vector<8x288xbf16>
    %c0_1 = arith.constant 0 : index
    %c0_2 = arith.constant 0 : index
    %1 = vector.load %arg3[%c0_1, %c0_2] : memref<8x256xf32, #tpu.memory_space<vmem>>, vector<8x256xf32>
    %c0_3 = arith.constant 0 : index
    %c0_4 = arith.constant 0 : index
    %c0_5 = arith.constant 0 : index
    %2 = vector.load %arg1[%c0_3, %c0_4, %c0_5] : memref<4x288x256xbf16, #tpu.memory_space<vmem>>, vector<1x288x256xbf16>
    %3 = vector.shape_cast %2 : vector<1x288x256xbf16> to vector<288x256xbf16>
    %cst = arith.constant dense<0.000000e+00> : vector<8x256xf32>
    %4 = tpu.matmul %0, %3, %cst {dimension_numbers = #tpu.dot_dimension_numbers<[1], [0], [0], [1], [0, 0, 1, 1], [], []>} : vector<8x288xbf16>, vector<288x256xbf16>, vector<8x256xf32> -> vector<8x256xf32>
    %5 = arith.addf %4, %1 : vector<8x256xf32>
    %cst_6 = arith.constant dense<0.000000e+00> : vector<8xf32>
    %6 = vector.multi_reduction <add>, %5, %cst_6 [1] : vector<8x256xf32> to vector<8xf32>
    %7 = vector.shape_cast %6 : vector<8xf32> to vector<8x1xf32>
    %cst_7 = arith.constant 2.560000e+02 : f32
    %8 = vector.broadcast %cst_7 : f32 to vector<8x1xf32>
    %9 = arith.divf %7, %8 : vector<8x1xf32>
    %10 = vector.broadcast %9 : vector<8x1xf32> to vector<8x256xf32>
    %11 = arith.subf %5, %10 : vector<8x256xf32>
    %12 = arith.mulf %11, %11 : vector<8x256xf32>
    %cst_8 = arith.constant dense<0.000000e+00> : vector<8xf32>
    %13 = vector.multi_reduction <add>, %12, %cst_8 [1] : vector<8x256xf32> to vector<8xf32>
    %14 = vector.shape_cast %13 : vector<8xf32> to vector<8x1xf32>
    %cst_9 = arith.constant 2.560000e+02 : f32
    %15 = vector.broadcast %cst_9 : f32 to vector<8x1xf32>
    %16 = arith.divf %14, %15 : vector<8x1xf32>
    %17 = vector.broadcast %9 : vector<8x1xf32> to vector<8x256xf32>
    %18 = arith.subf %5, %17 : vector<8x256xf32>
    %cst_10 = arith.constant 9.99999974E-6 : f32
    %19 = vector.broadcast %cst_10 : f32 to vector<8x1xf32>
    %20 = arith.addf %16, %19 : vector<8x1xf32>
    %21 = math.rsqrt %20 : vector<8x1xf32>
    %22 = vector.broadcast %21 : vector<8x1xf32> to vector<8x256xf32>
    %23 = arith.mulf %18, %22 : vector<8x256xf32>
    %cst_11 = arith.constant 0.000000e+00 : f32
    %24 = vector.broadcast %cst_11 : f32 to vector<8x256xf32>
    %25 = arith.cmpf oge, %23, %24 : vector<8x256xf32>
    %cst_12 = arith.constant 2.000000e-01 : f32
    %26 = vector.broadcast %cst_12 : f32 to vector<8x256xf32>
    %27 = arith.mulf %26, %23 : vector<8x256xf32>
    %28 = arith.select %25, %23, %27 : vector<8x256xi1>, vector<8x256xf32>
    %c0_13 = arith.constant 0 : index
    %c0_14 = arith.constant 0 : index
    %c0_15 = arith.constant 0 : index
    %29 = vector.load %arg4[%c0_13, %c0_14, %c0_15] : memref<4x8x256xf32, #tpu.memory_space<vmem>>, vector<1x8x256xf32>
    %30 = vector.shape_cast %29 : vector<1x8x256xf32> to vector<8x256xf32>
    %31 = vector.shape_cast %28 : vector<8x256xf32> to vector<1x8x256xf32>
    tpu.vector_store %arg4[%c0_13, %c0_14, %c0_15], %31 {strides = array<i32>} : memref<4x8x256xf32, #tpu.memory_space<vmem>>, vector<1x8x256xf32>,
    %c1 = arith.constant 1 : index
    %c0_16 = arith.constant 0 : index
    %c0_17 = arith.constant 0 : index
    %32 = vector.load %arg1[%c1, %c0_16, %c0_17] : memref<4x288x256xbf16, #tpu.memory_space<vmem>>, vector<1x288x256xbf16>
    %33 = vector.shape_cast %32 : vector<1x288x256xbf16> to vector<288x256xbf16>
    %cst_18 = arith.constant dense<0.000000e+00> : vector<8x256xf32>
    %34 = tpu.matmul %0, %33, %cst_18 {dimension_numbers = #tpu.dot_dimension_numbers<[1], [0], [0], [1], [0, 0, 1, 1], [], []>} : vector<8x288xbf16>, vector<288x256xbf16>, vector<8x256xf32> -> vector<8x256xf32>
    %35 = arith.addf %34, %1 : vector<8x256xf32>
    %cst_19 = arith.constant dense<0.000000e+00> : vector<8xf32>
    %36 = vector.multi_reduction <add>, %35, %cst_19 [1] : vector<8x256xf32> to vector<8xf32>
    %37 = vector.shape_cast %36 : vector<8xf32> to vector<8x1xf32>
    %cst_20 = arith.constant 2.560000e+02 : f32
    %38 = vector.broadcast %cst_20 : f32 to vector<8x1xf32>
    %39 = arith.divf %37, %38 : vector<8x1xf32>
    %40 = vector.broadcast %39 : vector<8x1xf32> to vector<8x256xf32>
    %41 = arith.subf %35, %40 : vector<8x256xf32>
    %42 = arith.mulf %41, %41 : vector<8x256xf32>
    %cst_21 = arith.constant dense<0.000000e+00> : vector<8xf32>
    %43 = vector.multi_reduction <add>, %42, %cst_21 [1] : vector<8x256xf32> to vector<8xf32>
    %44 = vector.shape_cast %43 : vector<8xf32> to vector<8x1xf32>
    %cst_22 = arith.constant 2.560000e+02 : f32
    %45 = vector.broadcast %cst_22 : f32 to vector<8x1xf32>
    %46 = arith.divf %44, %45 : vector<8x1xf32>
    %47 = vector.broadcast %39 : vector<8x1xf32> to vector<8x256xf32>
    %48 = arith.subf %35, %47 : vector<8x256xf32>
    %cst_23 = arith.constant 9.99999974E-6 : f32
    %49 = vector.broadcast %cst_23 : f32 to vector<8x1xf32>
    %50 = arith.addf %46, %49 : vector<8x1xf32>
    %51 = math.rsqrt %50 : vector<8x1xf32>
    %52 = vector.broadcast %51 : vector<8x1xf32> to vector<8x256xf32>
    %53 = arith.mulf %48, %52 : vector<8x256xf32>
    %cst_24 = arith.constant 0.000000e+00 : f32
    %54 = vector.broadcast %cst_24 : f32 to vector<8x256xf32>
    %55 = arith.cmpf oge, %53, %54 : vector<8x256xf32>
    %cst_25 = arith.constant 2.000000e-01 : f32
    %56 = vector.broadcast %cst_25 : f32 to vector<8x256xf32>
    %57 = arith.mulf %56, %53 : vector<8x256xf32>
    %58 = arith.select %55, %53, %57 : vector<8x256xi1>, vector<8x256xf32>
    %c1_26 = arith.constant 1 : index
    %c0_27 = arith.constant 0 : index
    %c0_28 = arith.constant 0 : index
    %59 = vector.load %arg4[%c1_26, %c0_27, %c0_28] : memref<4x8x256xf32, #tpu.memory_space<vmem>>, vector<1x8x256xf32>
    %60 = vector.shape_cast %59 : vector<1x8x256xf32> to vector<8x256xf32>
    %61 = vector.shape_cast %58 : vector<8x256xf32> to vector<1x8x256xf32>
    tpu.vector_store %arg4[%c1_26, %c0_27, %c0_28], %61 {strides = array<i32>} : memref<4x8x256xf32, #tpu.memory_space<vmem>>, vector<1x8x256xf32>,
    %c2 = arith.constant 2 : index
    %c0_29 = arith.constant 0 : index
    %c0_30 = arith.constant 0 : index
    %62 = vector.load %arg1[%c2, %c0_29, %c0_30] : memref<4x288x256xbf16, #tpu.memory_space<vmem>>, vector<1x288x256xbf16>
    %63 = vector.shape_cast %62 : vector<1x288x256xbf16> to vector<288x256xbf16>
    %cst_31 = arith.constant dense<0.000000e+00> : vector<8x256xf32>
    %64 = tpu.matmul %0, %63, %cst_31 {dimension_numbers = #tpu.dot_dimension_numbers<[1], [0], [0], [1], [0, 0, 1, 1], [], []>} : vector<8x288xbf16>, vector<288x256xbf16>, vector<8x256xf32> -> vector<8x256xf32>
    %65 = arith.addf %64, %1 : vector<8x256xf32>
    %cst_32 = arith.constant dense<0.000000e+00> : vector<8xf32>
    %66 = vector.multi_reduction <add>, %65, %cst_32 [1] : vector<8x256xf32> to vector<8xf32>
    %67 = vector.shape_cast %66 : vector<8xf32> to vector<8x1xf32>
    %cst_33 = arith.constant 2.560000e+02 : f32
    %68 = vector.broadcast %cst_33 : f32 to vector<8x1xf32>
    %69 = arith.divf %67, %68 : vector<8x1xf32>
    %70 = vector.broadcast %69 : vector<8x1xf32> to vector<8x256xf32>
    %71 = arith.subf %65, %70 : vector<8x256xf32>
    %72 = arith.mulf %71, %71 : vector<8x256xf32>
    %cst_34 = arith.constant dense<0.000000e+00> : vector<8xf32>
    %73 = vector.multi_reduction <add>, %72, %cst_34 [1] : vector<8x256xf32> to vector<8xf32>
    %74 = vector.shape_cast %73 : vector<8xf32> to vector<8x1xf32>
    %cst_35 = arith.constant 2.560000e+02 : f32
    %75 = vector.broadcast %cst_35 : f32 to vector<8x1xf32>
    %76 = arith.divf %74, %75 : vector<8x1xf32>
    %77 = vector.broadcast %69 : vector<8x1xf32> to vector<8x256xf32>
    %78 = arith.subf %65, %77 : vector<8x256xf32>
    %cst_36 = arith.constant 9.99999974E-6 : f32
    %79 = vector.broadcast %cst_36 : f32 to vector<8x1xf32>
    %80 = arith.addf %76, %79 : vector<8x1xf32>
    %81 = math.rsqrt %80 : vector<8x1xf32>
    %82 = vector.broadcast %81 : vector<8x1xf32> to vector<8x256xf32>
    %83 = arith.mulf %78, %82 : vector<8x256xf32>
    %cst_37 = arith.constant 0.000000e+00 : f32
    %84 = vector.broadcast %cst_37 : f32 to vector<8x256xf32>
    %85 = arith.cmpf oge, %83, %84 : vector<8x256xf32>
    %cst_38 = arith.constant 2.000000e-01 : f32
    %86 = vector.broadcast %cst_38 : f32 to vector<8x256xf32>
    %87 = arith.mulf %86, %83 : vector<8x256xf32>
    %88 = arith.select %85, %83, %87 : vector<8x256xi1>, vector<8x256xf32>
    %c2_39 = arith.constant 2 : index
    %c0_40 = arith.constant 0 : index
    %c0_41 = arith.constant 0 : index
    %89 = vector.load %arg4[%c2_39, %c0_40, %c0_41] : memref<4x8x256xf32, #tpu.memory_space<vmem>>, vector<1x8x256xf32>
    %90 = vector.shape_cast %89 : vector<1x8x256xf32> to vector<8x256xf32>
    %91 = vector.shape_cast %88 : vector<8x256xf32> to vector<1x8x256xf32>
    tpu.vector_store %arg4[%c2_39, %c0_40, %c0_41], %91 {strides = array<i32>} : memref<4x8x256xf32, #tpu.memory_space<vmem>>, vector<1x8x256xf32>,
    %c3 = arith.constant 3 : index
    %c0_42 = arith.constant 0 : index
    %c0_43 = arith.constant 0 : index
    %92 = vector.load %arg1[%c3, %c0_42, %c0_43] : memref<4x288x256xbf16, #tpu.memory_space<vmem>>, vector<1x288x256xbf16>
    %93 = vector.shape_cast %92 : vector<1x288x256xbf16> to vector<288x256xbf16>
    %cst_44 = arith.constant dense<0.000000e+00> : vector<8x256xf32>
    %94 = tpu.matmul %0, %93, %cst_44 {dimension_numbers = #tpu.dot_dimension_numbers<[1], [0], [0], [1], [0, 0, 1, 1], [], []>} : vector<8x288xbf16>, vector<288x256xbf16>, vector<8x256xf32> -> vector<8x256xf32>
    %95 = arith.addf %94, %1 : vector<8x256xf32>
    %cst_45 = arith.constant dense<0.000000e+00> : vector<8xf32>
    %96 = vector.multi_reduction <add>, %95, %cst_45 [1] : vector<8x256xf32> to vector<8xf32>
    %97 = vector.shape_cast %96 : vector<8xf32> to vector<8x1xf32>
    %cst_46 = arith.constant 2.560000e+02 : f32
    %98 = vector.broadcast %cst_46 : f32 to vector<8x1xf32>
    %99 = arith.divf %97, %98 : vector<8x1xf32>
    %100 = vector.broadcast %99 : vector<8x1xf32> to vector<8x256xf32>
    %101 = arith.subf %95, %100 : vector<8x256xf32>
    %102 = arith.mulf %101, %101 : vector<8x256xf32>
    %cst_47 = arith.constant dense<0.000000e+00> : vector<8xf32>
    %103 = vector.multi_reduction <add>, %102, %cst_47 [1] : vector<8x256xf32> to vector<8xf32>
    %104 = vector.shape_cast %103 : vector<8xf32> to vector<8x1xf32>
    %cst_48 = arith.constant 2.560000e+02 : f32
    %105 = vector.broadcast %cst_48 : f32 to vector<8x1xf32>
    %106 = arith.divf %104, %105 : vector<8x1xf32>
    %107 = vector.broadcast %99 : vector<8x1xf32> to vector<8x256xf32>
    %108 = arith.subf %95, %107 : vector<8x256xf32>
    %cst_49 = arith.constant 9.99999974E-6 : f32
    %109 = vector.broadcast %cst_49 : f32 to vector<8x1xf32>
    %110 = arith.addf %106, %109 : vector<8x1xf32>
    %111 = math.rsqrt %110 : vector<8x1xf32>
    %112 = vector.broadcast %111 : vector<8x1xf32> to vector<8x256xf32>
    %113 = arith.mulf %108, %112 : vector<8x256xf32>
    %cst_50 = arith.constant 0.000000e+00 : f32
    %114 = vector.broadcast %cst_50 : f32 to vector<8x256xf32>
    %115 = arith.cmpf oge, %113, %114 : vector<8x256xf32>
    %cst_51 = arith.constant 2.000000e-01 : f32
    %116 = vector.broadcast %cst_51 : f32 to vector<8x256xf32>
    %117 = arith.mulf %116, %113 : vector<8x256xf32>
    %118 = arith.select %115, %113, %117 : vector<8x256xi1>, vector<8x256xf32>
    %c3_52 = arith.constant 3 : index
    %c0_53 = arith.constant 0 : index
    %c0_54 = arith.constant 0 : index
    %119 = vector.load %arg4[%c3_52, %c0_53, %c0_54] : memref<4x8x256xf32, #tpu.memory_space<vmem>>, vector<1x8x256xf32>
    %120 = vector.shape_cast %119 : vector<1x8x256xf32> to vector<8x256xf32>
    %121 = vector.shape_cast %118 : vector<8x256xf32> to vector<1x8x256xf32>
    tpu.vector_store %arg4[%c3_52, %c0_53, %c0_54], %121 {strides = array<i32>} : memref<4x8x256xf32, #tpu.memory_space<vmem>>, vector<1x8x256xf32>,
    return
  }
  func.func @transform_0(%arg0: i32) -> (i32, i32, i32) {
    %c0_i32 = arith.constant 0 : i32
    %c0_i32_0 = arith.constant 0 : i32
    %c0_i32_1 = arith.constant 0 : i32
    %c0_i32_2 = arith.constant 0 : i32
    return %c0_i32, %c0_i32_0, %c0_i32_1 : i32, i32, i32
  }
  func.func @transform_1(%arg0: i32) -> (i32, i32) {
    %c0_i32 = arith.constant 0 : i32
    %c0_i32_0 = arith.constant 0 : i32
    %c0_i32_1 = arith.constant 0 : i32
    return %c0_i32, %c0_i32_0 : i32, i32
  }
  func.func @transform_2(%arg0: i32) -> (i32, i32) {
    %c0_i32 = arith.constant 0 : i32
    %c0_i32_0 = arith.constant 0 : i32
    %c0_i32_1 = arith.constant 0 : i32
    return %c0_i32, %c0_i32_0 : i32, i32
  }
  func.func @transform_3(%arg0: i32) -> (i32, i32, i32) {
    %c0_i32 = arith.constant 0 : i32
    %c0_i32_0 = arith.constant 0 : i32
    %c0_i32_1 = arith.constant 0 : i32
    %c0_i32_2 = arith.constant 0 : i32
    return %c0_i32, %c0_i32_0, %c0_i32_1 : i32, i32, i32
  }
}

</mosaic_0001>

<bundles_post_ra>
// kernel: refine_parsing_net_forward.7
= control target key start
LH: loop header
LB: loop body
LE: loop exit
PB: predicated region body
PF: predicated region fallthrough
CT: control target
= control target key end

     0   :  { %vm76_vm0 = vcmask 1043456   ;;  %v365_v2 = vmov 0   ;;  %vm72_vm1 = vcmask 588800   ;;  %s455_s0 = inlined_call_operand.vmem [shape: bf16[2,72,256], index: 0, kind: input, shape index: {}]   ;;  %s456_s1 = inlined_call_operand.vmem [shape: bf16[8,72], index: 1, kind: input, shape index: {}]   ;;  %s457_s2 = inlined_call_operand.vmem [shape: f32[8,256], index: 2, kind: input, shape index: {}]   ;;  %s458_s3 = inlined_call_operand.vmem [shape: bf16[2,8,256], index: 3, kind: output, shape index: {}]  }
   0x1   :  { %v26_v0 = vld [vmem:[%s455_s0 + $0x40] sm:$0xff]  ;;  %v315_v1 = vld [vmem:[%s455_s0 + $0x88] sm:$0xff]  ;;  %115 = vmatprep.mubr.bf16.mxu0 %v365_v2  ;;  %249 = vmatprep.mubr.bf16.mxu1 %v365_v2  ;;  %v337_v7 = vld [vmem:[%s455_s0 + $0x34] ss:$8 sps:$4 sm:$0xff]  }
   0x2   :  { %v303_v3 = vcombine.high %v26_v0, %v26_v0  ;;  %v325_v4 = vcombine.high %v315_v1, %v315_v1  ;;  %v302_v5 = vcombine.low %v26_v0, %v26_v0  ;;  %v324_v6 = vcombine.low %v315_v1, %v315_v1  ;;  %v339_v8 = vld [vmem:[%s455_s0 + $0x7c] ss:$8 sps:$4 sm:$0xff]   ;;  %v341_v11 = vld [vmem:[%s455_s0 + $0x30] ss:$8 sps:$4 sm:$0xff]   ;;  %v345_v14 = vld [vmem:[%s455_s0 + $0x6c] ss:$8 sps:$4 sm:$0xff]  }
   0x3   :  { %v342_v12 = vld [vmem:[%s455_s0 + $0x78] ss:$8 sps:$4 sm:$0xff]   ;;  %v343_v13 = vld [vmem:[%s455_s0 + $0x24] ss:$8 sps:$4 sm:$0xff]   ;;  %v348_v16 = vld [vmem:[%s455_s0 + $0x68] ss:$8 sps:$4 sm:$0xff]  }
   0x4   :  { %304 = vmatprep.subr.msk.bf16.mxu0 %vm76_vm0, %v303_v3  ;;  %326 = vmatprep.subr.msk.bf16.mxu1 %vm76_vm0, %v325_v4  ;;  %v78_v9 = vsel %vm76_vm0, %v302_v5, 0  ;;  %v212_v10 = vsel %vm76_vm0, %v324_v6, 0  ;;  %v347_v15 = vld [vmem:[%s455_s0 + $0x20] ss:$8 sps:$4 sm:$0xff]   ;;  %v349_v17 = vld [vmem:[%s455_s0 + $0x14] ss:$8 sps:$4 sm:$0xff]  }
   0x5   :  { %90 = vmatpush1.bf16.msra.mxu0 %v78_v9  ;;  %224 = vmatpush1.bf16.msra.mxu1 %v212_v10  ;;  %v351_v18 = vld [vmem:[%s455_s0 + $0x5c] ss:$8 sps:$4 sm:$0xff]   ;;  %v353_v19 = vld [vmem:[%s455_s0 + $0x10] ss:$8 sps:$4 sm:$0xff]   ;;  %v357_v22 = vld [vmem:[%s455_s0 + $0x4c] ss:$8 sps:$4 sm:$0xff]  }
   0x6   :  { %91 = vmatprep.subr.bf16.mxu0 %v337_v7  ;;  %225 = vmatprep.subr.bf16.mxu1 %v339_v8  ;;  %v354_v20 = vld [vmem:[%s455_s0 + $0x58] ss:$8 sps:$4 sm:$0xff]   ;;  %v355_v21 = vld [vmem:[%s455_s0 + $0x4] ss:$8 sps:$4 sm:$0xff]   ;;  %v360_v24 = vld [vmem:[%s455_s0 + $0x48] ss:$8 sps:$4 sm:$0xff]  }
   0x7   :  { %v359_v23 = vld [vmem:[%s455_s0] ss:$8 sps:$4 sm:$0xff]  }
   0x8   :  { %v15_v25 = vld [vmem:[%s456_s1] sm:$0xf]  ;;  %v17_v29 = vld [vmem:[%s457_s2 + $0x8] sm:$0xff] }
   0x9   :  { %92 = vmatpush1.bf16.msra.mxu0 %v341_v11  ;;  %226 = vmatpush1.bf16.msra.mxu1 %v342_v12  ;;  %v16_v26 = vld [vmem:[%s457_s2] sm:$0xff] }
   0xa   :  { %93 = vmatprep.subr.bf16.mxu0 %v343_v13  ;;  %227 = vmatprep.subr.bf16.mxu1 %v345_v14 }
   0xd   :  { %94 = vmatpush1.bf16.msra.mxu0 %v347_v15  ;;  %228 = vmatpush1.bf16.msra.mxu1 %v348_v16 }
   0xe   :  { %95 = vmatprep.subr.bf16.mxu0 %v349_v17  ;;  %229 = vmatprep.subr.bf16.mxu1 %v351_v18 }
  0x11   :  { %96 = vmatpush1.bf16.msra.mxu0 %v353_v19  ;;  %230 = vmatpush1.bf16.msra.mxu1 %v354_v20 }
  0x12   :  { %97 = vmatprep.subr.bf16.mxu0 %v355_v21  ;;  %231 = vmatprep.subr.bf16.mxu1 %v357_v22 }
  0x15   :  { %98 = vmatpush1.bf16.msra.mxu0 %v359_v23  ;;  %232 = vmatpush1.bf16.msra.mxu1 %v360_v24 }
  0x18   :  { %305 = vmatmul.mubr.msk.bf16.vlgmr.msra.gmra.mxu0 %vm72_vm1, %v15_v25  ;;  %327 = vmatmul.mubr.msk.bf16.vlgmr.msra.gmra.mxu1 %vm72_vm1, %v15_v25 }
  0xd8   :  { %v117_v27 = vpop.f32.mrf.mxu0  ;;  %v251_v28 = vpop.f32.mrf.mxu1 }
  0xd9   :  { %v118_v32 = vadd.f32 %v117_v27, %v16_v26  ;;  %v252_v36 = vadd.f32 %v251_v28, %v16_v26 }
  0xda   :  { %v119_v30 = vpop.f32.mrf.mxu0  ;;  %v253_v31 = vpop.f32.mrf.mxu1 }
  0xdb   :  { %v120_v33 = vadd.f32 %v119_v30, %v17_v29  ;;  %v254_v37 = vadd.f32 %v253_v31, %v17_v29 }
  0xdc   :  { %v121_v34 = vpop.f32.mrf.mxu0  ;;  %v255_v35 = vpop.f32.mrf.mxu1 }
  0xdd   :  { %v124_v38 = vadd.f32 %v120_v33, %v118_v32  ;;  %v258_v41 = vadd.f32 %v254_v37, %v252_v36 }
  0xde   :  { %v122_v39 = vpop.f32.mrf.mxu0  ;;  %v256_v40 = vpop.f32.mrf.mxu1 }
  0xdf   :  { %125 = vadd.xlane.f32.xlu0 %v124_v38 }
  0xe3   :  { %259 = vadd.xlane.f32.xlu0 %v258_v41 }
 0x168   :  { %v126_v42 = vpop.xlane.xlu0 %125 }
 0x169   :  { %v128_v43 = vmul.f32 0.00390625, %v126_v42 }
 0x16b   :  { %v129_v44 = vsub.f32 %v118_v32, %v128_v43  ;;  %v130_v45 = vsub.f32 %v120_v33, %v128_v43 }
 0x16c   :  { %v260_v46 = vpop.xlane.xlu0 %259 }
 0x16d   :  { %v261_v47 = vmul.f32 0.00390625, %v260_v46  ;;  %v131_v48 = vmul.f32 %v129_v44, %v129_v44  ;;  %v132_v49 = vmul.f32 %v130_v45, %v130_v45 }
 0x16f   :  { %v262_v50 = vsub.f32 %v252_v36, %v261_v47  ;;  %v263_v51 = vsub.f32 %v254_v37, %v261_v47  ;;  %v133_v52 = vadd.f32 %v132_v49, %v131_v48 }
 0x171   :  { %134 = vadd.xlane.f32.xlu1 %v133_v52  ;;  %v264_v53 = vmul.f32 %v262_v50, %v262_v50  ;;  %v265_v54 = vmul.f32 %v263_v51, %v263_v51 }
 0x173   :  { %v266_v55 = vadd.f32 %v265_v54, %v264_v53 }
 0x175   :  { %267 = vadd.xlane.f32.xlu1 %v266_v55 }
 0x1fa   :  { %v135_v56 = vpop.xlane.xlu1 %134 }
 0x1fb   :  { %v136_v57 = vmul.f32 0.00390625, %v135_v56 }
 0x1fd   :  { %v137_v58 = vadd.f32 1e-05, %v136_v57 }
 0x1fe   :  { %v268_v59 = vpop.xlane.xlu1 %267 }
 0x1ff   :  { %361 = vrsqrt.f32 %v137_v58  ;;  %v269_v60 = vmul.f32 0.00390625, %v268_v59 }
 0x201   :  { %v270_v61 = vadd.f32 1e-05, %v269_v60 }
 0x203   :  { %363 = vrsqrt.f32 %v270_v61 }
 0x20c   :  { %v362_v62 = vpop.eup %361 }
 0x20d   :  { %v139_v63 = vmul.f32 %v362_v62, %v129_v44  ;;  %v140_v0 = vmul.f32 %v362_v62, %v130_v45 }
 0x20f   :  { %vm141_vm2 = vcmp.ge.f32.partialorder %v139_v63, 0.0  ;;  %vm142_vm3 = vcmp.ge.f32.partialorder %v140_v0, 0.0  ;;  %v143_v1 = vmul.f32 0.2, %v139_v63  ;;  %v144_v2 = vmul.f32 0.2, %v140_v0 }
 0x210   :  { %v364_v3 = vpop.eup %363 }
 0x211   :  { %v145_v4 = vsel %vm141_vm2, %v139_v63, %v143_v1  ;;  %v146_v5 = vsel %vm142_vm3, %v140_v0, %v144_v2  ;;  %v272_v6 = vmul.f32 %v364_v3, %v262_v50  ;;  %v273_v7 = vmul.f32 %v364_v3, %v263_v51 }
 0x212   :  { %v330_v8 = vpack.c.bf16 %v146_v5, %v145_v4 }
 0x213   :  { %vm274_vm4 = vcmp.ge.f32.partialorder %v272_v6, 0.0  ;;  %vm275_vm5 = vcmp.ge.f32.partialorder %v273_v7, 0.0  ;;  %v276_v9 = vmul.f32 0.2, %v272_v6  ;;  %v277_v10 = vmul.f32 0.2, %v273_v7 }
 0x214   :  { %155 = vst [vmem:[%s458_s3] sm:$0xff] %v330_v8 }
 0x215   :  { %v278_v11 = vsel %vm274_vm4, %v272_v6, %v276_v9  ;;  %v279_v12 = vsel %vm275_vm5, %v273_v7, %v277_v10 }
 0x216   :  { %v331_v13 = vpack.c.bf16 %v279_v12, %v278_v11 }
 0x218   :  { %329 = vst [vmem:[%s458_s3 + $0x8] sm:$0xff] %v331_v13 }

// kernel: refine_parsing_net_forward.8
= control target key start
LH: loop header
LB: loop body
LE: loop exit
PB: predicated region body
PF: predicated region fallthrough
CT: control target
= control target key end

     0   :  { %v421_v1 = vmov 0   ;;  %vm97_vm0 = vcmask 654336   ;;  %s556_s0 = inlined_call_operand.vmem [shape: bf16[2,80,256], index: 0, kind: input, shape index: {}]   ;;  %s557_s1 = inlined_call_operand.vmem [shape: bf16[32,80], index: 1, kind: input, shape index: {}]   ;;  %s558_s2 = inlined_call_operand.vmem [shape: f32[32,256], index: 2, kind: input, shape index: {}]   ;;  %s559_s3 = inlined_call_operand.vmem [shape: bf16[2,32,256], index: 3, kind: output, shape index: {}]  }
   0x1   :  { %v389_v0 = vld [vmem:[%s556_s0 + $0x44] ss:$8 sps:$4 sm:$0xff]   ;;  %136 = vmatprep.mubr.bf16.mxu0 %v421_v1  ;;  %278 = vmatprep.mubr.bf16.mxu1 %v421_v1  ;;  %v391_v2 = vld [vmem:[%s556_s0 + $0x94] ss:$8 sps:$4 sm:$0xff]   ;;  %v393_v3 = vld [vmem:[%s556_s0 + $0x40] ss:$8 sps:$4 sm:$0xff]  }
   0x2   :  { %110 = vmatprep.subr.bf16.mxu0 %v389_v0  ;;  %v394_v4 = vld [vmem:[%s556_s0 + $0x90] ss:$8 sps:$4 sm:$0xff]   ;;  %252 = vmatprep.subr.bf16.mxu1 %v391_v2  ;;  %v395_v5 = vld [vmem:[%s556_s0 + $0x34] ss:$8 sps:$4 sm:$0xff]   ;;  %v397_v6 = vld [vmem:[%s556_s0 + $0x84] ss:$8 sps:$4 sm:$0xff]  }
   0x3   :  { %111 = vmatpush1.bf16.msra.mxu0 %v393_v3  ;;  %253 = vmatpush1.bf16.msra.mxu1 %v394_v4  ;;  %v399_v7 = vld [vmem:[%s556_s0 + $0x30] ss:$8 sps:$4 sm:$0xff]   ;;  %v400_v8 = vld [vmem:[%s556_s0 + $0x80] ss:$8 sps:$4 sm:$0xff]   ;;  %v401_v9 = vld [vmem:[%s556_s0 + $0x24] ss:$8 sps:$4 sm:$0xff]  }
   0x4   :  { %112 = vmatprep.subr.bf16.mxu0 %v395_v5  ;;  %254 = vmatprep.subr.bf16.mxu1 %v397_v6  ;;  %v403_v10 = vld [vmem:[%s556_s0 + $0x74] ss:$8 sps:$4 sm:$0xff]   ;;  %v405_v11 = vld [vmem:[%s556_s0 + $0x20] ss:$8 sps:$4 sm:$0xff]   ;;  %v406_v12 = vld [vmem:[%s556_s0 + $0x70] ss:$8 sps:$4 sm:$0xff]  }
   0x5   :  { %v407_v13 = vld [vmem:[%s556_s0 + $0x14] ss:$8 sps:$4 sm:$0xff]   ;;  %v409_v14 = vld [vmem:[%s556_s0 + $0x64] ss:$8 sps:$4 sm:$0xff]   ;;  %v411_v15 = vld [vmem:[%s556_s0 + $0x10] ss:$8 sps:$4 sm:$0xff]  }
   0x6   :  { %v412_v16 = vld [vmem:[%s556_s0 + $0x60] ss:$8 sps:$4 sm:$0xff]   ;;  %v413_v17 = vld [vmem:[%s556_s0 + $0x4] ss:$8 sps:$4 sm:$0xff]   ;;  %v415_v18 = vld [vmem:[%s556_s0 + $0x54] ss:$8 sps:$4 sm:$0xff]  }
   0x7   :  { %113 = vmatpush1.bf16.msra.mxu0 %v399_v7  ;;  %255 = vmatpush1.bf16.msra.mxu1 %v400_v8  ;;  %v417_v19 = vld [vmem:[%s556_s0] ss:$8 sps:$4 sm:$0xff]   ;;  %v418_v20 = vld [vmem:[%s556_s0 + $0x50] ss:$8 sps:$4 sm:$0xff]  }
   0x8   :  { %114 = vmatprep.subr.bf16.mxu0 %v401_v9  ;;  %256 = vmatprep.subr.bf16.mxu1 %v403_v10  ;;  %v419_v21 = vld [vmem:[%s557_s1] sm:$0xff]   ;;  %v420_v22 = vld [vmem:[%s557_s1 + $0x8] sm:$0xff]   ;;  %v21_v33 = vld [vmem:[%s558_s2 + $0x10] sm:$0xff] }
   0x9   :  { %v19_v23 = vld [vmem:[%s558_s2] sm:$0xff]  ;;  %v20_v26 = vld [vmem:[%s558_s2 + $0x8] sm:$0xff]  ;;  %v22_v36 = vld [vmem:[%s558_s2 + $0x18] sm:$0xff] }
   0xa   :  { %v23_v45 = vld [vmem:[%s558_s2 + $0x20] sm:$0xff]  ;;  %v24_v48 = vld [vmem:[%s558_s2 + $0x28] sm:$0xff]  ;;  %v25_v57 = vld [vmem:[%s558_s2 + $0x30] sm:$0xff] }
   0xb   :  { %115 = vmatpush1.bf16.msra.mxu0 %v405_v11  ;;  %257 = vmatpush1.bf16.msra.mxu1 %v406_v12  ;;  %v26_v60 = vld [vmem:[%s558_s2 + $0x38] sm:$0xff] }
   0xc   :  { %116 = vmatprep.subr.bf16.mxu0 %v407_v13  ;;  %258 = vmatprep.subr.bf16.mxu1 %v409_v14 }
   0xf   :  { %117 = vmatpush1.bf16.msra.mxu0 %v411_v15  ;;  %259 = vmatpush1.bf16.msra.mxu1 %v412_v16 }
  0x10   :  { %118 = vmatprep.subr.bf16.mxu0 %v413_v17  ;;  %260 = vmatprep.subr.bf16.mxu1 %v415_v18 }
  0x13   :  { %119 = vmatpush1.bf16.msra.mxu0 %v417_v19  ;;  %261 = vmatpush1.bf16.msra.mxu1 %v418_v20 }
  0x16   :  { %344 = vmatmul.mubr.msk.bf16.vlgmr.msra.gmra.mxu0 %vm97_vm0, %v419_v21  ;;  %370 = vmatmul.mubr.msk.bf16.vlgmr.msra.gmra.mxu1 %vm97_vm0, %v419_v21 }
  0x17   :  { %146 = vmatprep.mubr.bf16.mxu0 %v421_v1  ;;  %288 = vmatprep.mubr.bf16.mxu1 %v421_v1 }
  0x1e   :  { %345 = vmatmul.mubr.msk.bf16.gmra.mxu0 %vm97_vm0, %v420_v22  ;;  %371 = vmatmul.mubr.msk.bf16.gmra.mxu1 %vm97_vm0, %v420_v22 }
  0xd6   :  { %v138_v24 = vpop.f32.mrf.mxu0  ;;  %v280_v25 = vpop.f32.mrf.mxu1 }
  0xd7   :  { %v139_v29 = vadd.f32 %v138_v24, %v19_v23  ;;  %v281_v30 = vadd.f32 %v280_v25, %v19_v23 }
  0xd8   :  { %v140_v27 = vpop.f32.mrf.mxu0  ;;  %v282_v28 = vpop.f32.mrf.mxu1 }
  0xd9   :  { %v141_v31 = vadd.f32 %v140_v27, %v20_v26  ;;  %v283_v32 = vadd.f32 %v282_v28, %v20_v26 }
  0xda   :  { %v142_v34 = vpop.f32.mrf.mxu0  ;;  %v284_v35 = vpop.f32.mrf.mxu1 }
  0xdb   :  { %v380_v37 = vpack.c.bf16 %v141_v31, %v139_v29  ;;  %v384_v38 = vpack.c.bf16 %v283_v32, %v281_v30  ;;  %v143_v41 = vadd.f32 %v142_v34, %v21_v33  ;;  %v285_v42 = vadd.f32 %v284_v35, %v21_v33 }
  0xdc   :  { %v144_v39 = vpop.f32.mrf.mxu0  ;;  %v286_v40 = vpop.f32.mrf.mxu1 }
  0xdd   :  { %181 = vst [vmem:[%s559_s3] sm:$0xff] %v380_v37  ;;  %376 = vst [vmem:[%s559_s3 + $0x20] sm:$0xff] %v384_v38  ;;  %v145_v43 = vadd.f32 %v144_v39, %v22_v36  ;;  %v287_v44 = vadd.f32 %v286_v40, %v22_v36 }
  0xde   :  { %v148_v46 = vpop.f32.mrf.mxu0  ;;  %v290_v47 = vpop.f32.mrf.mxu1 }
  0xdf   :  { %v381_v49 = vpack.c.bf16 %v145_v43, %v143_v41  ;;  %v385_v50 = vpack.c.bf16 %v287_v44, %v285_v42  ;;  %v149_v53 = vadd.f32 %v148_v46, %v23_v45  ;;  %v291_v54 = vadd.f32 %v290_v47, %v23_v45 }
  0xe0   :  { %v150_v51 = vpop.f32.mrf.mxu0  ;;  %v292_v52 = vpop.f32.mrf.mxu1 }
  0xe1   :  { %182 = vst [vmem:[%s559_s3 + $0x8] sm:$0xff] %v381_v49  ;;  %377 = vst [vmem:[%s559_s3 + $0x28] sm:$0xff] %v385_v50  ;;  %v151_v55 = vadd.f32 %v150_v51, %v24_v48  ;;  %v293_v56 = vadd.f32 %v292_v52, %v24_v48 }
  0xe2   :  { %v152_v58 = vpop.f32.mrf.mxu0  ;;  %v294_v59 = vpop.f32.mrf.mxu1 }
  0xe3   :  { %v382_v61 = vpack.c.bf16 %v151_v55, %v149_v53  ;;  %v386_v62 = vpack.c.bf16 %v293_v56, %v291_v54  ;;  %v153_v1 = vadd.f32 %v152_v58, %v25_v57  ;;  %v295_v2 = vadd.f32 %v294_v59, %v25_v57 }
  0xe4   :  { %v154_v63 = vpop.f32.mrf.mxu0  ;;  %v296_v0 = vpop.f32.mrf.mxu1 }
  0xe5   :  { %183 = vst [vmem:[%s559_s3 + $0x10] sm:$0xff] %v382_v61  ;;  %378 = vst [vmem:[%s559_s3 + $0x30] sm:$0xff] %v386_v62  ;;  %v155_v3 = vadd.f32 %v154_v63, %v26_v60  ;;  %v297_v4 = vadd.f32 %v296_v0, %v26_v60 }
  0xe7   :  { %v383_v5 = vpack.c.bf16 %v155_v3, %v153_v1  ;;  %v387_v6 = vpack.c.bf16 %v297_v4, %v295_v2 }
  0xe9   :  { %184 = vst [vmem:[%s559_s3 + $0x18] sm:$0xff] %v383_v5  ;;  %379 = vst [vmem:[%s559_s3 + $0x38] sm:$0xff] %v387_v6 }

// kernel: refine_parsing_net_forward.9
= control target key start
LH: loop header
LB: loop body
LE: loop exit
PB: predicated region body
PF: predicated region fallthrough
CT: control target
= control target key end

     0   :  { %v1222_v1 = vmov 0   ;;  %vm277_vm0 = vcmask 261120   ;;  %s1649_s0 = inlined_call_operand.vmem [shape: bf16[2,288,256], index: 0, kind: input, shape index: {}]   ;;  %s1650_s1 = inlined_call_operand.vmem [shape: bf16[32,288], index: 1, kind: input, shape index: {}]   ;;  %s1651_s2 = inlined_call_operand.vmem [shape: f32[32,256], index: 2, kind: input, shape index: {}]   ;;  %s1652_s3 = inlined_call_operand.vmem [shape: bf16[2,32,256], index: 3, kind: output, shape index: {}]  }
   0x1   :  { %v1090_v0 = vld [vmem:[%s1649_s0 + $0x74] ss:$8 sps:$4 sm:$0xff]   ;;  %369 = vmatprep.mubr.bf16.mxu1 %v1222_v1  ;;  %v1092_v2 = vld [vmem:[%s1649_s0 + $0x70] ss:$8 sps:$4 sm:$0xff]   ;;  %v1096_v5 = vld [vmem:[%s1649_s0 + $0x64] ss:$8 sps:$4 sm:$0xff]  }
   0x2   :  { %284 = vmatprep.subr.bf16.mxu0 %v1090_v0  ;;  %v1093_v3 = vld [vmem:[%s1649_s0 + $0x114] ss:$8 sps:$4 sm:$0xff]   ;;  %v1095_v4 = vld [vmem:[%s1649_s0 + $0x110] ss:$8 sps:$4 sm:$0xff]   ;;  %v1098_v6 = vld [vmem:[%s1649_s0 + $0x60] ss:$8 sps:$4 sm:$0xff]  }
   0x3   :  { %285 = vmatpush1.bf16.msra.mxu0 %v1092_v2  ;;  %349 = vmatprep.subr.bf16.mxu1 %v1093_v3  ;;  %v1099_v7 = vld [vmem:[%s1649_s0 + $0x104] ss:$8 sps:$4 sm:$0xff]   ;;  %v1101_v8 = vld [vmem:[%s1649_s0 + $0x100] ss:$8 sps:$4 sm:$0xff]   ;;  %v1102_v9 = vld [vmem:[%s1649_s0 + $0x54] ss:$8 sps:$4 sm:$0xff]  }
   0x4   :  { %350 = vmatpush1.bf16.msra.mxu1 %v1095_v4  ;;  %286 = vmatprep.subr.bf16.mxu0 %v1096_v5  ;;  %v1104_v10 = vld [vmem:[%s1649_s0 + $0x50] ss:$8 sps:$4 sm:$0xff]   ;;  %v1107_v12 = vld [vmem:[%s1649_s0 + $0x194] ss:$8 sps:$4 sm:$0xff]   ;;  %v1109_v14 = vld [vmem:[%s1649_s0 + $0x44] ss:$8 sps:$4 sm:$0xff]  }
   0x5   :  { %351 = vmatprep.subr.bf16.mxu1 %v1099_v7  ;;  %v1105_v11 = vld [vmem:[%s1649_s0 + $0x190] ss:$8 sps:$4 sm:$0xff]   ;;  %v1283_v13 = vld [vmem:[%s1650_s1 + $0x8] ss:$12 sps:$4 sm:$0xff]   ;;  %v1114_v16 = vld [vmem:[%s1649_s0 + $0x184] ss:$8 sps:$4 sm:$0xff]  }
   0x6   :  { %v1111_v15 = vld [vmem:[%s1649_s0 + $0x40] ss:$8 sps:$4 sm:$0xff]   ;;  %v1115_v17 = vld [vmem:[%s1649_s0 + $0x34] ss:$8 sps:$4 sm:$0xff]   ;;  %v1117_v20 = vld [vmem:[%s1649_s0 + $0x30] ss:$8 sps:$4 sm:$0xff]  }
   0x7   :  { %287 = vmatpush1.bf16.msra.mxu0 %v1098_v6  ;;  %v1112_v18 = vld [vmem:[%s1649_s0 + $0x180] ss:$8 sps:$4 sm:$0xff]   ;;  %v1120_v19 = vld [vmem:[%s1649_s0 + $0x174] ss:$8 sps:$4 sm:$0xff]   ;;  %v1121_v21 = vld [vmem:[%s1649_s0 + $0x24] ss:$8 sps:$4 sm:$0xff]  }
   0x8   :  { %288 = vmatprep.subr.bf16.mxu0 %v1102_v9  ;;  %352 = vmatpush1.bf16.msra.mxu1 %v1101_v8  ;;  %v1118_v22 = vld [vmem:[%s1649_s0 + $0x170] ss:$8 sps:$4 sm:$0xff]   ;;  %v1126_v23 = vld [vmem:[%s1649_s0 + $0x164] ss:$8 sps:$4 sm:$0xff]   ;;  %v1123_v24 = vld [vmem:[%s1649_s0 + $0x20] ss:$8 sps:$4 sm:$0xff]  }
   0x9   :  { %724 = vmatprep.subr.bf16.mxu1 %v1107_v12  ;;  %v1127_v25 = vld [vmem:[%s1649_s0 + $0x14] ss:$8 sps:$4 sm:$0xff]   ;;  %v1124_v26 = vld [vmem:[%s1649_s0 + $0x160] ss:$8 sps:$4 sm:$0xff]   ;;  %v1129_v28 = vld [vmem:[%s1649_s0 + $0x10] ss:$8 sps:$4 sm:$0xff]  }
   0xa   :  { %v1132_v27 = vld [vmem:[%s1649_s0 + $0x154] ss:$8 sps:$4 sm:$0xff]   ;;  %v1133_v29 = vld [vmem:[%s1649_s0 + $0x4] ss:$8 sps:$4 sm:$0xff]   ;;  %v1130_v30 = vld [vmem:[%s1649_s0 + $0x150] ss:$8 sps:$4 sm:$0xff]  }
   0xb   :  { %289 = vmatpush1.bf16.msra.mxu0 %v1104_v10  ;;  %993 = vmatmul.mubr.msk.bf16.vlgmr.msra.gmra.mxu1 %vm277_vm0, %v1283_v13  ;;  %v1138_v31 = vld [vmem:[%s1649_s0 + $0x144] ss:$8 sps:$4 sm:$0xff]   ;;  %v1135_v32 = vld [vmem:[%s1649_s0] ss:$8 sps:$4 sm:$0xff]   ;;  %v1139_v33 = vld [vmem:[%s1649_s0 + $0xf4] ss:$8 sps:$4 sm:$0xff]  }
   0xc   :  { %290 = vmatprep.subr.bf16.mxu0 %v1109_v14  ;;  %725 = vmatpush1.bf16.msra.mxu1 %v1105_v11  ;;  %v1136_v34 = vld [vmem:[%s1649_s0 + $0x140] ss:$8 sps:$4 sm:$0xff]   ;;  %v1144_v35 = vld [vmem:[%s1649_s0 + $0x134] ss:$8 sps:$4 sm:$0xff]   ;;  %v1141_v36 = vld [vmem:[%s1649_s0 + $0xf0] ss:$8 sps:$4 sm:$0xff]  }
   0xd   :  { %379 = vmatprep.mubr.bf16.mxu1 %v1222_v1  ;;  %726 = vmatprep.subr.bf16.mxu1 %v1114_v16  ;;  %v1145_v37 = vld [vmem:[%s1649_s0 + $0xe4] ss:$8 sps:$4 sm:$0xff]   ;;  %v1142_v38 = vld [vmem:[%s1649_s0 + $0x130] ss:$8 sps:$4 sm:$0xff]   ;;  %v1147_v40 = vld [vmem:[%s1649_s0 + $0xe0] ss:$8 sps:$4 sm:$0xff]  }
   0xe   :  { %v1150_v39 = vld [vmem:[%s1649_s0 + $0x124] ss:$8 sps:$4 sm:$0xff]   ;;  %v1151_v41 = vld [vmem:[%s1649_s0 + $0xd4] ss:$8 sps:$4 sm:$0xff]   ;;  %v1148_v42 = vld [vmem:[%s1649_s0 + $0x120] ss:$8 sps:$4 sm:$0xff]  }
   0xf   :  { %291 = vmatpush1.bf16.msra.mxu0 %v1111_v15  ;;  %v1156_v43 = vld [vmem:[%s1649_s0 + $0x214] ss:$8 sps:$4 sm:$0xff]   ;;  %v1153_v44 = vld [vmem:[%s1649_s0 + $0xd0] ss:$8 sps:$4 sm:$0xff]   ;;  %v1157_v45 = vld [vmem:[%s1649_s0 + $0xc4] ss:$8 sps:$4 sm:$0xff]  }
  0x10   :  { %292 = vmatprep.subr.bf16.mxu0 %v1115_v17  ;;  %727 = vmatpush1.bf16.msra.mxu1 %v1112_v18  ;;  %v1154_v46 = vld [vmem:[%s1649_s0 + $0x210] ss:$8 sps:$4 sm:$0xff]   ;;  %v1162_v47 = vld [vmem:[%s1649_s0 + $0x204] ss:$8 sps:$4 sm:$0xff]   ;;  %v1159_v48 = vld [vmem:[%s1649_s0 + $0xc0] ss:$8 sps:$4 sm:$0xff]  }
  0x11   :  { %728 = vmatprep.subr.bf16.mxu1 %v1120_v19  ;;  %v1160_v49 = vld [vmem:[%s1649_s0 + $0x200] ss:$8 sps:$4 sm:$0xff]   ;;  %v1163_v50 = vld [vmem:[%s1649_s0 + $0xb4] ss:$8 sps:$4 sm:$0xff]   ;;  %v1189_v51 = vld [vmem:[%s1650_s1 + $0x4] ss:$12 sps:$4 sm:$0xff]  }
  0x12   :  { %v1165_v52 = vld [vmem:[%s1649_s0 + $0xb0] ss:$8 sps:$4 sm:$0xff]   ;;  %v1168_v53 = vld [vmem:[%s1649_s0 + $0x1f4] ss:$8 sps:$4 sm:$0xff]   ;;  %316 = vmatprep.mubr.bf16.mxu0 %v1189_v51  ;;  %v1193_v54 = vld [vmem:[%s1650_s1 + $0x20] ss:$12 sps:$4 sm:$0xff]  }
  0x13   :  { %293 = vmatpush1.bf16.msra.mxu0 %v1117_v20  ;;  %v1169_v55 = vld [vmem:[%s1649_s0 + $0xa4] ss:$8 sps:$4 sm:$0xff]   ;;  %v1166_v56 = vld [vmem:[%s1649_s0 + $0x1f0] ss:$8 sps:$4 sm:$0xff]   ;;  %994 = vmatmul.mubr.msk.bf16.gmra.mxu1 %vm277_vm0, %v1193_v54  ;;  %v1171_v58 = vld [vmem:[%s1649_s0 + $0xa0] ss:$8 sps:$4 sm:$0xff]  }
  0x14   :  { %294 = vmatprep.subr.bf16.mxu0 %v1121_v21  ;;  %729 = vmatpush1.bf16.msra.mxu1 %v1118_v22  ;;  %v1174_v57 = vld [vmem:[%s1649_s0 + $0x1e4] ss:$8 sps:$4 sm:$0xff]   ;;  %v1175_v59 = vld [vmem:[%s1649_s0 + $0x94] ss:$8 sps:$4 sm:$0xff]   ;;  %v1172_v60 = vld [vmem:[%s1649_s0 + $0x1e0] ss:$8 sps:$4 sm:$0xff]  }
  0x15   :  { %730 = vmatprep.subr.bf16.mxu1 %v1126_v23  ;;  %756 = vmatprep.mubr.bf16.mxu1 %v1189_v51  ;;  %v1180_v61 = vld [vmem:[%s1649_s0 + $0x1d4] ss:$8 sps:$4 sm:$0xff]   ;;  %v1177_v62 = vld [vmem:[%s1649_s0 + $0x90] ss:$8 sps:$4 sm:$0xff]   ;;  %v1181_v63 = vld [vmem:[%s1649_s0 + $0x84] ss:$8 sps:$4 sm:$0xff]  }
  0x16   :  { %v1178_v0 = vld [vmem:[%s1649_s0 + $0x1d0] ss:$8 sps:$4 sm:$0xff]   ;;  %v1186_v2 = vld [vmem:[%s1649_s0 + $0x1c4] ss:$8 sps:$4 sm:$0xff]   ;;  %v1183_v3 = vld [vmem:[%s1649_s0 + $0x80] ss:$8 sps:$4 sm:$0xff]  }
  0x17   :  { %295 = vmatpush1.bf16.msra.mxu0 %v1123_v24  ;;  %v1192_v4 = vld [vmem:[%s1649_s0 + $0x234] ss:$8 sps:$4 sm:$0xff]   ;;  %v1184_v5 = vld [vmem:[%s1649_s0 + $0x1c0] ss:$8 sps:$4 sm:$0xff]   ;;  %v1190_v8 = vld [vmem:[%s1649_s0 + $0x230] ss:$8 sps:$4 sm:$0xff]  }
  0x18   :  { %296 = vmatprep.subr.bf16.mxu0 %v1127_v25  ;;  %731 = vmatpush1.bf16.msra.mxu1 %v1124_v26  ;;  %v1187_v6 = vld [vmem:[%s1650_s1] ss:$12 sps:$4 sm:$0xff]   ;;  %v1196_v7 = vld [vmem:[%s1649_s0 + $0x1b4] ss:$8 sps:$4 sm:$0xff]   ;;  %v1194_v11 = vld [vmem:[%s1649_s0 + $0x1b0] ss:$8 sps:$4 sm:$0xff]  }
  0x19   :  { %732 = vmatprep.subr.bf16.mxu1 %v1132_v27  ;;  %v1200_v9 = vld [vmem:[%s1650_s1 + $0x1c] ss:$12 sps:$4 sm:$0xff]   ;;  %v1205_v10 = vld [vmem:[%s1649_s0 + $0x224] ss:$8 sps:$4 sm:$0xff]   ;;  %v25_v26 = vld [vmem:[%s1651_s2 + $0x10] sm:$0xff] }
  0x1a   :  { %v1199_v12 = vld [vmem:[%s1649_s0 + $0x1a4] ss:$8 sps:$4 sm:$0xff]   ;;  %v1203_v14 = vld [vmem:[%s1649_s0 + $0x220] ss:$8 sps:$4 sm:$0xff]   ;;  %v30_v51 = vld [vmem:[%s1651_s2 + $0x38] sm:$0xff] }
  0x1b   :  { %297 = vmatpush1.bf16.msra.mxu0 %v1129_v28  ;;  %v1197_v15 = vld [vmem:[%s1649_s0 + $0x1a0] ss:$8 sps:$4 sm:$0xff]   ;;  %v1202_v16 = vld [vmem:[%s1650_s1 + $0x18] ss:$12 sps:$4 sm:$0xff]  }
  0x1c   :  { %298 = vmatprep.subr.bf16.mxu0 %v1133_v29  ;;  %733 = vmatpush1.bf16.msra.mxu1 %v1130_v30  ;;  %v23_v22 = vld [vmem:[%s1651_s2] sm:$0xff]  ;;  %v26_v30 = vld [vmem:[%s1651_s2 + $0x18] sm:$0xff] }
  0x1d   :  { %734 = vmatprep.subr.bf16.mxu1 %v1138_v31 }
  0x1f   :  { %299 = vmatpush1.bf16.msra.mxu0 %v1135_v32 }
  0x20   :  { %300 = vmatprep.subr.bf16.mxu0 %v1139_v33  ;;  %735 = vmatpush1.bf16.msra.mxu1 %v1136_v34 }
  0x21   :  { %736 = vmatprep.subr.bf16.mxu1 %v1144_v35 }
  0x23   :  { %301 = vmatpush2.bf16.msra.mxu0 %v1141_v36  ;;  %v27_v36 = vld [vmem:[%s1651_s2 + $0x20] sm:$0xff] }
  0x24   :  { %302 = vmatprep.subr.bf16.mxu0 %v1145_v37  ;;  %737 = vmatpush1.bf16.msra.mxu1 %v1142_v38 }
  0x25   :  { %738 = vmatprep.subr.bf16.mxu1 %v1150_v39 }
  0x27   :  { %303 = vmatpush2.bf16.msra.mxu0 %v1147_v40  ;;  %v28_v40 = vld [vmem:[%s1651_s2 + $0x28] sm:$0xff] }
  0x28   :  { %304 = vmatprep.subr.bf16.mxu0 %v1151_v41  ;;  %739 = vmatpush1.bf16.msra.mxu1 %v1148_v42 }
  0x29   :  { %740 = vmatprep.subr.bf16.mxu1 %v1156_v43 }
  0x2b   :  { %305 = vmatpush2.bf16.msra.mxu0 %v1153_v44 }
  0x2c   :  { %306 = vmatprep.subr.bf16.mxu0 %v1157_v45  ;;  %741 = vmatpush2.bf16.msra.mxu1 %v1154_v46  ;;  %v29_v46 = vld [vmem:[%s1651_s2 + $0x30] sm:$0xff] }
  0x2d   :  { %742 = vmatprep.subr.bf16.mxu1 %v1162_v47 }
  0x2f   :  { %307 = vmatpush2.bf16.msra.mxu0 %v1159_v48 }
  0x30   :  { %308 = vmatprep.subr.bf16.mxu0 %v1163_v50  ;;  %743 = vmatpush2.bf16.msra.mxu1 %v1160_v49 }
  0x31   :  { %744 = vmatprep.subr.bf16.mxu1 %v1168_v53 }
  0x33   :  { %309 = vmatpush2.bf16.msra.mxu0 %v1165_v52 }
  0x34   :  { %310 = vmatprep.subr.bf16.mxu0 %v1169_v55  ;;  %745 = vmatpush2.bf16.msra.mxu1 %v1166_v56 }
  0x35   :  { %746 = vmatprep.subr.bf16.mxu1 %v1174_v57 }
  0x37   :  { %311 = vmatpush2.bf16.msra.mxu0 %v1171_v58 }
  0x38   :  { %312 = vmatprep.subr.bf16.mxu0 %v1175_v59  ;;  %747 = vmatpush2.bf16.msra.mxu1 %v1172_v60 }
  0x39   :  { %748 = vmatprep.subr.bf16.mxu1 %v1180_v61 }
  0x3b   :  { %313 = vmatpush2.bf16.msra.mxu0 %v1177_v62 }
  0x3c   :  { %314 = vmatprep.subr.bf16.mxu0 %v1181_v63  ;;  %749 = vmatpush2.bf16.msra.mxu1 %v1178_v0 }
  0x3d   :  { %750 = vmatprep.subr.bf16.mxu1 %v1186_v2 }
  0x3f   :  { %315 = vmatpush2.bf16.msra.mxu0 %v1183_v3 }
  0x40   :  { %789 = vmatprep.subr.bf16.mxu0 %v1192_v4  ;;  %751 = vmatpush2.bf16.msra.mxu1 %v1184_v5 }
  0x41   :  { %752 = vmatprep.subr.bf16.mxu1 %v1196_v7 }
  0x42   :  { %317 = vmatmul.mubr.bf16.vlgmr.msra.gmra.mxu0 %v1187_v6 }
  0x43   :  { %790 = vmatpush1.bf16.msra.mxu0 %v1190_v8  ;;  %326 = vmatprep.mubr.bf16.mxu0 %v1200_v9 }
  0x44   :  { %791 = vmatprep.subr.bf16.mxu0 %v1205_v10  ;;  %753 = vmatpush2.bf16.msra.mxu1 %v1194_v11 }
  0x45   :  { %754 = vmatprep.subr.bf16.mxu1 %v1199_v12 }
  0x47   :  { %792 = vmatpush1.bf16.msra.mxu0 %v1203_v14 }
  0x48   :  { %755 = vmatpush2.bf16.msra.mxu1 %v1197_v15 }
  0x4a   :  { %327 = vmatmul.mubr.bf16.gmra.mxu0 %v1202_v16 }
  0x4b   :  { %809 = vmatprep.mubr.bf16.mxu0 %v1222_v1  ;;  %757 = vmatmul.mubr.bf16.vlgmr.msra.gmra.mxu1 %v1187_v6 }
  0x4c   :  { %766 = vmatprep.mubr.bf16.mxu1 %v1200_v9 }
  0x52   :  { %1071 = vmatmul.mubr.msk.bf16.vlgmr.msra.gmra.mxu0 %vm277_vm0, %v1283_v13  ;;  %v24_v13 = vld [vmem:[%s1651_s2 + $0x8] sm:$0xff] }
  0x53   :  { %819 = vmatprep.mubr.bf16.mxu0 %v1222_v1  ;;  %767 = vmatmul.mubr.bf16.gmra.mxu1 %v1202_v16 }
  0x5a   :  { %1072 = vmatmul.mubr.msk.bf16.gmra.mxu0 %vm277_vm0, %v1193_v54 }
  0xcb   :  { %v371_v17 = vpop.f32.mrf.mxu1 }
  0xcd   :  { %v373_v18 = vpop.f32.mrf.mxu1 }
  0xcf   :  { %v375_v19 = vpop.f32.mrf.mxu1 }
  0xd1   :  { %v377_v20 = vpop.f32.mrf.mxu1 }
  0xd3   :  { %v381_v21 = vpop.f32.mrf.mxu1 }
  0xd5   :  { %v383_v23 = vpop.f32.mrf.mxu1 }
  0xd7   :  { %v385_v27 = vpop.f32.mrf.mxu1 }
  0xd9   :  { %v387_v35 = vpop.f32.mrf.mxu1 }
 0x102   :  { %v318_v24 = vpop.f32.mrf.mxu0 }
 0x103   :  { %v319_v25 = vadd.f32 %v318_v24, %v23_v22 }
 0x104   :  { %v320_v1 = vpop.f32.mrf.mxu0 }
 0x105   :  { %v321_v28 = vadd.f32 %v320_v1, %v24_v13  ;;  %v1501_v32 = vadd.f32 %v371_v17, %v319_v25 }
 0x106   :  { %v322_v29 = vpop.f32.mrf.mxu0 }
 0x107   :  { %v323_v31 = vadd.f32 %v322_v29, %v25_v26  ;;  %v1503_v33 = vadd.f32 %v373_v18, %v321_v28 }
 0x108   :  { %v324_v34 = vpop.f32.mrf.mxu0 }
 0x109   :  { %v325_v37 = vadd.f32 %v324_v34, %v26_v30  ;;  %v390_v38 = vadd.f32 %v1503_v33, %v1501_v32  ;;  %v1513_v41 = vadd.f32 %v375_v19, %v323_v31 }
 0x10a   :  { %v328_v39 = vpop.f32.mrf.mxu0 }
 0x10b   :  { %v1515_v42 = vadd.f32 %v377_v20, %v325_v37  ;;  %v329_v43 = vadd.f32 %v328_v39, %v27_v36  ;;  %391 = vadd.xlane.f32.xlu0 %v390_v38  ;;  %v758_v44 = vpop.f32.mrf.mxu1 }
 0x10c   :  { %v330_v45 = vpop.f32.mrf.mxu0  ;;  %v759_v57 = vadd.f32 %v758_v44, %v23_v22 }
 0x10d   :  { %v331_v47 = vadd.f32 %v330_v45, %v28_v40  ;;  %v393_v48 = vadd.f32 %v1515_v42, %v1513_v41  ;;  %v760_v49 = vpop.f32.mrf.mxu1  ;;  %v1525_v53 = vadd.f32 %v381_v21, %v329_v43 }
 0x10e   :  { %v332_v50 = vpop.f32.mrf.mxu0  ;;  %v761_v62 = vadd.f32 %v760_v49, %v24_v13 }
 0x10f   :  { %v333_v52 = vadd.f32 %v332_v50, %v29_v46  ;;  %394 = vadd.xlane.f32.xlu0 %v393_v48  ;;  %v1527_v54 = vadd.f32 %v383_v23, %v331_v47  ;;  %v762_v55 = vpop.f32.mrf.mxu1 }
 0x110   :  { %v334_v56 = vpop.f32.mrf.mxu0  ;;  %v763_v9 = vadd.f32 %v762_v55, %v25_v26 }
 0x111   :  { %v335_v58 = vadd.f32 %v334_v56, %v30_v51  ;;  %v396_v59 = vadd.f32 %v1527_v54, %v1525_v53  ;;  %v764_v60 = vpop.f32.mrf.mxu1  ;;  %v1531_v63 = vadd.f32 %v385_v27, %v333_v52 }
 0x112   :  { %v811_v61 = vpop.f32.mrf.mxu0  ;;  %v765_v10 = vadd.f32 %v764_v60, %v26_v30 }
 0x113   :  { %v1533_v0 = vadd.f32 %v387_v35, %v335_v58  ;;  %397 = vadd.xlane.f32.xlu1 %v396_v59  ;;  %v768_v2 = vpop.f32.mrf.mxu1  ;;  %v812_v4 = vadd.f32 %v811_v61, %v759_v57 }
 0x114   :  { %v813_v3 = vpop.f32.mrf.mxu0  ;;  %v769_v15 = vadd.f32 %v768_v2, %v27_v36 }
 0x115   :  { %v814_v5 = vadd.f32 %v813_v3, %v761_v62  ;;  %v399_v6 = vadd.f32 %v1533_v0, %v1531_v63  ;;  %v770_v7 = vpop.f32.mrf.mxu1 }
 0x116   :  { %v815_v8 = vpop.f32.mrf.mxu0  ;;  %v771_v19 = vadd.f32 %v770_v7, %v28_v40 }
 0x117   :  { %400 = vadd.xlane.f32.xlu1 %v399_v6  ;;  %v830_v11 = vadd.f32 %v814_v5, %v812_v4  ;;  %v772_v12 = vpop.f32.mrf.mxu1  ;;  %v816_v16 = vadd.f32 %v815_v8, %v763_v9 }
 0x118   :  { %v817_v14 = vpop.f32.mrf.mxu0  ;;  %v773_v25 = vadd.f32 %v772_v12, %v29_v46 }
 0x119   :  { %v818_v17 = vadd.f32 %v817_v14, %v765_v10  ;;  %831 = vadd.xlane.f32.xlu0 %v830_v11  ;;  %v774_v21 = vpop.f32.mrf.mxu1 }
 0x11a   :  { %v821_v18 = vpop.f32.mrf.mxu0  ;;  %v775_v1 = vadd.f32 %v774_v21, %v30_v51 }
 0x11b   :  { %v833_v20 = vadd.f32 %v818_v17, %v816_v16  ;;  %v822_v23 = vadd.f32 %v821_v18, %v769_v15 }
 0x11c   :  { %v823_v22 = vpop.f32.mrf.mxu0 }
 0x11d   :  { %v824_v24 = vadd.f32 %v823_v22, %v771_v19  ;;  %834 = vadd.xlane.f32.xlu1 %v833_v20 }
 0x11e   :  { %v825_v13 = vpop.f32.mrf.mxu0 }
 0x11f   :  { %v836_v26 = vadd.f32 %v824_v24, %v822_v23  ;;  %v826_v28 = vadd.f32 %v825_v13, %v773_v25 }
 0x120   :  { %v827_v27 = vpop.f32.mrf.mxu0 }
 0x121   :  { %v828_v29 = vadd.f32 %v827_v27, %v775_v1  ;;  %837 = vadd.xlane.f32.xlu0 %v836_v26 }
 0x123   :  { %v839_v30 = vadd.f32 %v828_v29, %v826_v28 }
 0x125   :  { %840 = vadd.xlane.f32.xlu1 %v839_v30 }
 0x194   :  { %v392_v31 = vpop.xlane.xlu0 %391 }
 0x195   :  { %v403_v34 = vmul.f32 0.00390625, %v392_v31 }
 0x197   :  { %v1538_v35 = vsub.f32 %v1501_v32, %v403_v34  ;;  %v1541_v36 = vsub.f32 %v1503_v33, %v403_v34 }
 0x198   :  { %v395_v37 = vpop.xlane.xlu0 %394 }
 0x199   :  { %v404_v38 = vmul.f32 0.00390625, %v395_v37  ;;  %v415_v39 = vmul.f32 %v1538_v35, %v1538_v35  ;;  %v416_v40 = vmul.f32 %v1541_v36, %v1541_v36 }
 0x19b   :  { %v1548_v43 = vsub.f32 %v1513_v41, %v404_v38  ;;  %v1551_v44 = vsub.f32 %v1515_v42, %v404_v38  ;;  %v423_v45 = vadd.f32 %v416_v40, %v415_v39 }
 0x19c   :  { %v398_v32 = vpop.xlane.xlu1 %397 }
 0x19d   :  { %v405_v46 = vmul.f32 0.00390625, %v398_v32  ;;  %424 = vadd.xlane.f32.xlu0 %v423_v45  ;;  %v417_v33 = vmul.f32 %v1548_v43, %v1548_v43  ;;  %v418_v47 = vmul.f32 %v1551_v44, %v1551_v44 }
 0x19f   :  { %v1558_v48 = vsub.f32 %v1525_v53, %v405_v46  ;;  %v1561_v49 = vsub.f32 %v1527_v54, %v405_v46  ;;  %v426_v41 = vadd.f32 %v418_v47, %v417_v33 }
 0x1a0   :  { %v401_v50 = vpop.xlane.xlu1 %400 }
 0x1a1   :  { %v406_v42 = vmul.f32 0.00390625, %v401_v50  ;;  %427 = vadd.xlane.f32.xlu1 %v426_v41  ;;  %v419_v51 = vmul.f32 %v1558_v48, %v1558_v48  ;;  %v420_v52 = vmul.f32 %v1561_v49, %v1561_v49 }
 0x1a2   :  { %v832_v55 = vpop.xlane.xlu0 %831 }
 0x1a3   :  { %v1568_v56 = vsub.f32 %v1531_v63, %v406_v42  ;;  %v1571_v53 = vsub.f32 %v1533_v0, %v406_v42  ;;  %v842_v57 = vmul.f32 0.00390625, %v832_v55  ;;  %v429_v54 = vadd.f32 %v420_v52, %v419_v51 }
 0x1a5   :  { %v1573_v58 = vsub.f32 %v812_v4, %v842_v57  ;;  %v1575_v59 = vsub.f32 %v814_v5, %v842_v57  ;;  %430 = vadd.xlane.f32.xlu0 %v429_v54  ;;  %v421_v60 = vmul.f32 %v1568_v56, %v1568_v56  ;;  %v422_v61 = vmul.f32 %v1571_v53, %v1571_v53 }
 0x1a6   :  { %v835_v62 = vpop.xlane.xlu1 %834 }
 0x1a7   :  { %v843_v2 = vmul.f32 0.00390625, %v835_v62  ;;  %v432_v63 = vadd.f32 %v422_v61, %v421_v60  ;;  %v854_v0 = vmul.f32 %v1573_v58, %v1573_v58  ;;  %v855_v3 = vmul.f32 %v1575_v59, %v1575_v59 }
 0x1a9   :  { %v1585_v4 = vsub.f32 %v816_v16, %v843_v2  ;;  %v1587_v5 = vsub.f32 %v818_v17, %v843_v2  ;;  %433 = vadd.xlane.f32.xlu1 %v432_v63  ;;  %v862_v6 = vadd.f32 %v855_v3, %v854_v0 }
 0x1aa   :  { %v838_v7 = vpop.xlane.xlu0 %837 }
 0x1ab   :  { %v844_v8 = vmul.f32 0.00390625, %v838_v7  ;;  %863 = vadd.xlane.f32.xlu0 %v862_v6  ;;  %v856_v9 = vmul.f32 %v1585_v4, %v1585_v4  ;;  %v857_v10 = vmul.f32 %v1587_v5, %v1587_v5 }
 0x1ad   :  { %v1593_v11 = vsub.f32 %v822_v23, %v844_v8  ;;  %v1595_v12 = vsub.f32 %v824_v24, %v844_v8  ;;  %v865_v14 = vadd.f32 %v857_v10, %v856_v9 }
 0x1ae   :  { %v841_v15 = vpop.xlane.xlu1 %840 }
 0x1af   :  { %v845_v16 = vmul.f32 0.00390625, %v841_v15  ;;  %866 = vadd.xlane.f32.xlu1 %v865_v14  ;;  %v858_v17 = vmul.f32 %v1593_v11, %v1593_v11  ;;  %v859_v18 = vmul.f32 %v1595_v12, %v1595_v12 }
 0x1b1   :  { %v1601_v19 = vsub.f32 %v826_v28, %v845_v16  ;;  %v1603_v20 = vsub.f32 %v828_v29, %v845_v16  ;;  %v868_v21 = vadd.f32 %v859_v18, %v858_v17 }
 0x1b3   :  { %869 = vadd.xlane.f32.xlu0 %v868_v21  ;;  %v860_v22 = vmul.f32 %v1601_v19, %v1601_v19  ;;  %v861_v23 = vmul.f32 %v1603_v20, %v1603_v20 }
 0x1b5   :  { %v871_v24 = vadd.f32 %v861_v23, %v860_v22 }
 0x1b7   :  { %872 = vadd.xlane.f32.xlu1 %v871_v24 }
 0x226   :  { %v425_v13 = vpop.xlane.xlu0 %424 }
 0x227   :  { %v435_v25 = vmul.f32 0.00390625, %v425_v13 }
 0x229   :  { %v439_v1 = vadd.f32 1e-05, %v435_v25 }
 0x22a   :  { %v428_v26 = vpop.xlane.xlu1 %427 }
 0x22b   :  { %1206 = vrsqrt.f32 %v439_v1  ;;  %v436_v27 = vmul.f32 0.00390625, %v428_v26 }
 0x22d   :  { %v440_v28 = vadd.f32 1e-05, %v436_v27 }
 0x22e   :  { %v431_v30 = vpop.xlane.xlu0 %430 }
 0x22f   :  { %1208 = vrsqrt.f32 %v440_v28  ;;  %v437_v29 = vmul.f32 0.00390625, %v431_v30 }
 0x231   :  { %v441_v31 = vadd.f32 1e-05, %v437_v29 }
 0x232   :  { %v434_v34 = vpop.xlane.xlu1 %433 }
 0x233   :  { %1210 = vrsqrt.f32 %v441_v31  ;;  %v438_v37 = vmul.f32 0.00390625, %v434_v34 }
 0x234   :  { %v864_v38 = vpop.xlane.xlu0 %863 }
 0x235   :  { %v442_v39 = vadd.f32 1e-05, %v438_v37  ;;  %v874_v40 = vmul.f32 0.00390625, %v864_v38 }
 0x237   :  { %1212 = vrsqrt.f32 %v442_v39  ;;  %v878_v45 = vadd.f32 1e-05, %v874_v40 }
 0x238   :  { %v1207_v32 = vpop.eup %1206  ;;  %v867_v46 = vpop.xlane.xlu1 %866 }
 0x239   :  { %v447_v33 = vmul.f32 %v1207_v32, %v1538_v35  ;;  %v448_v47 = vmul.f32 %v1207_v32, %v1541_v36  ;;  %1214 = vrsqrt.f32 %v878_v45  ;;  %v875_v41 = vmul.f32 0.00390625, %v867_v46 }
 0x23b   :  { %vm455_vm1 = vcmp.ge.f32.partialorder %v447_v33, 0.0  ;;  %vm456_vm2 = vcmp.ge.f32.partialorder %v448_v47, 0.0  ;;  %v463_v50 = vmul.f32 0.2, %v447_v33  ;;  %v464_v42 = vmul.f32 0.2, %v448_v47 }
 0x23c   :  { %v1209_v51 = vpop.eup %1208  ;;  %v879_v52 = vadd.f32 1e-05, %v875_v41  ;;  %v870_v55 = vpop.xlane.xlu0 %869 }
 0x23d   :  { %v471_v57 = vsel %vm455_vm1, %v447_v33, %v463_v50  ;;  %v472_v54 = vsel %vm456_vm2, %v448_v47, %v464_v42  ;;  %v449_v60 = vmul.f32 %v1209_v51, %v1548_v43  ;;  %v450_v61 = vmul.f32 %v1209_v51, %v1551_v44 }
 0x23e   :  { %v1081_v62 = vpack.c.bf16 %v472_v54, %v471_v57  ;;  %1216 = vrsqrt.f32 %v879_v52  ;;  %v876_v35 = vmul.f32 0.00390625, %v870_v55 }
 0x23f   :  { %vm457_vm3 = vcmp.ge.f32.partialorder %v449_v60, 0.0  ;;  %vm458_vm4 = vcmp.ge.f32.partialorder %v450_v61, 0.0  ;;  %v465_v36 = vmul.f32 0.2, %v449_v60  ;;  %v466_v2 = vmul.f32 0.2, %v450_v61 }
 0x240   :  { %v1211_v63 = vpop.eup %1210  ;;  %503 = vst [vmem:[%s1652_s3] sm:$0xff] %v1081_v62  ;;  %v880_v0 = vadd.f32 1e-05, %v876_v35  ;;  %v873_v3 = vpop.xlane.xlu1 %872 }
 0x241   :  { %v473_v6 = vsel %vm457_vm3, %v449_v60, %v465_v36  ;;  %v474_v7 = vsel %vm458_vm4, %v450_v61, %v466_v2  ;;  %v451_v43 = vmul.f32 %v1211_v63, %v1558_v48  ;;  %v452_v44 = vmul.f32 %v1211_v63, %v1561_v49 }
 0x242   :  { %v1082_v8 = vpack.c.bf16 %v474_v7, %v473_v6  ;;  %1218 = vrsqrt.f32 %v880_v0  ;;  %v877_v9 = vmul.f32 0.00390625, %v873_v3 }
 0x243   :  { %vm459_vm5 = vcmp.ge.f32.partialorder %v451_v43, 0.0  ;;  %vm460_vm6 = vcmp.ge.f32.partialorder %v452_v44, 0.0  ;;  %v467_v10 = vmul.f32 0.2, %v451_v43  ;;  %v468_v14 = vmul.f32 0.2, %v452_v44 }
 0x244   :  { %v1213_v15 = vpop.eup %1212  ;;  %504 = vst [vmem:[%s1652_s3 + $0x8] sm:$0xff] %v1082_v8  ;;  %v881_v16 = vadd.f32 1e-05, %v877_v9 }
 0x245   :  { %v475_v17 = vsel %vm459_vm5, %v451_v43, %v467_v10  ;;  %v476_v18 = vsel %vm460_vm6, %v452_v44, %v468_v14  ;;  %v453_v21 = vmul.f32 %v1213_v15, %v1568_v56  ;;  %v454_v48 = vmul.f32 %v1213_v15, %v1571_v53 }
 0x246   :  { %v1215_v49 = vpop.eup %1214  ;;  %v1083_v22 = vpack.c.bf16 %v476_v18, %v475_v17  ;;  %1220 = vrsqrt.f32 %v881_v16 }
 0x247   :  { %vm461_vm7 = vcmp.ge.f32.partialorder %v453_v21, 0.0  ;;  %vm462_vm8 = vcmp.ge.f32.partialorder %v454_v48, 0.0  ;;  %v469_v23 = vmul.f32 0.2, %v453_v21  ;;  %v470_v24 = vmul.f32 0.2, %v454_v48 }
 0x248   :  { %505 = vst [vmem:[%s1652_s3 + $0x10] sm:$0xff] %v1083_v22  ;;  %v886_v13 = vmul.f32 %v1215_v49, %v1573_v58  ;;  %v887_v25 = vmul.f32 %v1215_v49, %v1575_v59 }
 0x249   :  { %v477_v1 = vsel %vm461_vm7, %v453_v21, %v469_v23  ;;  %v478_v26 = vsel %vm462_vm8, %v454_v48, %v470_v24 }
 0x24a   :  { %v1084_v56 = vpack.c.bf16 %v478_v26, %v477_v1  ;;  %vm894_vm9 = vcmp.ge.f32.partialorder %v886_v13, 0.0  ;;  %vm895_vm10 = vcmp.ge.f32.partialorder %v887_v25, 0.0  ;;  %v902_v53 = vmul.f32 0.2, %v886_v13 }
 0x24b   :  { %v1217_v27 = vpop.eup %1216  ;;  %v903_v28 = vmul.f32 0.2, %v887_v25 }
 0x24c   :  { %506 = vst [vmem:[%s1652_s3 + $0x18] sm:$0xff] %v1084_v56  ;;  %v910_v30 = vsel %vm894_vm9, %v886_v13, %v902_v53  ;;  %v888_v29 = vmul.f32 %v1217_v27, %v1585_v4  ;;  %v889_v31 = vmul.f32 %v1217_v27, %v1587_v5 }
 0x24d   :  { %v911_v58 = vsel %vm895_vm10, %v887_v25, %v903_v28 }
 0x24e   :  { %v1085_v34 = vpack.c.bf16 %v911_v58, %v910_v30  ;;  %vm896_vm11 = vcmp.ge.f32.partialorder %v888_v29, 0.0  ;;  %vm897_vm12 = vcmp.ge.f32.partialorder %v889_v31, 0.0  ;;  %v904_v59 = vmul.f32 0.2, %v888_v29 }
 0x24f   :  { %v1219_v37 = vpop.eup %1218  ;;  %v905_v38 = vmul.f32 0.2, %v889_v31 }
 0x250   :  { %1077 = vst [vmem:[%s1652_s3 + $0x20] sm:$0xff] %v1085_v34  ;;  %v912_v39 = vsel %vm896_vm11, %v888_v29, %v904_v59  ;;  %v890_v40 = vmul.f32 %v1219_v37, %v1593_v11  ;;  %v891_v45 = vmul.f32 %v1219_v37, %v1595_v12 }
 0x251   :  { %v913_v32 = vsel %vm897_vm12, %v889_v31, %v905_v38 }
 0x252   :  { %v1086_v4 = vpack.c.bf16 %v913_v32, %v912_v39  ;;  %vm898_vm13 = vcmp.ge.f32.partialorder %v890_v40, 0.0  ;;  %vm899_vm14 = vcmp.ge.f32.partialorder %v891_v45, 0.0  ;;  %v906_v5 = vmul.f32 0.2, %v890_v40 }
 0x253   :  { %v1221_v46 = vpop.eup %1220  ;;  %v907_v33 = vmul.f32 0.2, %v891_v45 }
 0x254   :  { %1078 = vst [vmem:[%s1652_s3 + $0x28] sm:$0xff] %v1086_v4  ;;  %v914_v47 = vsel %vm898_vm13, %v890_v40, %v906_v5  ;;  %v892_v41 = vmul.f32 %v1221_v46, %v1601_v19  ;;  %v893_v50 = vmul.f32 %v1221_v46, %v1603_v20 }
 0x255   :  { %v915_v42 = vsel %vm899_vm14, %v891_v45, %v907_v33 }
 0x256   :  { %v1087_v11 = vpack.c.bf16 %v915_v42, %v914_v47  ;;  %vm900_vm15 = vcmp.ge.f32.partialorder %v892_v41, 0.0  ;;  %vm901_vm0 = vcmp.ge.f32.partialorder %v893_v50, 0.0  ;;  %v908_v12 = vmul.f32 0.2, %v892_v41 }
 0x257   :  { %v909_v51 = vmul.f32 0.2, %v893_v50 }
 0x258   :  { %1079 = vst [vmem:[%s1652_s3 + $0x30] sm:$0xff] %v1087_v11  ;;  %v916_v52 = vsel %vm900_vm15, %v892_v41, %v908_v12 }
 0x259   :  { %v917_v55 = vsel %vm901_vm0, %v893_v50, %v909_v51 }
 0x25a   :  { %v1088_v57 = vpack.c.bf16 %v917_v55, %v916_v52 }
 0x25c   :  { %1080 = vst [vmem:[%s1652_s3 + $0x38] sm:$0xff] %v1088_v57 }

// kernel: refine_parsing_net_forward.10
= control target key start
LH: loop header
LB: loop body
LE: loop exit
PB: predicated region body
PF: predicated region fallthrough
CT: control target
= control target key end

     0   :  { %v1101_v1 = vmov 0   ;;  %vm301_vm0 = vcmask 523264   ;;  %s1444_s0 = inlined_call_operand.vmem [shape: bf16[2,320,256], index: 0, kind: input, shape index: {}]   ;;  %s1445_s1 = inlined_call_operand.vmem [shape: bf16[32,320], index: 1, kind: input, shape index: {}]   ;;  %s1446_s2 = inlined_call_operand.vmem [shape: f32[32,256], index: 2, kind: input, shape index: {}]   ;;  %s1447_s3 = inlined_call_operand.vmem [shape: bf16[2,32,256], index: 3, kind: output, shape index: {}]  }
   0x1   :  { %v973_v0 = vld [vmem:[%s1444_s0 + $0x74] ss:$8 sps:$4 sm:$0xff]   ;;  %393 = vmatprep.mubr.bf16.mxu1 %v1101_v1  ;;  %v977_v3 = vld [vmem:[%s1444_s0 + $0x70] ss:$8 sps:$4 sm:$0xff]   ;;  %v979_v5 = vld [vmem:[%s1444_s0 + $0x64] ss:$8 sps:$4 sm:$0xff]  }
   0x2   :  { %v975_v2 = vld [vmem:[%s1444_s0 + $0x134] ss:$8 sps:$4 sm:$0xff]   ;;  %308 = vmatprep.subr.bf16.mxu0 %v973_v0  ;;  %v978_v4 = vld [vmem:[%s1444_s0 + $0x130] ss:$8 sps:$4 sm:$0xff]   ;;  %v981_v6 = vld [vmem:[%s1444_s0 + $0x124] ss:$8 sps:$4 sm:$0xff]  }
   0x3   :  { %369 = vmatprep.subr.bf16.mxu1 %v975_v2  ;;  %309 = vmatpush1.bf16.msra.mxu0 %v977_v3  ;;  %v983_v7 = vld [vmem:[%s1444_s0 + $0x60] ss:$8 sps:$4 sm:$0xff]   ;;  %v985_v9 = vld [vmem:[%s1444_s0 + $0x54] ss:$8 sps:$4 sm:$0xff]   ;;  %v989_v11 = vld [vmem:[%s1444_s0 + $0x50] ss:$8 sps:$4 sm:$0xff]  }
   0x4   :  { %370 = vmatpush1.bf16.msra.mxu1 %v978_v4  ;;  %310 = vmatprep.subr.bf16.mxu0 %v979_v5  ;;  %v984_v8 = vld [vmem:[%s1444_s0 + $0x120] ss:$8 sps:$4 sm:$0xff]   ;;  %v987_v10 = vld [vmem:[%s1444_s0 + $0x114] ss:$8 sps:$4 sm:$0xff]   ;;  %v990_v12 = vld [vmem:[%s1444_s0 + $0x110] ss:$8 sps:$4 sm:$0xff]  }
   0x5   :  { %371 = vmatprep.subr.bf16.mxu1 %v981_v6  ;;  %v991_v13 = vld [vmem:[%s1444_s0 + $0x44] ss:$8 sps:$4 sm:$0xff]   ;;  %v995_v15 = vld [vmem:[%s1444_s0 + $0x40] ss:$8 sps:$4 sm:$0xff]   ;;  %v997_v17 = vld [vmem:[%s1444_s0 + $0x34] ss:$8 sps:$4 sm:$0xff]  }
   0x6   :  { %v993_v14 = vld [vmem:[%s1444_s0 + $0x104] ss:$8 sps:$4 sm:$0xff]   ;;  %v996_v16 = vld [vmem:[%s1444_s0 + $0x100] ss:$8 sps:$4 sm:$0xff]   ;;  %v1002_v18 = vld [vmem:[%s1444_s0 + $0x1b4] ss:$8 sps:$4 sm:$0xff]  }
   0x7   :  { %311 = vmatpush1.bf16.msra.mxu0 %v983_v7  ;;  %v1180_v19 = vld [vmem:[%s1445_s1 + $0x8] ss:$12 sps:$4 sm:$0xff]   ;;  %v1000_v20 = vld [vmem:[%s1444_s0 + $0x1b0] ss:$8 sps:$4 sm:$0xff]   ;;  %v1004_v22 = vld [vmem:[%s1444_s0 + $0x24] ss:$8 sps:$4 sm:$0xff]  }
   0x8   :  { %372 = vmatpush1.bf16.msra.mxu1 %v984_v8  ;;  %312 = vmatprep.subr.bf16.mxu0 %v985_v9  ;;  %v1003_v21 = vld [vmem:[%s1444_s0 + $0x30] ss:$8 sps:$4 sm:$0xff]   ;;  %v1008_v23 = vld [vmem:[%s1444_s0 + $0x1a4] ss:$8 sps:$4 sm:$0xff]   ;;  %v1006_v24 = vld [vmem:[%s1444_s0 + $0x1a0] ss:$8 sps:$4 sm:$0xff]  }
   0x9   :  { %373 = vmatprep.subr.bf16.mxu1 %v987_v10  ;;  %v1009_v25 = vld [vmem:[%s1444_s0 + $0x20] ss:$8 sps:$4 sm:$0xff]   ;;  %v1010_v26 = vld [vmem:[%s1444_s0 + $0x14] ss:$8 sps:$4 sm:$0xff]   ;;  %v1012_v28 = vld [vmem:[%s1444_s0 + $0x190] ss:$8 sps:$4 sm:$0xff]  }
   0xa   :  { %v1014_v27 = vld [vmem:[%s1444_s0 + $0x194] ss:$8 sps:$4 sm:$0xff]   ;;  %v1015_v29 = vld [vmem:[%s1444_s0 + $0x10] ss:$8 sps:$4 sm:$0xff]   ;;  %v1016_v30 = vld [vmem:[%s1444_s0 + $0x4] ss:$8 sps:$4 sm:$0xff]  }
   0xb   :  { %313 = vmatpush1.bf16.msra.mxu0 %v989_v11  ;;  %v1020_v31 = vld [vmem:[%s1444_s0 + $0x184] ss:$8 sps:$4 sm:$0xff]   ;;  %v1018_v32 = vld [vmem:[%s1444_s0 + $0x180] ss:$8 sps:$4 sm:$0xff]   ;;  %v1022_v34 = vld [vmem:[%s1444_s0 + $0xf4] ss:$8 sps:$4 sm:$0xff]  }
   0xc   :  { %374 = vmatpush1.bf16.msra.mxu1 %v990_v12  ;;  %314 = vmatprep.subr.bf16.mxu0 %v991_v13  ;;  %v1021_v33 = vld [vmem:[%s1444_s0] ss:$8 sps:$4 sm:$0xff]   ;;  %v1026_v35 = vld [vmem:[%s1444_s0 + $0x174] ss:$8 sps:$4 sm:$0xff]   ;;  %v1024_v36 = vld [vmem:[%s1444_s0 + $0x170] ss:$8 sps:$4 sm:$0xff]  }
   0xd   :  { %375 = vmatprep.subr.bf16.mxu1 %v993_v14  ;;  %v1027_v37 = vld [vmem:[%s1444_s0 + $0xf0] ss:$8 sps:$4 sm:$0xff]   ;;  %v1028_v38 = vld [vmem:[%s1444_s0 + $0xe4] ss:$8 sps:$4 sm:$0xff]   ;;  %v1030_v40 = vld [vmem:[%s1444_s0 + $0x160] ss:$8 sps:$4 sm:$0xff]  }
   0xe   :  { %v1032_v39 = vld [vmem:[%s1444_s0 + $0x164] ss:$8 sps:$4 sm:$0xff]   ;;  %v1033_v41 = vld [vmem:[%s1444_s0 + $0xe0] ss:$8 sps:$4 sm:$0xff]   ;;  %v1034_v42 = vld [vmem:[%s1444_s0 + $0xd4] ss:$8 sps:$4 sm:$0xff]  }
   0xf   :  { %315 = vmatpush1.bf16.msra.mxu0 %v995_v15  ;;  %v1038_v43 = vld [vmem:[%s1444_s0 + $0x154] ss:$8 sps:$4 sm:$0xff]   ;;  %v1036_v44 = vld [vmem:[%s1444_s0 + $0x150] ss:$8 sps:$4 sm:$0xff]   ;;  %v1040_v46 = vld [vmem:[%s1444_s0 + $0xc4] ss:$8 sps:$4 sm:$0xff]  }
  0x10   :  { %376 = vmatpush1.bf16.msra.mxu1 %v996_v16  ;;  %316 = vmatprep.subr.bf16.mxu0 %v997_v17  ;;  %v1039_v45 = vld [vmem:[%s1444_s0 + $0xd0] ss:$8 sps:$4 sm:$0xff]   ;;  %v1044_v47 = vld [vmem:[%s1444_s0 + $0x144] ss:$8 sps:$4 sm:$0xff]   ;;  %v1042_v48 = vld [vmem:[%s1444_s0 + $0x140] ss:$8 sps:$4 sm:$0xff]  }
  0x11   :  { %683 = vmatprep.subr.bf16.mxu1 %v1002_v18  ;;  %v1045_v49 = vld [vmem:[%s1444_s0 + $0xc0] ss:$8 sps:$4 sm:$0xff]   ;;  %v1046_v50 = vld [vmem:[%s1444_s0 + $0xb4] ss:$8 sps:$4 sm:$0xff]   ;;  %v1072_v51 = vld [vmem:[%s1445_s1 + $0x4] ss:$12 sps:$4 sm:$0xff]  }
  0x12   :  { %v1050_v52 = vld [vmem:[%s1444_s0 + $0x234] ss:$8 sps:$4 sm:$0xff]   ;;  %340 = vmatprep.mubr.bf16.mxu0 %v1072_v51  ;;  %v1048_v53 = vld [vmem:[%s1444_s0 + $0x230] ss:$8 sps:$4 sm:$0xff]   ;;  %v1293_v55 = vld [vmem:[%s1445_s1 + $0x20] ss:$12 sps:$4 sm:$0xff]  }
  0x13   :  { %868 = vmatmul.mubr.msk.bf16.vlgmr.msra.gmra.mxu1 %vm301_vm0, %v1180_v19  ;;  %317 = vmatpush1.bf16.msra.mxu0 %v1003_v21  ;;  %v1051_v54 = vld [vmem:[%s1444_s0 + $0xb0] ss:$8 sps:$4 sm:$0xff]   ;;  %v1052_v56 = vld [vmem:[%s1444_s0 + $0xa4] ss:$8 sps:$4 sm:$0xff]   ;;  %v1054_v58 = vld [vmem:[%s1444_s0 + $0x220] ss:$8 sps:$4 sm:$0xff]  }
  0x14   :  { %684 = vmatpush1.bf16.msra.mxu1 %v1000_v20  ;;  %318 = vmatprep.subr.bf16.mxu0 %v1004_v22  ;;  %v1056_v57 = vld [vmem:[%s1444_s0 + $0x224] ss:$8 sps:$4 sm:$0xff]   ;;  %v1057_v59 = vld [vmem:[%s1444_s0 + $0xa0] ss:$8 sps:$4 sm:$0xff]   ;;  %v1058_v60 = vld [vmem:[%s1444_s0 + $0x94] ss:$8 sps:$4 sm:$0xff]  }
  0x15   :  { %685 = vmatprep.subr.bf16.mxu1 %v1008_v23  ;;  %403 = vmatprep.mubr.bf16.mxu1 %v1101_v1  ;;  %v1062_v61 = vld [vmem:[%s1444_s0 + $0x214] ss:$8 sps:$4 sm:$0xff]   ;;  %v1060_v62 = vld [vmem:[%s1444_s0 + $0x210] ss:$8 sps:$4 sm:$0xff]   ;;  %v1064_v0 = vld [vmem:[%s1444_s0 + $0x84] ss:$8 sps:$4 sm:$0xff]  }
  0x16   :  { %v1063_v63 = vld [vmem:[%s1444_s0 + $0x90] ss:$8 sps:$4 sm:$0xff]   ;;  %v1068_v2 = vld [vmem:[%s1444_s0 + $0x204] ss:$8 sps:$4 sm:$0xff]   ;;  %v1066_v3 = vld [vmem:[%s1444_s0 + $0x200] ss:$8 sps:$4 sm:$0xff]  }
  0x17   :  { %319 = vmatpush1.bf16.msra.mxu0 %v1009_v25  ;;  %v1069_v4 = vld [vmem:[%s1444_s0 + $0x80] ss:$8 sps:$4 sm:$0xff]   ;;  %v1075_v5 = vld [vmem:[%s1444_s0 + $0x1f4] ss:$8 sps:$4 sm:$0xff]   ;;  %v1073_v8 = vld [vmem:[%s1444_s0 + $0x1f0] ss:$8 sps:$4 sm:$0xff]  }
  0x18   :  { %686 = vmatpush1.bf16.msra.mxu1 %v1006_v24  ;;  %320 = vmatprep.subr.bf16.mxu0 %v1010_v26  ;;  %v1078_v6 = vld [vmem:[%s1444_s0 + $0x274] ss:$8 sps:$4 sm:$0xff]   ;;  %v1070_v7 = vld [vmem:[%s1445_s1] ss:$12 sps:$4 sm:$0xff]   ;;  %v1076_v9 = vld [vmem:[%s1444_s0 + $0x270] ss:$8 sps:$4 sm:$0xff]  }
  0x19   :  { %687 = vmatprep.subr.bf16.mxu1 %v1014_v27  ;;  %v1082_v10 = vld [vmem:[%s1444_s0 + $0x1e4] ss:$8 sps:$4 sm:$0xff]   ;;  %v1086_v12 = vld [vmem:[%s1445_s1 + $0x1c] ss:$12 sps:$4 sm:$0xff]   ;;  %v1089_v18 = vld [vmem:[%s1444_s0 + $0x1d0] ss:$8 sps:$4 sm:$0xff]  }
  0x1a   :  { %v1085_v11 = vld [vmem:[%s1444_s0 + $0x264] ss:$8 sps:$4 sm:$0xff]   ;;  %v1080_v13 = vld [vmem:[%s1444_s0 + $0x1e0] ss:$8 sps:$4 sm:$0xff]   ;;  %v1091_v15 = vld [vmem:[%s1444_s0 + $0x1d4] ss:$8 sps:$4 sm:$0xff]  }
  0x1b   :  { %321 = vmatpush1.bf16.msra.mxu0 %v1015_v29  ;;  %869 = vmatmul.mubr.msk.bf16.gmra.mxu1 %vm301_vm0, %v1293_v55  ;;  %v1083_v14 = vld [vmem:[%s1444_s0 + $0x260] ss:$8 sps:$4 sm:$0xff]   ;;  %v1094_v16 = vld [vmem:[%s1444_s0 + $0x254] ss:$8 sps:$4 sm:$0xff]   ;;  %v1088_v17 = vld [vmem:[%s1445_s1 + $0x18] ss:$12 sps:$4 sm:$0xff]  }
  0x1c   :  { %688 = vmatpush1.bf16.msra.mxu1 %v1012_v28  ;;  %322 = vmatprep.subr.bf16.mxu0 %v1016_v30  ;;  %v1092_v20 = vld [vmem:[%s1444_s0 + $0x250] ss:$8 sps:$4 sm:$0xff]   ;;  %v1097_v21 = vld [vmem:[%s1444_s0 + $0x1c4] ss:$8 sps:$4 sm:$0xff]   ;;  %v1095_v23 = vld [vmem:[%s1444_s0 + $0x1c0] ss:$8 sps:$4 sm:$0xff]  }
  0x1d   :  { %689 = vmatprep.subr.bf16.mxu1 %v1020_v31  ;;  %715 = vmatprep.mubr.bf16.mxu1 %v1072_v51  ;;  %v1100_v22 = vld [vmem:[%s1444_s0 + $0x244] ss:$8 sps:$4 sm:$0xff]   ;;  %v1098_v24 = vld [vmem:[%s1444_s0 + $0x240] ss:$8 sps:$4 sm:$0xff]  }
  0x1e   :  { %v23_v28 = vld [vmem:[%s1446_s2] sm:$0xff] }
  0x1f   :  { %323 = vmatpush1.bf16.msra.mxu0 %v1021_v33  ;;  %v25_v33 = vld [vmem:[%s1446_s2 + $0x10] sm:$0xff] }
  0x20   :  { %690 = vmatpush1.bf16.msra.mxu1 %v1018_v32  ;;  %324 = vmatprep.subr.bf16.mxu0 %v1022_v34 }
  0x21   :  { %691 = vmatprep.subr.bf16.mxu1 %v1026_v35 }
  0x23   :  { %325 = vmatpush2.bf16.msra.mxu0 %v1027_v37 }
  0x24   :  { %692 = vmatpush1.bf16.msra.mxu1 %v1024_v36  ;;  %326 = vmatprep.subr.bf16.mxu0 %v1028_v38  ;;  %v26_v36 = vld [vmem:[%s1446_s2 + $0x18] sm:$0xff] }
  0x25   :  { %693 = vmatprep.subr.bf16.mxu1 %v1032_v39 }
  0x27   :  { %327 = vmatpush2.bf16.msra.mxu0 %v1033_v41 }
  0x28   :  { %694 = vmatpush1.bf16.msra.mxu1 %v1030_v40  ;;  %328 = vmatprep.subr.bf16.mxu0 %v1034_v42  ;;  %v27_v42 = vld [vmem:[%s1446_s2 + $0x20] sm:$0xff] }
  0x29   :  { %695 = vmatprep.subr.bf16.mxu1 %v1038_v43 }
  0x2b   :  { %329 = vmatpush2.bf16.msra.mxu0 %v1039_v45 }
  0x2c   :  { %696 = vmatpush1.bf16.msra.mxu1 %v1036_v44  ;;  %330 = vmatprep.subr.bf16.mxu0 %v1040_v46  ;;  %v28_v46 = vld [vmem:[%s1446_s2 + $0x28] sm:$0xff] }
  0x2d   :  { %697 = vmatprep.subr.bf16.mxu1 %v1044_v47 }
  0x2f   :  { %331 = vmatpush2.bf16.msra.mxu0 %v1045_v49 }
  0x30   :  { %698 = vmatpush1.bf16.msra.mxu1 %v1042_v48  ;;  %332 = vmatprep.subr.bf16.mxu0 %v1046_v50 }
  0x31   :  { %699 = vmatprep.subr.bf16.mxu1 %v1050_v52  ;;  %v29_v52 = vld [vmem:[%s1446_s2 + $0x30] sm:$0xff] }
  0x33   :  { %333 = vmatpush2.bf16.msra.mxu0 %v1051_v54 }
  0x34   :  { %700 = vmatpush2.bf16.msra.mxu1 %v1048_v53  ;;  %334 = vmatprep.subr.bf16.mxu0 %v1052_v56  ;;  %v30_v56 = vld [vmem:[%s1446_s2 + $0x38] sm:$0xff] }
  0x35   :  { %701 = vmatprep.subr.bf16.mxu1 %v1056_v57 }
  0x37   :  { %335 = vmatpush2.bf16.msra.mxu0 %v1057_v59 }
  0x38   :  { %702 = vmatpush2.bf16.msra.mxu1 %v1054_v58  ;;  %336 = vmatprep.subr.bf16.mxu0 %v1058_v60 }
  0x39   :  { %703 = vmatprep.subr.bf16.mxu1 %v1062_v61 }
  0x3b   :  { %337 = vmatpush2.bf16.msra.mxu0 %v1063_v63 }
  0x3c   :  { %704 = vmatpush2.bf16.msra.mxu1 %v1060_v62  ;;  %338 = vmatprep.subr.bf16.mxu0 %v1064_v0 }
  0x3d   :  { %705 = vmatprep.subr.bf16.mxu1 %v1068_v2 }
  0x3f   :  { %339 = vmatpush2.bf16.msra.mxu0 %v1069_v4 }
  0x40   :  { %706 = vmatpush2.bf16.msra.mxu1 %v1066_v3  ;;  %744 = vmatprep.subr.bf16.mxu0 %v1078_v6 }
  0x41   :  { %707 = vmatprep.subr.bf16.mxu1 %v1075_v5 }
  0x42   :  { %341 = vmatmul.mubr.bf16.vlgmr.msra.gmra.mxu0 %v1070_v7 }
  0x43   :  { %745 = vmatpush1.bf16.msra.mxu0 %v1076_v9  ;;  %350 = vmatprep.mubr.bf16.mxu0 %v1086_v12 }
  0x44   :  { %708 = vmatpush2.bf16.msra.mxu1 %v1073_v8  ;;  %746 = vmatprep.subr.bf16.mxu0 %v1085_v11 }
  0x45   :  { %709 = vmatprep.subr.bf16.mxu1 %v1082_v10 }
  0x47   :  { %747 = vmatpush1.bf16.msra.mxu0 %v1083_v14 }
  0x48   :  { %710 = vmatpush2.bf16.msra.mxu1 %v1080_v13  ;;  %748 = vmatprep.subr.bf16.mxu0 %v1094_v16 }
  0x49   :  { %711 = vmatprep.subr.bf16.mxu1 %v1091_v15 }
  0x4a   :  { %351 = vmatmul.mubr.bf16.gmra.mxu0 %v1088_v17 }
  0x4b   :  { %749 = vmatpush1.bf16.msra.mxu0 %v1092_v20  ;;  %768 = vmatprep.mubr.bf16.mxu0 %v1101_v1 }
  0x4c   :  { %712 = vmatpush2.bf16.msra.mxu1 %v1089_v18  ;;  %750 = vmatprep.subr.bf16.mxu0 %v1100_v22 }
  0x4d   :  { %713 = vmatprep.subr.bf16.mxu1 %v1097_v21 }
  0x4f   :  { %751 = vmatpush1.bf16.msra.mxu0 %v1098_v24 }
  0x50   :  { %714 = vmatpush2.bf16.msra.mxu1 %v1095_v23 }
  0x52   :  { %954 = vmatmul.mubr.msk.bf16.vlgmr.msra.gmra.mxu0 %vm301_vm0, %v1180_v19  ;;  %v24_v19 = vld [vmem:[%s1446_s2 + $0x8] sm:$0xff] }
  0x53   :  { %716 = vmatmul.mubr.bf16.vlgmr.msra.gmra.mxu1 %v1070_v7  ;;  %778 = vmatprep.mubr.bf16.mxu0 %v1101_v1 }
  0x54   :  { %725 = vmatprep.mubr.bf16.mxu1 %v1086_v12 }
  0x5a   :  { %955 = vmatmul.mubr.msk.bf16.gmra.mxu0 %vm301_vm0, %v1293_v55 }
  0x5b   :  { %726 = vmatmul.mubr.bf16.gmra.mxu1 %v1088_v17 }
  0xd3   :  { %v395_v25 = vpop.f32.mrf.mxu1 }
  0xd5   :  { %v397_v26 = vpop.f32.mrf.mxu1 }
  0xd7   :  { %v399_v27 = vpop.f32.mrf.mxu1 }
  0xd9   :  { %v401_v29 = vpop.f32.mrf.mxu1 }
  0xdb   :  { %v405_v1 = vpop.f32.mrf.mxu1 }
  0xdd   :  { %v407_v40 = vpop.f32.mrf.mxu1 }
  0xdf   :  { %v409_v50 = vpop.f32.mrf.mxu1 }
  0xe1   :  { %v411_v60 = vpop.f32.mrf.mxu1 }
 0x102   :  { %v342_v30 = vpop.f32.mrf.mxu0 }
 0x103   :  { %v343_v31 = vadd.f32 %v342_v30, %v23_v28 }
 0x104   :  { %v344_v32 = vpop.f32.mrf.mxu0 }
 0x105   :  { %v345_v34 = vadd.f32 %v344_v32, %v24_v19  ;;  %v396_v37 = vadd.f32 %v395_v25, %v343_v31 }
 0x106   :  { %v346_v35 = vpop.f32.mrf.mxu0 }
 0x107   :  { %v398_v38 = vadd.f32 %v397_v26, %v345_v34  ;;  %v347_v39 = vadd.f32 %v346_v35, %v25_v33 }
 0x108   :  { %v348_v41 = vpop.f32.mrf.mxu0 }
 0x109   :  { %v964_v43 = vpack.c.bf16 %v398_v38, %v396_v37  ;;  %v349_v44 = vadd.f32 %v348_v41, %v26_v36  ;;  %v400_v47 = vadd.f32 %v399_v27, %v347_v39 }
 0x10a   :  { %v352_v45 = vpop.f32.mrf.mxu0 }
 0x10b   :  { %438 = vst [vmem:[%s1447_s3] sm:$0xff] %v964_v43  ;;  %v402_v48 = vadd.f32 %v401_v29, %v349_v44  ;;  %v353_v49 = vadd.f32 %v352_v45, %v27_v42 }
 0x10c   :  { %v354_v51 = vpop.f32.mrf.mxu0 }
 0x10d   :  { %v965_v53 = vpack.c.bf16 %v402_v48, %v400_v47  ;;  %v355_v54 = vadd.f32 %v354_v51, %v28_v46  ;;  %v406_v57 = vadd.f32 %v405_v1, %v353_v49 }
 0x10e   :  { %v356_v55 = vpop.f32.mrf.mxu0 }
 0x10f   :  { %439 = vst [vmem:[%s1447_s3 + $0x8] sm:$0xff] %v965_v53  ;;  %v408_v58 = vadd.f32 %v407_v40, %v355_v54  ;;  %v357_v59 = vadd.f32 %v356_v55, %v29_v52 }
 0x110   :  { %v358_v61 = vpop.f32.mrf.mxu0 }
 0x111   :  { %v966_v62 = vpack.c.bf16 %v408_v58, %v406_v57  ;;  %v359_v63 = vadd.f32 %v358_v61, %v30_v56  ;;  %v410_v3 = vadd.f32 %v409_v50, %v357_v59 }
 0x112   :  { %v770_v2 = vpop.f32.mrf.mxu0 }
 0x113   :  { %v717_v0 = vpop.f32.mrf.mxu1  ;;  %440 = vst [vmem:[%s1447_s3 + $0x10] sm:$0xff] %v966_v62  ;;  %v412_v4 = vadd.f32 %v411_v60, %v359_v63 }
 0x114   :  { %v718_v5 = vadd.f32 %v717_v0, %v23_v28  ;;  %v772_v7 = vpop.f32.mrf.mxu0 }
 0x115   :  { %v719_v6 = vpop.f32.mrf.mxu1  ;;  %v967_v8 = vpack.c.bf16 %v412_v4, %v410_v3 }
 0x116   :  { %v720_v9 = vadd.f32 %v719_v6, %v24_v19  ;;  %v774_v11 = vpop.f32.mrf.mxu0  ;;  %v771_v12 = vadd.f32 %v770_v2, %v718_v5 }
 0x117   :  { %v721_v10 = vpop.f32.mrf.mxu1  ;;  %441 = vst [vmem:[%s1447_s3 + $0x18] sm:$0xff] %v967_v8 }
 0x118   :  { %v773_v13 = vadd.f32 %v772_v7, %v720_v9  ;;  %v722_v14 = vadd.f32 %v721_v10, %v25_v33  ;;  %v776_v16 = vpop.f32.mrf.mxu0 }
 0x119   :  { %v723_v15 = vpop.f32.mrf.mxu1 }
 0x11a   :  { %v968_v17 = vpack.c.bf16 %v773_v13, %v771_v12  ;;  %v724_v18 = vadd.f32 %v723_v15, %v26_v36  ;;  %v780_v21 = vpop.f32.mrf.mxu0  ;;  %v775_v22 = vadd.f32 %v774_v11, %v722_v14 }
 0x11b   :  { %v727_v20 = vpop.f32.mrf.mxu1 }
 0x11c   :  { %960 = vst [vmem:[%s1447_s3 + $0x20] sm:$0xff] %v968_v17  ;;  %v777_v23 = vadd.f32 %v776_v16, %v724_v18  ;;  %v728_v24 = vadd.f32 %v727_v20, %v27_v42  ;;  %v782_v26 = vpop.f32.mrf.mxu0 }
 0x11d   :  { %v729_v25 = vpop.f32.mrf.mxu1 }
 0x11e   :  { %v969_v27 = vpack.c.bf16 %v777_v23, %v775_v22  ;;  %v730_v28 = vadd.f32 %v729_v25, %v28_v46  ;;  %v784_v30 = vpop.f32.mrf.mxu0  ;;  %v781_v19 = vadd.f32 %v780_v21, %v728_v24 }
 0x11f   :  { %v731_v29 = vpop.f32.mrf.mxu1 }
 0x120   :  { %961 = vst [vmem:[%s1447_s3 + $0x28] sm:$0xff] %v969_v27  ;;  %v783_v31 = vadd.f32 %v782_v26, %v730_v28  ;;  %v732_v32 = vadd.f32 %v731_v29, %v29_v52  ;;  %v786_v35 = vpop.f32.mrf.mxu0 }
 0x121   :  { %v733_v1 = vpop.f32.mrf.mxu1 }
 0x122   :  { %v970_v33 = vpack.c.bf16 %v783_v31, %v781_v19  ;;  %v734_v34 = vadd.f32 %v733_v1, %v30_v56  ;;  %v785_v36 = vadd.f32 %v784_v30, %v732_v32 }
 0x124   :  { %962 = vst [vmem:[%s1447_s3 + $0x30] sm:$0xff] %v970_v33  ;;  %v787_v37 = vadd.f32 %v786_v35, %v734_v34 }
 0x126   :  { %v971_v38 = vpack.c.bf16 %v787_v37, %v785_v36 }
 0x128   :  { %963 = vst [vmem:[%s1447_s3 + $0x38] sm:$0xff] %v971_v38 }

// kernel: refine_parsing_net_forward.11
= control target key start
LH: loop header
LB: loop body
LE: loop exit
PB: predicated region body
PF: predicated region fallthrough
CT: control target
= control target key end

     0   :  { %vm201_vm0 = vcmask 261120   ;;  %vm306_vm1 = vcmask 523264   ;;  %vm388_vm3 = vcmask 519168   ;;  %s1225_s0 = inlined_call_operand.vmem [shape: bf16[2,288,64], index: 0, kind: input, shape index: {}]   ;;  %s1226_s1 = inlined_call_operand.vmem [shape: bf16[32,288], index: 1, kind: input, shape index: {}]   ;;  %s1227_s2 = inlined_call_operand.vmem [shape: f32[32,64], index: 2, kind: input, shape index: {}]   ;;  %s1228_s3 = inlined_call_operand.vmem [shape: bf16[2,32,64], index: 3, kind: output, shape index: {}]  }
   0x1   :  { %v907_v0 = vld [vmem:[%s1225_s0 + $0x78] sm:$0xff]   ;;  %v908_v1 = vld [vmem:[%s1225_s0 + $0x88] sm:$0xff]   ;;  %v910_v3 = vld [vmem:[%s1225_s0 + $0x70] sm:$0xff]  }
   0x2   :  { %827 = vmatprep.subr.bf16.mxu0 %v907_v0  ;;  %v909_v2 = vld [vmem:[%s1225_s0 + $0x38] sm:$0xff]   ;;  %891 = vmatprep.subr.bf16.mxu1 %v908_v1  ;;  %v911_v4 = vld [vmem:[%s1225_s0 + $0x80] sm:$0xff]   ;;  %v912_v5 = vld [vmem:[%s1225_s0 + $0x30] sm:$0xff]  }
   0x3   :  { %828 = vmatpush3.bf16.msra.mxu0 %v909_v2  ;;  %892 = vmatpush3.bf16.msra.mxu1 %v908_v1  ;;  %v1008_v6 = vld [vmem:[%s1226_s1 + $0x8] ss:$12 sps:$4 sm:$0xff]   ;;  %v1016_v8 = vld [vmem:[%s1226_s1 + $0x20] ss:$12 sps:$4 sm:$0xff]   ;;  %v923_v16 = vld [vmem:[%s1225_s0 + $0x58] sm:$0xff]  }
   0x4   :  { %829 = vmatprep.subr.bf16.mxu0 %v910_v3  ;;  %893 = vmatprep.subr.bf16.mxu1 %v911_v4  ;;  %v914_v7 = vld [vmem:[%s1225_s0 + $0x68] sm:$0xff]   ;;  %v919_v12 = vld [vmem:[%s1225_s0 + $0x60] sm:$0xff]   ;;  %v924_v17 = vld [vmem:[%s1225_s0 + $0xf8] sm:$0xff]  }
   0x5   :  { %895 = vmatprep.mubr.msk.bf16.mxu1 %vm201_vm0, %v1008_v6  ;;  %v916_v9 = vld [vmem:[%s1225_s0 + $0x108] sm:$0xff]   ;;  %v920_v13 = vld [vmem:[%s1225_s0 + $0x100] sm:$0xff]   ;;  %v925_v18 = vld [vmem:[%s1225_s0 + $0x18] sm:$0xff]  }
   0x6   :  { %v917_v10 = vld [vmem:[%s1225_s0 + $0x28] sm:$0xff]   ;;  %v921_v14 = vld [vmem:[%s1225_s0 + $0x20] sm:$0xff]   ;;  %v926_v19 = vld [vmem:[%s1225_s0 + $0xb8] sm:$0xff]  }
   0x7   :  { %830 = vmatpush3.bf16.msra.mxu0 %v912_v5  ;;  %894 = vmatpush3.bf16.msra.mxu1 %v911_v4  ;;  %v918_v11 = vld [vmem:[%s1225_s0 + $0xc8] sm:$0xff]   ;;  %v922_v15 = vld [vmem:[%s1225_s0 + $0xc0] sm:$0xff]   ;;  %v927_v20 = vld [vmem:[%s1225_s0 + $0x50] sm:$0xff]  }
   0x8   :  { %831 = vmatprep.subr.bf16.mxu0 %v914_v7  ;;  %859 = vmatprep.subr.bf16.mxu1 %v916_v9  ;;  %v928_v21 = vld [vmem:[%s1225_s0 + $0xf0] sm:$0xff]   ;;  %v931_v24 = vld [vmem:[%s1225_s0 + $0x48] sm:$0xff]   ;;  %v935_v28 = vld [vmem:[%s1225_s0 + $0x40] sm:$0xff]  }
   0x9   :  { %v929_v22 = vld [vmem:[%s1225_s0 + $0x10] sm:$0xff]   ;;  %v932_v25 = vld [vmem:[%s1225_s0 + $0xe8] sm:$0xff]   ;;  %v936_v29 = vld [vmem:[%s1225_s0 + $0xe0] sm:$0xff]  }
   0xa   :  { %896 = vmatmul.mubr.msk.bf16.vlgmr.msra.gmra.mxu1 %vm201_vm0, %v1016_v8  ;;  %v930_v23 = vld [vmem:[%s1225_s0 + $0xb0] sm:$0xff]   ;;  %v933_v26 = vld [vmem:[%s1225_s0 + $0x8] sm:$0xff]   ;;  %v937_v30 = vld [vmem:[%s1225_s0] sm:$0xff]  }
   0xb   :  { %832 = vmatpush3.bf16.msra.mxu0 %v917_v10  ;;  %860 = vmatpush3.bf16.msra.mxu1 %v918_v11  ;;  %v934_v27 = vld [vmem:[%s1225_s0 + $0xa8] sm:$0xff]   ;;  %v938_v31 = vld [vmem:[%s1225_s0 + $0xa0] sm:$0xff]   ;;  %v942_v34 = vld [vmem:[%s1225_s0 + $0xd8] sm:$0xff]  }
   0xc   :  { %833 = vmatprep.subr.bf16.mxu0 %v919_v12  ;;  %861 = vmatprep.subr.bf16.mxu1 %v920_v13  ;;  %v939_v32 = vld [vmem:[%s1226_s1] ss:$12 sps:$4 sm:$0xff]   ;;  %v941_v33 = vld [vmem:[%s1226_s1 + $0x4] ss:$12 sps:$4 sm:$0xff]   ;;  %v943_v35 = vld [vmem:[%s1225_s0 + $0x118] sm:$0xff]  }
   0xd   :  { %240 = vmatprep.mubr.bf16.mxu0 %v941_v33  ;;  %570 = vmatprep.mubr.bf16.mxu1 %v941_v33  ;;  %v944_v36 = vld [vmem:[%s1225_s0 + $0x98] sm:$0xff]   ;;  %v945_v37 = vld [vmem:[%s1225_s0 + $0xd0] sm:$0xff]   ;;  %v23_v45 = vld [vmem:[%s1227_s2] sm:$0xff] }
   0xe   :  { %v946_v38 = vld [vmem:[%s1225_s0 + $0x90] sm:$0xff]   ;;  %v947_v39 = vld [vmem:[%s1226_s1 + $0x1c] ss:$12 sps:$4 sm:$0xff]   ;;  %v949_v40 = vld [vmem:[%s1226_s1 + $0x18] ss:$12 sps:$4 sm:$0xff]  }
   0xf   :  { %834 = vmatpush3.bf16.msra.mxu0 %v921_v14  ;;  %862 = vmatpush3.bf16.msra.mxu1 %v922_v15  ;;  %v950_v41 = vld [vmem:[%s1225_s0 + $0x110] sm:$0xff]   ;;  %v24_v51 = vld [vmem:[%s1227_s2 + $0x8] sm:$0xff] }
  0x10   :  { %835 = vmatprep.subr.bf16.mxu0 %v923_v16  ;;  %863 = vmatprep.subr.bf16.mxu1 %v924_v17  ;;  %v25_v60 = vld [vmem:[%s1227_s2 + $0x10] sm:$0xff] }
  0x13   :  { %836 = vmatpush3.bf16.msra.mxu0 %v925_v18  ;;  %864 = vmatpush3.bf16.msra.mxu1 %v926_v19 }
  0x14   :  { %837 = vmatprep.subr.bf16.mxu0 %v927_v20  ;;  %865 = vmatprep.subr.bf16.mxu1 %v928_v21 }
  0x17   :  { %838 = vmatpush3.bf16.msra.mxu0 %v929_v22  ;;  %866 = vmatpush3.bf16.msra.mxu1 %v930_v23 }
  0x18   :  { %839 = vmatprep.subr.bf16.mxu0 %v931_v24  ;;  %867 = vmatprep.subr.bf16.mxu1 %v932_v25 }
  0x1b   :  { %840 = vmatpush3.bf16.msra.mxu0 %v933_v26  ;;  %868 = vmatpush3.bf16.msra.mxu1 %v934_v27 }
  0x1c   :  { %841 = vmatprep.subr.bf16.mxu0 %v935_v28  ;;  %869 = vmatprep.subr.bf16.mxu1 %v936_v29 }
  0x1f   :  { %842 = vmatpush3.bf16.msra.mxu0 %v937_v30  ;;  %870 = vmatpush3.bf16.msra.mxu1 %v938_v31 }
  0x20   :  { %871 = vmatprep.subr.bf16.mxu1 %v942_v34  ;;  %899 = vmatprep.subr.bf16.mxu0 %v943_v35 }
  0x22   :  { %241 = vmatmul.mubr.bf16.vlgmr.msra.gmra.mxu0 %v939_v32 }
  0x23   :  { %872 = vmatpush3.bf16.msra.mxu1 %v944_v36  ;;  %900 = vmatpush3.bf16.msra.mxu0 %v943_v35 }
  0x24   :  { %873 = vmatprep.subr.bf16.mxu1 %v945_v37  ;;  %248 = vmatprep.mubr.bf16.mxu0 %v947_v39 }
  0x25   :  { %901 = vmatprep.subr.bf16.mxu0 %v950_v41 }
  0x27   :  { %874 = vmatpush3.bf16.msra.mxu1 %v946_v38  ;;  %902 = vmatpush3.bf16.msra.mxu0 %v950_v41 }
  0x2a   :  { %249 = vmatmul.mubr.bf16.gmra.mxu0 %v949_v40  ;;  %571 = vmatmul.mubr.bf16.vlgmr.msra.gmra.mxu1 %v939_v32 }
  0x2b   :  { %903 = vmatprep.mubr.msk.bf16.mxu0 %vm201_vm0, %v1008_v6  ;;  %578 = vmatprep.mubr.bf16.mxu1 %v947_v39  ;;  %v26_v6 = vld [vmem:[%s1227_s2 + $0x18] sm:$0xff] }
  0x32   :  { %904 = vmatmul.mubr.msk.bf16.vlgmr.msra.gmra.mxu0 %vm201_vm0, %v1016_v8  ;;  %579 = vmatmul.mubr.bf16.gmra.mxu1 %v949_v40 }
  0xca   :  { %v897_v42 = vpop.f32.mrf.mxu1 }
  0xcc   :  { %v291_v43 = vpop.f32.mrf.mxu1 }
  0xce   :  { %v898_v47 = vpop.f32.mrf.mxu1 }
  0xd0   :  { %v294_v53 = vpop.f32.mrf.mxu1 }
  0xe2   :  { %v843_v44 = vpop.f32.mrf.mxu0 }
  0xe4   :  { %v844_v46 = vpop.f32.mrf.mxu0 }
  0xe5   :  { %v845_v48 = vadd.f32 %v844_v46, %v843_v44 }
  0xe6   :  { %v846_v49 = vpop.f32.mrf.mxu0 }
  0xe7   :  { %v243_v50 = vadd.f32 %v845_v48, %v23_v45 }
  0xe8   :  { %v847_v52 = vpop.f32.mrf.mxu0 }
  0xe9   :  { %v848_v54 = vadd.f32 %v847_v52, %v846_v49  ;;  %v292_v55 = vadd.f32 %v291_v43, %v243_v50 }
  0xea   :  { %v849_v56 = vpop.f32.mrf.mxu0  ;;  %v875_v58 = vpop.f32.mrf.mxu1 }
  0xeb   :  { %v246_v57 = vadd.f32 %v848_v54, %v24_v51  ;;  %v307_v59 = vsel %vm306_vm1, %v292_v55, 0.0 }
  0xec   :  { %v850_v61 = vpop.f32.mrf.mxu0  ;;  %308 = vadd.xlane.f32.xlu0 %v307_v59  ;;  %v876_v63 = vpop.f32.mrf.mxu1 }
  0xed   :  { %v851_v62 = vadd.f32 %v850_v61, %v849_v56  ;;  %v295_v0 = vadd.f32 %v294_v53, %v246_v57  ;;  %v877_v3 = vadd.f32 %v876_v63, %v875_v58 }
  0xee   :  { %v852_v1 = vpop.f32.mrf.mxu0  ;;  %v878_v4 = vpop.f32.mrf.mxu1 }
  0xef   :  { %v251_v2 = vadd.f32 %v851_v62, %v25_v60  ;;  %v310_v5 = vsel %vm306_vm1, %v295_v0, 0.0  ;;  %v573_v15 = vadd.f32 %v877_v3, %v23_v45 }
  0xf0   :  { %v853_v7 = vpop.f32.mrf.mxu0  ;;  %311 = vadd.xlane.f32.xlu0 %v310_v5  ;;  %v879_v9 = vpop.f32.mrf.mxu1 }
  0xf1   :  { %v854_v8 = vadd.f32 %v853_v7, %v852_v1  ;;  %v300_v10 = vadd.f32 %v897_v42, %v251_v2  ;;  %v880_v13 = vadd.f32 %v879_v9, %v878_v4 }
  0xf2   :  { %v905_v11 = vpop.f32.mrf.mxu0  ;;  %v881_v14 = vpop.f32.mrf.mxu1 }
  0xf3   :  { %v254_v12 = vadd.f32 %v854_v8, %v26_v6  ;;  %v313_v16 = vsel %vm306_vm1, %v300_v10, 0.0  ;;  %v576_v24 = vadd.f32 %v880_v13, %v24_v51 }
  0xf4   :  { %v621_v17 = vpop.f32.mrf.mxu0  ;;  %314 = vadd.xlane.f32.xlu1 %v313_v16  ;;  %v882_v18 = vpop.f32.mrf.mxu1 }
  0xf5   :  { %v622_v19 = vadd.f32 %v621_v17, %v573_v15  ;;  %v303_v20 = vadd.f32 %v898_v47, %v254_v12  ;;  %v883_v21 = vadd.f32 %v882_v18, %v881_v14 }
  0xf6   :  { %v906_v22 = vpop.f32.mrf.mxu0  ;;  %v884_v23 = vpop.f32.mrf.mxu1 }
  0xf7   :  { %v316_v25 = vsel %vm306_vm1, %v303_v20, 0.0  ;;  %v636_v26 = vsel %vm306_vm1, %v622_v19, 0.0  ;;  %v581_v27 = vadd.f32 %v883_v21, %v25_v60 }
  0xf8   :  { %v624_v28 = vpop.f32.mrf.mxu0  ;;  %317 = vadd.xlane.f32.xlu1 %v316_v25  ;;  %637 = vadd.xlane.f32.xlu0 %v636_v26  ;;  %v885_v29 = vpop.f32.mrf.mxu1 }
  0xf9   :  { %v625_v30 = vadd.f32 %v624_v28, %v576_v24  ;;  %v886_v31 = vadd.f32 %v885_v29, %v884_v23  ;;  %v630_v32 = vadd.f32 %v905_v11, %v581_v27 }
  0xfb   :  { %v639_v33 = vsel %vm306_vm1, %v625_v30, 0.0  ;;  %v584_v34 = vadd.f32 %v886_v31, %v26_v6  ;;  %v642_v35 = vsel %vm306_vm1, %v630_v32, 0.0 }
  0xfc   :  { %640 = vadd.xlane.f32.xlu1 %v639_v33  ;;  %643 = vadd.xlane.f32.xlu0 %v642_v35 }
  0xfd   :  { %v633_v36 = vadd.f32 %v906_v22, %v584_v34 }
  0xff   :  { %v645_v37 = vsel %vm306_vm1, %v633_v36, 0.0 }
 0x100   :  { %646 = vadd.xlane.f32.xlu1 %v645_v37 }
 0x175   :  { %v309_v38 = vpop.xlane.xlu0 %308 }
 0x176   :  { %v320_v39 = vmul.f32 0.015625, %v309_v38 }
 0x178   :  { %v1145_v40 = vsub.f32 %v292_v55, %v320_v39 }
 0x179   :  { %v312_v41 = vpop.xlane.xlu0 %311 }
 0x17a   :  { %v321_v42 = vmul.f32 0.015625, %v312_v41  ;;  %v328_v43 = vmul.f32 %v1145_v40, %v1145_v40 }
 0x17c   :  { %v1149_v44 = vsub.f32 %v295_v0, %v321_v42  ;;  %v332_v45 = vsel %vm306_vm1, %v328_v43, 0.0 }
 0x17d   :  { %v315_v46 = vpop.xlane.xlu1 %314  ;;  %333 = vadd.xlane.f32.xlu0 %v332_v45 }
 0x17e   :  { %v322_v47 = vmul.f32 0.015625, %v315_v46  ;;  %v329_v48 = vmul.f32 %v1149_v44, %v1149_v44 }
 0x180   :  { %v1154_v49 = vsub.f32 %v300_v10, %v322_v47  ;;  %v335_v50 = vsel %vm306_vm1, %v329_v48, 0.0 }
 0x181   :  { %v318_v51 = vpop.xlane.xlu1 %317  ;;  %336 = vadd.xlane.f32.xlu1 %v335_v50  ;;  %v638_v52 = vpop.xlane.xlu0 %637 }
 0x182   :  { %v323_v53 = vmul.f32 0.015625, %v318_v51  ;;  %v648_v54 = vmul.f32 0.015625, %v638_v52  ;;  %v330_v55 = vmul.f32 %v1154_v49, %v1154_v49 }
 0x184   :  { %v1159_v56 = vsub.f32 %v303_v20, %v323_v53  ;;  %v1161_v57 = vsub.f32 %v622_v19, %v648_v54  ;;  %v338_v58 = vsel %vm306_vm1, %v330_v55, 0.0 }
 0x185   :  { %v641_v59 = vpop.xlane.xlu1 %640  ;;  %339 = vadd.xlane.f32.xlu0 %v338_v58  ;;  %v644_v61 = vpop.xlane.xlu0 %643 }
 0x186   :  { %v649_v60 = vmul.f32 0.015625, %v641_v59  ;;  %v331_v62 = vmul.f32 %v1159_v56, %v1159_v56  ;;  %v656_v63 = vmul.f32 %v1161_v57, %v1161_v57  ;;  %v650_v0 = vmul.f32 0.015625, %v644_v61 }
 0x188   :  { %v1168_v1 = vsub.f32 %v625_v30, %v649_v60  ;;  %v341_v2 = vsel %vm306_vm1, %v331_v62, 0.0  ;;  %v660_v3 = vsel %vm306_vm1, %v656_v63, 0.0  ;;  %v1172_v4 = vsub.f32 %v630_v32, %v650_v0 }
 0x189   :  { %342 = vadd.xlane.f32.xlu1 %v341_v2  ;;  %661 = vadd.xlane.f32.xlu0 %v660_v3  ;;  %v647_v5 = vpop.xlane.xlu1 %646 }
 0x18a   :  { %v657_v6 = vmul.f32 %v1168_v1, %v1168_v1  ;;  %v651_v7 = vmul.f32 0.015625, %v647_v5  ;;  %v658_v8 = vmul.f32 %v1172_v4, %v1172_v4 }
 0x18c   :  { %v663_v9 = vsel %vm306_vm1, %v657_v6, 0.0  ;;  %v1179_v10 = vsub.f32 %v633_v36, %v651_v7  ;;  %v666_v11 = vsel %vm306_vm1, %v658_v8, 0.0 }
 0x18d   :  { %664 = vadd.xlane.f32.xlu1 %v663_v9  ;;  %667 = vadd.xlane.f32.xlu0 %v666_v11 }
 0x18e   :  { %v659_v12 = vmul.f32 %v1179_v10, %v1179_v10 }
 0x190   :  { %v669_v13 = vsel %vm306_vm1, %v659_v12, 0.0 }
 0x191   :  { %670 = vadd.xlane.f32.xlu1 %v669_v13 }
 0x206   :  { %v334_v14 = vpop.xlane.xlu0 %333 }
 0x207   :  { %v344_v15 = vmul.f32 0.015625, %v334_v14 }
 0x209   :  { %v348_v16 = vadd.f32 1e-05, %v344_v15 }
 0x20a   :  { %v337_v17 = vpop.xlane.xlu1 %336 }
 0x20b   :  { %951 = vrsqrt.f32 %v348_v16  ;;  %v345_v18 = vmul.f32 0.015625, %v337_v17 }
 0x20d   :  { %v349_v19 = vadd.f32 1e-05, %v345_v18 }
 0x20e   :  { %v340_v20 = vpop.xlane.xlu0 %339 }
 0x20f   :  { %953 = vrsqrt.f32 %v349_v19  ;;  %v346_v21 = vmul.f32 0.015625, %v340_v20 }
 0x211   :  { %v350_v22 = vadd.f32 1e-05, %v346_v21 }
 0x212   :  { %v343_v23 = vpop.xlane.xlu1 %342  ;;  %v662_v24 = vpop.xlane.xlu0 %661 }
 0x213   :  { %955 = vrsqrt.f32 %v350_v22  ;;  %v347_v25 = vmul.f32 0.015625, %v343_v23  ;;  %v672_v26 = vmul.f32 0.015625, %v662_v24 }
 0x215   :  { %v351_v27 = vadd.f32 1e-05, %v347_v25  ;;  %v676_v28 = vadd.f32 1e-05, %v672_v26 }
 0x216   :  { %v665_v29 = vpop.xlane.xlu1 %664  ;;  %v668_v31 = vpop.xlane.xlu0 %667 }
 0x217   :  { %957 = vrsqrt.f32 %v351_v27  ;;  %v673_v30 = vmul.f32 0.015625, %v665_v29  ;;  %v674_v33 = vmul.f32 0.015625, %v668_v31 }
 0x218   :  { %v952_v32 = vpop.eup %951  ;;  %959 = vrsqrt.f32 %v676_v28 }
 0x219   :  { %v356_v34 = vmul.f32 %v952_v32, %v1145_v40  ;;  %v677_v35 = vadd.f32 1e-05, %v673_v30  ;;  %v678_v36 = vadd.f32 1e-05, %v674_v33 }
 0x21a   :  { %v671_v38 = vpop.xlane.xlu1 %670 }
 0x21b   :  { %vm360_vm2 = vcmp.ge.f32.partialorder %v356_v34, 0.0  ;;  %v364_v37 = vmul.f32 0.2, %v356_v34  ;;  %961 = vrsqrt.f32 %v677_v35  ;;  %v675_v41 = vmul.f32 0.015625, %v671_v38 }
 0x21c   :  { %v954_v39 = vpop.eup %953  ;;  %963 = vrsqrt.f32 %v678_v36 }
 0x21d   :  { %v368_v42 = vsel %vm360_vm2, %v356_v34, %v364_v37  ;;  %v357_v43 = vmul.f32 %v954_v39, %v1149_v44  ;;  %v679_v46 = vadd.f32 1e-05, %v675_v41 }
 0x21e   :  { %v819_v45 = vpack.c.bf16 %v368_v42, %v368_v42 }
 0x21f   :  { %vm361_vm4 = vcmp.ge.f32.partialorder %v357_v43, 0.0  ;;  %v365_v47 = vmul.f32 0.2, %v357_v43  ;;  %965 = vrsqrt.f32 %v679_v46 }
 0x220   :  { %v956_v48 = vpop.eup %955  ;;  %389 = vst.msk [vmem:[%s1228_s3] sm:$0xf] %vm388_vm3, %v819_v45 }
 0x221   :  { %v369_v40 = vsel %vm361_vm4, %v357_v43, %v365_v47  ;;  %v358_v50 = vmul.f32 %v956_v48, %v1154_v49 }
 0x222   :  { %v820_v51 = vpack.c.bf16 %v369_v40, %v369_v40 }
 0x223   :  { %vm362_vm5 = vcmp.ge.f32.partialorder %v358_v50, 0.0  ;;  %v366_v52 = vmul.f32 0.2, %v358_v50 }
 0x224   :  { %v958_v53 = vpop.eup %957  ;;  %390 = vst.msk [vmem:[%s1228_s3 + $0x4] sm:$0xf] %vm388_vm3, %v820_v51 }
 0x225   :  { %v960_v44 = vpop.eup %959  ;;  %v370_v54 = vsel %vm362_vm5, %v358_v50, %v366_v52  ;;  %v359_v55 = vmul.f32 %v958_v53, %v1159_v56 }
 0x226   :  { %v821_v58 = vpack.c.bf16 %v370_v54, %v370_v54  ;;  %v684_v59 = vmul.f32 %v960_v44, %v1161_v57 }
 0x227   :  { %vm363_vm6 = vcmp.ge.f32.partialorder %v359_v55, 0.0  ;;  %v367_v60 = vmul.f32 0.2, %v359_v55 }
 0x228   :  { %v962_v61 = vpop.eup %961  ;;  %391 = vst.msk [vmem:[%s1228_s3 + $0x8] sm:$0xf] %vm388_vm3, %v821_v58  ;;  %vm688_vm7 = vcmp.ge.f32.partialorder %v684_v59, 0.0  ;;  %v692_v49 = vmul.f32 0.2, %v684_v59 }
 0x229   :  { %v964_v62 = vpop.eup %963  ;;  %v371_v63 = vsel %vm363_vm6, %v359_v55, %v367_v60  ;;  %v685_v0 = vmul.f32 %v962_v61, %v1168_v1 }
 0x22a   :  { %v822_v2 = vpack.c.bf16 %v371_v63, %v371_v63  ;;  %v696_v3 = vsel %vm688_vm7, %v684_v59, %v692_v49  ;;  %v686_v56 = vmul.f32 %v964_v62, %v1172_v4 }
 0x22b   :  { %v823_v5 = vpack.c.bf16 %v696_v3, %v696_v3  ;;  %vm689_vm8 = vcmp.ge.f32.partialorder %v685_v0, 0.0  ;;  %v693_v57 = vmul.f32 0.2, %v685_v0 }
 0x22c   :  { %392 = vst.msk [vmem:[%s1228_s3 + $0xc] sm:$0xf] %vm388_vm3, %v822_v2  ;;  %vm690_vm9 = vcmp.ge.f32.partialorder %v686_v56, 0.0  ;;  %v694_v6 = vmul.f32 0.2, %v686_v56  ;;  %v966_v7 = vpop.eup %965 }
 0x22d   :  { %815 = vst.msk [vmem:[%s1228_s3 + $0x10] sm:$0xf] %vm388_vm3, %v823_v5  ;;  %v697_v1 = vsel %vm689_vm8, %v685_v0, %v693_v57  ;;  %v687_v4 = vmul.f32 %v966_v7, %v1179_v10 }
 0x22e   :  { %v824_v8 = vpack.c.bf16 %v697_v1, %v697_v1  ;;  %v698_v9 = vsel %vm690_vm9, %v686_v56, %v694_v6 }
 0x22f   :  { %v825_v11 = vpack.c.bf16 %v698_v9, %v698_v9  ;;  %vm691_vm10 = vcmp.ge.f32.partialorder %v687_v4, 0.0  ;;  %v695_v12 = vmul.f32 0.2, %v687_v4 }
 0x230   :  { %816 = vst.msk [vmem:[%s1228_s3 + $0x14] sm:$0xf] %vm388_vm3, %v824_v8 }
 0x231   :  { %817 = vst.msk [vmem:[%s1228_s3 + $0x18] sm:$0xf] %vm388_vm3, %v825_v11  ;;  %v699_v13 = vsel %vm691_vm10, %v687_v4, %v695_v12 }
 0x232   :  { %v826_v14 = vpack.c.bf16 %v699_v13, %v699_v13 }
 0x234   :  { %818 = vst.msk [vmem:[%s1228_s3 + $0x1c] sm:$0xf] %vm388_vm3, %v826_v14 }

// kernel: refine_parsing_net_forward.12
= control target key start
LH: loop header
LB: loop body
LE: loop exit
PB: predicated region body
PF: predicated region fallthrough
CT: control target
= control target key end

     0   :  { %vm217_vm0 = vcmask 523264   ;;  %vm338_vm1 = vcmask 519168   ;;  %s1091_s0 = inlined_call_operand.vmem [shape: bf16[2,320,64], index: 0, kind: input, shape index: {}]   ;;  %s1092_s1 = inlined_call_operand.vmem [shape: bf16[32,320], index: 1, kind: input, shape index: {}]   ;;  %s1093_s2 = inlined_call_operand.vmem [shape: f32[32,64], index: 2, kind: input, shape index: {}]   ;;  %s1094_s3 = inlined_call_operand.vmem [shape: bf16[2,32,64], index: 3, kind: output, shape index: {}]  }
   0x1   :  { %v829_v0 = vld [vmem:[%s1091_s0 + $0x78] sm:$0xff]   ;;  %v832_v3 = vld [vmem:[%s1091_s0 + $0x70] sm:$0xff]   ;;  %v835_v6 = vld [vmem:[%s1091_s0 + $0x68] sm:$0xff]  }
   0x2   :  { %v830_v1 = vld [vmem:[%s1091_s0 + $0x98] sm:$0xff]   ;;  %737 = vmatprep.subr.bf16.mxu0 %v829_v0  ;;  %v833_v4 = vld [vmem:[%s1091_s0 + $0x90] sm:$0xff]   ;;  %v836_v7 = vld [vmem:[%s1091_s0 + $0x88] sm:$0xff]  }
   0x3   :  { %v831_v2 = vld [vmem:[%s1091_s0 + $0x38] sm:$0xff]   ;;  %805 = vmatprep.subr.bf16.mxu1 %v830_v1  ;;  %v834_v5 = vld [vmem:[%s1091_s0 + $0x30] sm:$0xff]   ;;  %v837_v8 = vld [vmem:[%s1091_s0 + $0x28] sm:$0xff]  }
   0x4   :  { %738 = vmatpush3.bf16.msra.mxu0 %v831_v2  ;;  %806 = vmatpush3.bf16.msra.mxu1 %v830_v1  ;;  %v838_v9 = vld [vmem:[%s1091_s0 + $0x60] sm:$0xff]   ;;  %v936_v12 = vld [vmem:[%s1092_s1 + $0x8] ss:$12 sps:$4 sm:$0xff]   ;;  %v842_v13 = vld [vmem:[%s1091_s0 + $0x58] sm:$0xff]  }
   0x5   :  { %739 = vmatprep.subr.bf16.mxu0 %v832_v3  ;;  %807 = vmatprep.subr.bf16.mxu1 %v833_v4  ;;  %v839_v10 = vld [vmem:[%s1091_s0 + $0x80] sm:$0xff]   ;;  %v844_v15 = vld [vmem:[%s1091_s0 + $0x118] sm:$0xff]   ;;  %v847_v18 = vld [vmem:[%s1091_s0 + $0x50] sm:$0xff]  }
   0x6   :  { %v840_v11 = vld [vmem:[%s1091_s0 + $0x20] sm:$0xff]   ;;  %813 = vmatprep.mubr.msk.bf16.mxu1 %vm217_vm0, %v936_v12  ;;  %v845_v16 = vld [vmem:[%s1091_s0 + $0x18] sm:$0xff]   ;;  %v848_v19 = vld [vmem:[%s1091_s0 + $0x110] sm:$0xff]  }
   0x7   :  { %v946_v14 = vld [vmem:[%s1092_s1 + $0x20] ss:$12 sps:$4 sm:$0xff]   ;;  %v846_v17 = vld [vmem:[%s1091_s0 + $0xd8] sm:$0xff]   ;;  %v849_v20 = vld [vmem:[%s1091_s0 + $0x10] sm:$0xff]  }
   0x8   :  { %740 = vmatpush3.bf16.msra.mxu0 %v834_v5  ;;  %808 = vmatpush3.bf16.msra.mxu1 %v833_v4  ;;  %v850_v21 = vld [vmem:[%s1091_s0 + $0xd0] sm:$0xff]   ;;  %v851_v22 = vld [vmem:[%s1091_s0 + $0x48] sm:$0xff]   ;;  %v855_v26 = vld [vmem:[%s1091_s0 + $0x40] sm:$0xff]  }
   0x9   :  { %741 = vmatprep.subr.bf16.mxu0 %v835_v6  ;;  %809 = vmatprep.subr.bf16.mxu1 %v836_v7  ;;  %v852_v23 = vld [vmem:[%s1091_s0 + $0x108] sm:$0xff]   ;;  %v856_v27 = vld [vmem:[%s1091_s0 + $0x100] sm:$0xff]   ;;  %v862_v32 = vld [vmem:[%s1091_s0 + $0xf8] sm:$0xff]  }
   0xa   :  { %v853_v24 = vld [vmem:[%s1091_s0 + $0x8] sm:$0xff]   ;;  %v857_v28 = vld [vmem:[%s1091_s0] sm:$0xff]   ;;  %v863_v33 = vld [vmem:[%s1091_s0 + $0xb8] sm:$0xff]  }
   0xb   :  { %v854_v25 = vld [vmem:[%s1091_s0 + $0xc8] sm:$0xff]   ;;  %v858_v29 = vld [vmem:[%s1091_s0 + $0xc0] sm:$0xff]   ;;  %v864_v34 = vld [vmem:[%s1091_s0 + $0xf0] sm:$0xff]  }
   0xc   :  { %742 = vmatpush3.bf16.msra.mxu0 %v837_v8  ;;  %810 = vmatpush3.bf16.msra.mxu1 %v836_v7  ;;  %v859_v30 = vld [vmem:[%s1092_s1] ss:$12 sps:$4 sm:$0xff]   ;;  %v861_v31 = vld [vmem:[%s1092_s1 + $0x4] ss:$12 sps:$4 sm:$0xff]   ;;  %v865_v35 = vld [vmem:[%s1091_s0 + $0x138] sm:$0xff]  }
   0xd   :  { %743 = vmatprep.subr.bf16.mxu0 %v838_v9  ;;  %811 = vmatprep.subr.bf16.mxu1 %v839_v10  ;;  %v866_v36 = vld [vmem:[%s1091_s0 + $0xb0] sm:$0xff]   ;;  %v867_v37 = vld [vmem:[%s1092_s1 + $0x1c] ss:$12 sps:$4 sm:$0xff]   ;;  %v869_v38 = vld [vmem:[%s1092_s1 + $0x18] ss:$12 sps:$4 sm:$0xff]  }
   0xe   :  { %256 = vmatprep.mubr.bf16.mxu0 %v861_v31  ;;  %v870_v39 = vld [vmem:[%s1091_s0 + $0xe8] sm:$0xff]   ;;  %v871_v40 = vld [vmem:[%s1091_s0 + $0x130] sm:$0xff]   ;;  %v873_v42 = vld [vmem:[%s1091_s0 + $0xe0] sm:$0xff]  }
   0xf   :  { %v872_v41 = vld [vmem:[%s1091_s0 + $0xa8] sm:$0xff]   ;;  %v875_v44 = vld [vmem:[%s1091_s0 + $0xa0] sm:$0xff]   ;;  %v25_v63 = vld [vmem:[%s1093_s2 + $0x10] sm:$0xff] }
  0x10   :  { %744 = vmatpush3.bf16.msra.mxu0 %v840_v11  ;;  %812 = vmatpush3.bf16.msra.mxu1 %v839_v10  ;;  %v874_v43 = vld [vmem:[%s1091_s0 + $0x128] sm:$0xff]   ;;  %v876_v45 = vld [vmem:[%s1091_s0 + $0x120] sm:$0xff]   ;;  %v26_v6 = vld [vmem:[%s1093_s2 + $0x18] sm:$0xff] }
  0x11   :  { %745 = vmatprep.subr.bf16.mxu0 %v842_v13  ;;  %771 = vmatprep.subr.bf16.mxu1 %v844_v15  ;;  %v23_v49 = vld [vmem:[%s1093_s2] sm:$0xff]  ;;  %v24_v55 = vld [vmem:[%s1093_s2 + $0x8] sm:$0xff] }
  0x13   :  { %814 = vmatmul.mubr.msk.bf16.vlgmr.msra.gmra.mxu1 %vm217_vm0, %v946_v14 }
  0x14   :  { %746 = vmatpush3.bf16.msra.mxu0 %v845_v16  ;;  %772 = vmatpush3.bf16.msra.mxu1 %v846_v17 }
  0x15   :  { %747 = vmatprep.subr.bf16.mxu0 %v847_v18  ;;  %773 = vmatprep.subr.bf16.mxu1 %v848_v19 }
  0x16   :  { %536 = vmatprep.mubr.bf16.mxu1 %v861_v31 }
  0x18   :  { %748 = vmatpush3.bf16.msra.mxu0 %v849_v20  ;;  %774 = vmatpush3.bf16.msra.mxu1 %v850_v21 }
  0x19   :  { %749 = vmatprep.subr.bf16.mxu0 %v851_v22  ;;  %775 = vmatprep.subr.bf16.mxu1 %v852_v23 }
  0x1c   :  { %750 = vmatpush3.bf16.msra.mxu0 %v853_v24  ;;  %776 = vmatpush3.bf16.msra.mxu1 %v854_v25 }
  0x1d   :  { %751 = vmatprep.subr.bf16.mxu0 %v855_v26  ;;  %777 = vmatprep.subr.bf16.mxu1 %v856_v27 }
  0x20   :  { %752 = vmatpush3.bf16.msra.mxu0 %v857_v28  ;;  %778 = vmatpush3.bf16.msra.mxu1 %v858_v29 }
  0x21   :  { %779 = vmatprep.subr.bf16.mxu1 %v862_v32  ;;  %817 = vmatprep.subr.bf16.mxu0 %v865_v35 }
  0x23   :  { %257 = vmatmul.mubr.bf16.vlgmr.msra.gmra.mxu0 %v859_v30 }
  0x24   :  { %780 = vmatpush3.bf16.msra.mxu1 %v863_v33  ;;  %818 = vmatpush3.bf16.msra.mxu0 %v865_v35 }
  0x25   :  { %781 = vmatprep.subr.bf16.mxu1 %v864_v34  ;;  %264 = vmatprep.mubr.bf16.mxu0 %v867_v37 }
  0x26   :  { %819 = vmatprep.subr.bf16.mxu0 %v871_v40 }
  0x28   :  { %782 = vmatpush3.bf16.msra.mxu1 %v866_v36  ;;  %820 = vmatpush3.bf16.msra.mxu0 %v871_v40 }
  0x29   :  { %783 = vmatprep.subr.bf16.mxu1 %v870_v39  ;;  %821 = vmatprep.subr.bf16.mxu0 %v874_v43 }
  0x2b   :  { %265 = vmatmul.mubr.bf16.gmra.mxu0 %v869_v38 }
  0x2c   :  { %784 = vmatpush3.bf16.msra.mxu1 %v872_v41  ;;  %825 = vmatprep.mubr.msk.bf16.mxu0 %vm217_vm0, %v936_v12 }
  0x2d   :  { %785 = vmatprep.subr.bf16.mxu1 %v873_v42  ;;  %822 = vmatpush3.bf16.msra.mxu0 %v874_v43 }
  0x2e   :  { %823 = vmatprep.subr.bf16.mxu0 %v876_v45 }
  0x30   :  { %786 = vmatpush3.bf16.msra.mxu1 %v875_v44 }
  0x31   :  { %824 = vmatpush3.bf16.msra.mxu0 %v876_v45 }
  0x33   :  { %537 = vmatmul.mubr.bf16.vlgmr.msra.gmra.mxu1 %v859_v30 }
  0x34   :  { %544 = vmatprep.mubr.bf16.mxu1 %v867_v37  ;;  %826 = vmatmul.mubr.msk.bf16.vlgmr.msra.gmra.mxu0 %vm217_vm0, %v946_v14 }
  0x3b   :  { %545 = vmatmul.mubr.bf16.gmra.mxu1 %v869_v38 }
  0xd3   :  { %v815_v46 = vpop.f32.mrf.mxu1 }
  0xd5   :  { %v307_v48 = vpop.f32.mrf.mxu1 }
  0xd7   :  { %v816_v54 = vpop.f32.mrf.mxu1 }
  0xd9   :  { %v310_v62 = vpop.f32.mrf.mxu1 }
  0xe3   :  { %v753_v47 = vpop.f32.mrf.mxu0 }
  0xe5   :  { %v754_v50 = vpop.f32.mrf.mxu0 }
  0xe6   :  { %v755_v51 = vadd.f32 %v754_v50, %v753_v47 }
  0xe7   :  { %v756_v52 = vpop.f32.mrf.mxu0 }
  0xe8   :  { %v259_v53 = vadd.f32 %v755_v51, %v23_v49 }
  0xe9   :  { %v757_v56 = vpop.f32.mrf.mxu0 }
  0xea   :  { %v308_v57 = vadd.f32 %v307_v48, %v259_v53  ;;  %v758_v58 = vadd.f32 %v757_v56, %v756_v52 }
  0xeb   :  { %v759_v59 = vpop.f32.mrf.mxu0 }
  0xec   :  { %v729_v60 = vpack.c.bf16 %v308_v57, %v308_v57  ;;  %v262_v61 = vadd.f32 %v758_v58, %v24_v55 }
  0xed   :  { %v760_v0 = vpop.f32.mrf.mxu0 }
  0xee   :  { %339 = vst.msk [vmem:[%s1094_s3] sm:$0xf] %vm338_vm1, %v729_v60  ;;  %v311_v1 = vadd.f32 %v310_v62, %v262_v61  ;;  %v761_v2 = vadd.f32 %v760_v0, %v759_v59 }
  0xef   :  { %v762_v3 = vpop.f32.mrf.mxu0 }
  0xf0   :  { %v730_v4 = vpack.c.bf16 %v311_v1, %v311_v1  ;;  %v267_v5 = vadd.f32 %v761_v2, %v25_v63 }
  0xf1   :  { %v763_v7 = vpop.f32.mrf.mxu0 }
  0xf2   :  { %340 = vst.msk [vmem:[%s1094_s3 + $0x4] sm:$0xf] %vm338_vm1, %v730_v4  ;;  %v316_v8 = vadd.f32 %v815_v46, %v267_v5  ;;  %v764_v9 = vadd.f32 %v763_v7, %v762_v3 }
  0xf3   :  { %v787_v10 = vpop.f32.mrf.mxu1 }
  0xf4   :  { %v731_v11 = vpack.c.bf16 %v316_v8, %v316_v8  ;;  %v270_v12 = vadd.f32 %v764_v9, %v26_v6  ;;  %v827_v14 = vpop.f32.mrf.mxu0 }
  0xf5   :  { %v788_v13 = vpop.f32.mrf.mxu1 }
  0xf6   :  { %341 = vst.msk [vmem:[%s1094_s3 + $0x8] sm:$0xf] %vm338_vm1, %v731_v11  ;;  %v319_v15 = vadd.f32 %v816_v54, %v270_v12  ;;  %v789_v16 = vadd.f32 %v788_v13, %v787_v10  ;;  %v587_v18 = vpop.f32.mrf.mxu0 }
  0xf7   :  { %v790_v17 = vpop.f32.mrf.mxu1 }
  0xf8   :  { %v732_v19 = vpack.c.bf16 %v319_v15, %v319_v15  ;;  %v539_v20 = vadd.f32 %v789_v16, %v23_v49  ;;  %v828_v22 = vpop.f32.mrf.mxu0 }
  0xf9   :  { %v791_v21 = vpop.f32.mrf.mxu1 }
  0xfa   :  { %342 = vst.msk [vmem:[%s1094_s3 + $0xc] sm:$0xf] %vm338_vm1, %v732_v19  ;;  %v792_v23 = vadd.f32 %v791_v21, %v790_v17  ;;  %v588_v24 = vadd.f32 %v587_v18, %v539_v20  ;;  %v590_v26 = vpop.f32.mrf.mxu0 }
  0xfb   :  { %v793_v25 = vpop.f32.mrf.mxu1 }
  0xfc   :  { %v733_v27 = vpack.c.bf16 %v588_v24, %v588_v24  ;;  %v542_v28 = vadd.f32 %v792_v23, %v24_v55 }
  0xfd   :  { %v794_v29 = vpop.f32.mrf.mxu1 }
  0xfe   :  { %725 = vst.msk [vmem:[%s1094_s3 + $0x10] sm:$0xf] %vm338_vm1, %v733_v27  ;;  %v795_v30 = vadd.f32 %v794_v29, %v793_v25  ;;  %v591_v31 = vadd.f32 %v590_v26, %v542_v28 }
  0xff   :  { %v796_v32 = vpop.f32.mrf.mxu1 }
 0x100   :  { %v547_v33 = vadd.f32 %v795_v30, %v25_v63  ;;  %v734_v34 = vpack.c.bf16 %v591_v31, %v591_v31 }
 0x101   :  { %v797_v35 = vpop.f32.mrf.mxu1 }
 0x102   :  { %v596_v36 = vadd.f32 %v827_v14, %v547_v33  ;;  %726 = vst.msk [vmem:[%s1094_s3 + $0x14] sm:$0xf] %vm338_vm1, %v734_v34  ;;  %v798_v37 = vadd.f32 %v797_v35, %v796_v32 }
 0x104   :  { %v735_v38 = vpack.c.bf16 %v596_v36, %v596_v36  ;;  %v550_v39 = vadd.f32 %v798_v37, %v26_v6 }
 0x106   :  { %727 = vst.msk [vmem:[%s1094_s3 + $0x18] sm:$0xf] %vm338_vm1, %v735_v38  ;;  %v599_v40 = vadd.f32 %v828_v22, %v550_v39 }
 0x108   :  { %v736_v41 = vpack.c.bf16 %v599_v40, %v599_v40 }
 0x10a   :  { %728 = vst.msk [vmem:[%s1094_s3 + $0x1c] sm:$0xf] %vm338_vm1, %v736_v41 }

// kernel: squeeze.2
= control target key start
LH: loop header
LB: loop body
LE: loop exit
PB: predicated region body
PF: predicated region fallthrough
CT: control target
= control target key end

     0   :  { %s385_s10 = smov 112   ;;  %s386_s15 = smov 96   ;;  %vm3_vm0 = vcmask 130048   ;;  %s714_s0 = inlined_call_operand.vmem [shape: f32[2,8,256], index: 0, kind: input, shape index: {}]   ;;  %s715_s1 = inlined_call_operand.vmem [shape: f32[2,8,16,16], index: 1, kind: output, shape index: {}]  }
   0x1   :  { %v306_v0 = vld.sshfl [vmem:[%s714_s0 + $0x10] sm:$0xff pattern:$0xb3a29180]   ;;  %v41_v1 = vld.sshfl [vmem:[%s714_s0] sm:$0xff pattern:$0xb3a29180]  }
   0x2   :  { %60 = vrot.lane.b32.xlu1 %v306_v0, %s385_s10  ;;  %42 = vrot.lane.b32.xlu0 %v41_v1, %s385_s10  ;;  %v309_v2 = vld.sshfl [vmem:[%s714_s0 + $0x14] sm:$0xff pattern:$0xb3a29180]   ;;  %v303_v3 = vld.sshfl [vmem:[%s714_s0 + $0x4] sm:$0xff pattern:$0xb3a29180]  }
   0x3   :  { %s387_s16 = smov 80   ;;  %s388_s17 = smov 64   ;;  %v2_v4 = vld [vmem:[%s714_s0] sm:$0xff]   ;;  %v286_v5 = vld [vmem:[%s714_s0 + $0x8] sm:$0xff]   ;;  %v291_v6 = vld [vmem:[%s714_s0 + $0x10] sm:$0xff]  }
   0x4   :  { %s389_s18 = smov 48   ;;  %4 = vst.msk [vmem:[%s715_s1] ss:$16 sm:$0x3] %vm3_vm0, %v2_v4   ;;  %v296_v7 = vld [vmem:[%s714_s0 + $0x18] sm:$0xff]   ;;  %s390_s0 = smov 32  }
   0x5   :  { %5 = vst.msk [vmem:[%s715_s1] ss:$16 sm:$0xc] %vm3_vm0, %v2_v4   ;;  %6 = vst.msk [vmem:[%s715_s1] ss:$16 sm:$0x30] %vm3_vm0, %v2_v4  }
   0x6   :  { %69 = vrot.lane.b32.xlu1 %v309_v2, %s385_s10  ;;  %51 = vrot.lane.b32.xlu0 %v303_v3, %s385_s10  ;;  %7 = vst.msk [vmem:[%s715_s1] ss:$16 sm:$0xc0] %vm3_vm0, %v2_v4   ;;  %287 = vst.msk [vmem:[%s715_s1 + $0x8] ss:$16 sm:$0x3] %vm3_vm0, %v286_v5  }
   0x7   :  { %288 = vst.msk [vmem:[%s715_s1 + $0x8] ss:$16 sm:$0xc] %vm3_vm0, %v286_v5   ;;  %289 = vst.msk [vmem:[%s715_s1 + $0x8] ss:$16 sm:$0x30] %vm3_vm0, %v286_v5  }
   0x8   :  { %290 = vst.msk [vmem:[%s715_s1 + $0x8] ss:$16 sm:$0xc0] %vm3_vm0, %v286_v5   ;;  %292 = vst.msk [vmem:[%s715_s1 + $0x80] ss:$16 sm:$0x3] %vm3_vm0, %v291_v6  }
   0x9   :  { %293 = vst.msk [vmem:[%s715_s1 + $0x80] ss:$16 sm:$0xc] %vm3_vm0, %v291_v6   ;;  %294 = vst.msk [vmem:[%s715_s1 + $0x80] ss:$16 sm:$0x30] %vm3_vm0, %v291_v6  }
   0xa   :  { %86 = vrot.lane.b32.xlu1 %v303_v3, %s386_s15  ;;  %77 = vrot.lane.b32.xlu0 %v41_v1, %s386_s15  ;;  %295 = vst.msk [vmem:[%s715_s1 + $0x80] ss:$16 sm:$0xc0] %vm3_vm0, %v291_v6   ;;  %297 = vst.msk [vmem:[%s715_s1 + $0x88] ss:$16 sm:$0x3] %vm3_vm0, %v296_v7  }
   0xb   :  { %298 = vst.msk [vmem:[%s715_s1 + $0x88] ss:$16 sm:$0xc] %vm3_vm0, %v296_v7   ;;  %299 = vst.msk [vmem:[%s715_s1 + $0x88] ss:$16 sm:$0x30] %vm3_vm0, %v296_v7  }
   0xc   :  { %300 = vst.msk [vmem:[%s715_s1 + $0x88] ss:$16 sm:$0xc0] %vm3_vm0, %v296_v7   ;;  %s391_s30 = smov 16  }
   0xe   :  { %104 = vrot.lane.b32.xlu1 %v309_v2, %s386_s15  ;;  %95 = vrot.lane.b32.xlu0 %v306_v0, %s386_s15 }
  0x12   :  { %121 = vrot.lane.b32.xlu1 %v303_v3, %s387_s16  ;;  %112 = vrot.lane.b32.xlu0 %v41_v1, %s387_s16 }
  0x16   :  { %139 = vrot.lane.b32.xlu1 %v309_v2, %s387_s16  ;;  %130 = vrot.lane.b32.xlu0 %v306_v0, %s387_s16 }
  0x1a   :  { %156 = vrot.lane.b32.xlu1 %v303_v3, %s388_s17  ;;  %147 = vrot.lane.b32.xlu0 %v41_v1, %s388_s17 }
  0x1e   :  { %174 = vrot.lane.b32.xlu1 %v309_v2, %s388_s17  ;;  %165 = vrot.lane.b32.xlu0 %v306_v0, %s388_s17 }
  0x22   :  { %191 = vrot.lane.b32.xlu1 %v303_v3, %s389_s18  ;;  %182 = vrot.lane.b32.xlu0 %v41_v1, %s389_s18 }
  0x26   :  { %209 = vrot.lane.b32.xlu1 %v309_v2, %s389_s18  ;;  %200 = vrot.lane.b32.xlu0 %v306_v0, %s389_s18 }
  0x2a   :  { %226 = vrot.lane.b32.xlu1 %v303_v3, %s390_s0  ;;  %217 = vrot.lane.b32.xlu0 %v41_v1, %s390_s0 }
  0x2e   :  { %244 = vrot.lane.b32.xlu1 %v309_v2, %s390_s0  ;;  %235 = vrot.lane.b32.xlu0 %v306_v0, %s390_s0 }
  0x32   :  { %261 = vrot.lane.b32.xlu1 %v303_v3, %s391_s30  ;;  %252 = vrot.lane.b32.xlu0 %v41_v1, %s391_s30 }
  0x36   :  { %279 = vrot.lane.b32.xlu1 %v309_v2, %s391_s30  ;;  %270 = vrot.lane.b32.xlu0 %v306_v0, %s391_s30 }
  0x74   :  { %v61_v8 = vpop.permute.xlu1 %60   ;;  %v43_v9 = vpop.permute.xlu0 %42  }
  0x75   :  { %307 = vst.msk [vmem:[%s715_s1 + $0x81] ss:$8 sm:$0xf] %vm3_vm0, %v61_v8   ;;  %308 = vst.msk [vmem:[%s715_s1 + $0x81] ss:$8 sm:$0xf0] %vm3_vm0, %v61_v8  }
  0x76   :  { %301 = vst.msk [vmem:[%s715_s1 + $0x1] ss:$8 sm:$0xf] %vm3_vm0, %v43_v9   ;;  %302 = vst.msk [vmem:[%s715_s1 + $0x1] ss:$8 sm:$0xf0] %vm3_vm0, %v43_v9  }
  0x78   :  { %v70_v10 = vpop.permute.xlu1 %69   ;;  %v52_v11 = vpop.permute.xlu0 %51  }
  0x79   :  { %310 = vst.msk [vmem:[%s715_s1 + $0xc1] ss:$8 sm:$0xf] %vm3_vm0, %v70_v10   ;;  %311 = vst.msk [vmem:[%s715_s1 + $0xc1] ss:$8 sm:$0xf0] %vm3_vm0, %v70_v10  }
  0x7a   :  { %304 = vst.msk [vmem:[%s715_s1 + $0x41] ss:$8 sm:$0xf] %vm3_vm0, %v52_v11   ;;  %305 = vst.msk [vmem:[%s715_s1 + $0x41] ss:$8 sm:$0xf0] %vm3_vm0, %v52_v11  }
  0x7c   :  { %v87_v12 = vpop.permute.xlu1 %86   ;;  %v78_v13 = vpop.permute.xlu0 %77  }
  0x7d   :  { %315 = vst.msk [vmem:[%s715_s1 + $0x42] ss:$8 sm:$0xf] %vm3_vm0, %v87_v12   ;;  %316 = vst.msk [vmem:[%s715_s1 + $0x42] ss:$8 sm:$0xf0] %vm3_vm0, %v87_v12  }
  0x7e   :  { %312 = vst.msk [vmem:[%s715_s1 + $0x2] ss:$8 sm:$0xf] %vm3_vm0, %v78_v13   ;;  %313 = vst.msk [vmem:[%s715_s1 + $0x2] ss:$8 sm:$0xf0] %vm3_vm0, %v78_v13  }
  0x80   :  { %v105_v14 = vpop.permute.xlu1 %104   ;;  %v96_v15 = vpop.permute.xlu0 %95  }
  0x81   :  { %321 = vst.msk [vmem:[%s715_s1 + $0xc2] ss:$8 sm:$0xf] %vm3_vm0, %v105_v14   ;;  %322 = vst.msk [vmem:[%s715_s1 + $0xc2] ss:$8 sm:$0xf0] %vm3_vm0, %v105_v14  }
  0x82   :  { %318 = vst.msk [vmem:[%s715_s1 + $0x82] ss:$8 sm:$0xf] %vm3_vm0, %v96_v15   ;;  %319 = vst.msk [vmem:[%s715_s1 + $0x82] ss:$8 sm:$0xf0] %vm3_vm0, %v96_v15  }
  0x84   :  { %v122_v16 = vpop.permute.xlu1 %121   ;;  %v113_v17 = vpop.permute.xlu0 %112  }
  0x85   :  { %326 = vst.msk [vmem:[%s715_s1 + $0x43] ss:$8 sm:$0xf] %vm3_vm0, %v122_v16   ;;  %327 = vst.msk [vmem:[%s715_s1 + $0x43] ss:$8 sm:$0xf0] %vm3_vm0, %v122_v16  }
  0x86   :  { %323 = vst.msk [vmem:[%s715_s1 + $0x3] ss:$8 sm:$0xf] %vm3_vm0, %v113_v17   ;;  %324 = vst.msk [vmem:[%s715_s1 + $0x3] ss:$8 sm:$0xf0] %vm3_vm0, %v113_v17  }
  0x88   :  { %v140_v18 = vpop.permute.xlu1 %139   ;;  %v131_v19 = vpop.permute.xlu0 %130  }
  0x89   :  { %332 = vst.msk [vmem:[%s715_s1 + $0xc3] ss:$8 sm:$0xf] %vm3_vm0, %v140_v18   ;;  %333 = vst.msk [vmem:[%s715_s1 + $0xc3] ss:$8 sm:$0xf0] %vm3_vm0, %v140_v18  }
  0x8a   :  { %329 = vst.msk [vmem:[%s715_s1 + $0x83] ss:$8 sm:$0xf] %vm3_vm0, %v131_v19   ;;  %330 = vst.msk [vmem:[%s715_s1 + $0x83] ss:$8 sm:$0xf0] %vm3_vm0, %v131_v19  }
  0x8c   :  { %v157_v20 = vpop.permute.xlu1 %156   ;;  %v148_v21 = vpop.permute.xlu0 %147  }
  0x8d   :  { %337 = vst.msk [vmem:[%s715_s1 + $0x44] ss:$8 sm:$0xf] %vm3_vm0, %v157_v20   ;;  %338 = vst.msk [vmem:[%s715_s1 + $0x44] ss:$8 sm:$0xf0] %vm3_vm0, %v157_v20  }
  0x8e   :  { %334 = vst.msk [vmem:[%s715_s1 + $0x4] ss:$8 sm:$0xf] %vm3_vm0, %v148_v21   ;;  %335 = vst.msk [vmem:[%s715_s1 + $0x4] ss:$8 sm:$0xf0] %vm3_vm0, %v148_v21  }
  0x90   :  { %v175_v22 = vpop.permute.xlu1 %174   ;;  %v166_v23 = vpop.permute.xlu0 %165  }
  0x91   :  { %343 = vst.msk [vmem:[%s715_s1 + $0xc4] ss:$8 sm:$0xf] %vm3_vm0, %v175_v22   ;;  %344 = vst.msk [vmem:[%s715_s1 + $0xc4] ss:$8 sm:$0xf0] %vm3_vm0, %v175_v22  }
  0x92   :  { %340 = vst.msk [vmem:[%s715_s1 + $0x84] ss:$8 sm:$0xf] %vm3_vm0, %v166_v23   ;;  %341 = vst.msk [vmem:[%s715_s1 + $0x84] ss:$8 sm:$0xf0] %vm3_vm0, %v166_v23  }
  0x94   :  { %v192_v24 = vpop.permute.xlu1 %191   ;;  %v183_v25 = vpop.permute.xlu0 %182  }
  0x95   :  { %348 = vst.msk [vmem:[%s715_s1 + $0x45] ss:$8 sm:$0xf] %vm3_vm0, %v192_v24   ;;  %349 = vst.msk [vmem:[%s715_s1 + $0x45] ss:$8 sm:$0xf0] %vm3_vm0, %v192_v24  }
  0x96   :  { %345 = vst.msk [vmem:[%s715_s1 + $0x5] ss:$8 sm:$0xf] %vm3_vm0, %v183_v25   ;;  %346 = vst.msk [vmem:[%s715_s1 + $0x5] ss:$8 sm:$0xf0] %vm3_vm0, %v183_v25  }
  0x98   :  { %v210_v26 = vpop.permute.xlu1 %209   ;;  %v201_v27 = vpop.permute.xlu0 %200  }
  0x99   :  { %354 = vst.msk [vmem:[%s715_s1 + $0xc5] ss:$8 sm:$0xf] %vm3_vm0, %v210_v26   ;;  %355 = vst.msk [vmem:[%s715_s1 + $0xc5] ss:$8 sm:$0xf0] %vm3_vm0, %v210_v26  }
  0x9a   :  { %351 = vst.msk [vmem:[%s715_s1 + $0x85] ss:$8 sm:$0xf] %vm3_vm0, %v201_v27   ;;  %352 = vst.msk [vmem:[%s715_s1 + $0x85] ss:$8 sm:$0xf0] %vm3_vm0, %v201_v27  }
  0x9c   :  { %v227_v28 = vpop.permute.xlu1 %226   ;;  %v218_v29 = vpop.permute.xlu0 %217  }
  0x9d   :  { %359 = vst.msk [vmem:[%s715_s1 + $0x46] ss:$8 sm:$0xf] %vm3_vm0, %v227_v28   ;;  %360 = vst.msk [vmem:[%s715_s1 + $0x46] ss:$8 sm:$0xf0] %vm3_vm0, %v227_v28  }
  0x9e   :  { %356 = vst.msk [vmem:[%s715_s1 + $0x6] ss:$8 sm:$0xf] %vm3_vm0, %v218_v29   ;;  %357 = vst.msk [vmem:[%s715_s1 + $0x6] ss:$8 sm:$0xf0] %vm3_vm0, %v218_v29  }
  0xa0   :  { %v245_v30 = vpop.permute.xlu1 %244   ;;  %v236_v31 = vpop.permute.xlu0 %235  }
  0xa1   :  { %365 = vst.msk [vmem:[%s715_s1 + $0xc6] ss:$8 sm:$0xf] %vm3_vm0, %v245_v30   ;;  %366 = vst.msk [vmem:[%s715_s1 + $0xc6] ss:$8 sm:$0xf0] %vm3_vm0, %v245_v30  }
  0xa2   :  { %362 = vst.msk [vmem:[%s715_s1 + $0x86] ss:$8 sm:$0xf] %vm3_vm0, %v236_v31   ;;  %363 = vst.msk [vmem:[%s715_s1 + $0x86] ss:$8 sm:$0xf0] %vm3_vm0, %v236_v31  }
  0xa4   :  { %v262_v32 = vpop.permute.xlu1 %261   ;;  %v253_v33 = vpop.permute.xlu0 %252  }
  0xa5   :  { %370 = vst.msk [vmem:[%s715_s1 + $0x47] ss:$8 sm:$0xf] %vm3_vm0, %v262_v32   ;;  %371 = vst.msk [vmem:[%s715_s1 + $0x47] ss:$8 sm:$0xf0] %vm3_vm0, %v262_v32  }
  0xa6   :  { %367 = vst.msk [vmem:[%s715_s1 + $0x7] ss:$8 sm:$0xf] %vm3_vm0, %v253_v33   ;;  %368 = vst.msk [vmem:[%s715_s1 + $0x7] ss:$8 sm:$0xf0] %vm3_vm0, %v253_v33  }
  0xa8   :  { %v280_v34 = vpop.permute.xlu1 %279   ;;  %v271_v35 = vpop.permute.xlu0 %270  }
  0xa9   :  { %376 = vst.msk [vmem:[%s715_s1 + $0xc7] ss:$8 sm:$0xf] %vm3_vm0, %v280_v34   ;;  %377 = vst.msk [vmem:[%s715_s1 + $0xc7] ss:$8 sm:$0xf0] %vm3_vm0, %v280_v34  }
  0xaa   :  { %373 = vst.msk [vmem:[%s715_s1 + $0x87] ss:$8 sm:$0xf] %vm3_vm0, %v271_v35   ;;  %374 = vst.msk [vmem:[%s715_s1 + $0x87] ss:$8 sm:$0xf0] %vm3_vm0, %v271_v35  }

// kernel: refine_parsing_net_forward.13
= control target key start
LH: loop header
LB: loop body
LE: loop exit
PB: predicated region body
PF: predicated region fallthrough
CT: control target
= control target key end

     0   :  { %v1825_v1 = vmov 0   ;;  %vm245_vm0 = vcmask 261120   ;;  %s2340_s0 = inlined_call_operand.vmem [shape: bf16[4,288,256], index: 0, kind: input, shape index: {}]   ;;  %s2341_s1 = inlined_call_operand.vmem [shape: bf16[8,288], index: 1, kind: input, shape index: {}]   ;;  %s2342_s2 = inlined_call_operand.vmem [shape: f32[8,256], index: 2, kind: input, shape index: {}]   ;;  %s2343_s3 = inlined_call_operand.vmem [shape: f32[4,8,256], index: 3, kind: output, shape index: {}]  }
   0x1   :  { %v1598_v0 = vld [vmem:[%s2340_s0 + $0x74] ss:$8 sps:$4 sm:$0xff]   ;;  %322 = vmatprep.mubr.bf16.mxu1 %v1825_v1  ;;  %v1602_v3 = vld [vmem:[%s2340_s0 + $0x70] ss:$8 sps:$4 sm:$0xff]   ;;  %v1604_v5 = vld [vmem:[%s2340_s0 + $0x64] ss:$8 sps:$4 sm:$0xff]  }
   0x2   :  { %v1600_v2 = vld [vmem:[%s2340_s0 + $0x114] ss:$8 sps:$4 sm:$0xff]   ;;  %249 = vmatprep.subr.bf16.mxu0 %v1598_v0  ;;  %v1603_v4 = vld [vmem:[%s2340_s0 + $0x110] ss:$8 sps:$4 sm:$0xff]   ;;  %v1606_v6 = vld [vmem:[%s2340_s0 + $0x104] ss:$8 sps:$4 sm:$0xff]  }
   0x3   :  { %302 = vmatprep.subr.bf16.mxu1 %v1600_v2  ;;  %250 = vmatpush1.bf16.msra.mxu0 %v1602_v3  ;;  %v1608_v7 = vld [vmem:[%s2340_s0 + $0x60] ss:$8 sps:$4 sm:$0xff]   ;;  %v1610_v9 = vld [vmem:[%s2340_s0 + $0x54] ss:$8 sps:$4 sm:$0xff]   ;;  %v1613_v11 = vld [vmem:[%s2340_s0 + $0x190] ss:$8 sps:$4 sm:$0xff]  }
   0x4   :  { %303 = vmatpush1.bf16.msra.mxu1 %v1603_v4  ;;  %251 = vmatprep.subr.bf16.mxu0 %v1604_v5  ;;  %v1609_v8 = vld [vmem:[%s2340_s0 + $0x100] ss:$8 sps:$4 sm:$0xff]   ;;  %v1615_v12 = vld [vmem:[%s2340_s0 + $0x194] ss:$8 sps:$4 sm:$0xff]   ;;  %v1616_v13 = vld [vmem:[%s2340_s0 + $0x50] ss:$8 sps:$4 sm:$0xff]  }
   0x5   :  { %304 = vmatprep.subr.bf16.mxu1 %v1606_v6  ;;  %v1877_v10 = vld [vmem:[%s2341_s1 + $0x8] ss:$0 sps:$4 sm:$0xff]   ;;  %v1617_v14 = vld [vmem:[%s2340_s0 + $0x44] ss:$8 sps:$4 sm:$0xff]   ;;  %v1623_v18 = vld [vmem:[%s2340_s0 + $0x34] ss:$8 sps:$4 sm:$0xff]  }
   0x6   :  { %v1621_v15 = vld [vmem:[%s2340_s0 + $0x184] ss:$8 sps:$4 sm:$0xff]   ;;  %v1619_v16 = vld [vmem:[%s2340_s0 + $0x180] ss:$8 sps:$4 sm:$0xff]   ;;  %v1627_v19 = vld [vmem:[%s2340_s0 + $0x174] ss:$8 sps:$4 sm:$0xff]  }
   0x7   :  { %252 = vmatpush1.bf16.msra.mxu0 %v1608_v7  ;;  %v1622_v17 = vld [vmem:[%s2340_s0 + $0x40] ss:$8 sps:$4 sm:$0xff]   ;;  %v1625_v20 = vld [vmem:[%s2340_s0 + $0x170] ss:$8 sps:$4 sm:$0xff]   ;;  %v1629_v22 = vld [vmem:[%s2340_s0 + $0x24] ss:$8 sps:$4 sm:$0xff]  }
   0x8   :  { %305 = vmatpush1.bf16.msra.mxu1 %v1609_v8  ;;  %253 = vmatprep.subr.bf16.mxu0 %v1610_v9  ;;  %v1628_v21 = vld [vmem:[%s2340_s0 + $0x30] ss:$8 sps:$4 sm:$0xff]   ;;  %v1633_v23 = vld [vmem:[%s2340_s0 + $0x164] ss:$8 sps:$4 sm:$0xff]   ;;  %v1631_v24 = vld [vmem:[%s2340_s0 + $0x160] ss:$8 sps:$4 sm:$0xff]  }
   0x9   :  { %573 = vmatprep.subr.bf16.mxu1 %v1615_v12  ;;  %v1634_v25 = vld [vmem:[%s2340_s0 + $0x20] ss:$8 sps:$4 sm:$0xff]   ;;  %v1635_v26 = vld [vmem:[%s2340_s0 + $0x14] ss:$8 sps:$4 sm:$0xff]   ;;  %v1637_v28 = vld [vmem:[%s2340_s0 + $0x150] ss:$8 sps:$4 sm:$0xff]  }
   0xa   :  { %v1639_v27 = vld [vmem:[%s2340_s0 + $0x154] ss:$8 sps:$4 sm:$0xff]   ;;  %v1640_v29 = vld [vmem:[%s2340_s0 + $0x10] ss:$8 sps:$4 sm:$0xff]   ;;  %v1641_v30 = vld [vmem:[%s2340_s0 + $0x4] ss:$8 sps:$4 sm:$0xff]  }
   0xb   :  { %1371 = vmatmul.mubr.msk.bf16.vlgmr.msra.gmra.mxu1 %vm245_vm0, %v1877_v10  ;;  %254 = vmatpush1.bf16.msra.mxu0 %v1616_v13  ;;  %v1645_v31 = vld [vmem:[%s2340_s0 + $0x144] ss:$8 sps:$4 sm:$0xff]   ;;  %v1643_v32 = vld [vmem:[%s2340_s0 + $0x140] ss:$8 sps:$4 sm:$0xff]   ;;  %v1647_v34 = vld [vmem:[%s2340_s0 + $0xf4] ss:$8 sps:$4 sm:$0xff]  }
   0xc   :  { %574 = vmatpush1.bf16.msra.mxu1 %v1613_v11  ;;  %255 = vmatprep.subr.bf16.mxu0 %v1617_v14  ;;  %v1646_v33 = vld [vmem:[%s2340_s0] ss:$8 sps:$4 sm:$0xff]   ;;  %v1651_v35 = vld [vmem:[%s2340_s0 + $0x134] ss:$8 sps:$4 sm:$0xff]   ;;  %v1649_v36 = vld [vmem:[%s2340_s0 + $0x130] ss:$8 sps:$4 sm:$0xff]  }
   0xd   :  { %575 = vmatprep.subr.bf16.mxu1 %v1621_v15  ;;  %v1652_v37 = vld [vmem:[%s2340_s0 + $0xf0] ss:$8 sps:$4 sm:$0xff]   ;;  %v1653_v38 = vld [vmem:[%s2340_s0 + $0xe4] ss:$8 sps:$4 sm:$0xff]   ;;  %v1655_v40 = vld [vmem:[%s2340_s0 + $0x120] ss:$8 sps:$4 sm:$0xff]  }
   0xe   :  { %v1657_v39 = vld [vmem:[%s2340_s0 + $0x124] ss:$8 sps:$4 sm:$0xff]   ;;  %v1658_v41 = vld [vmem:[%s2340_s0 + $0xe0] ss:$8 sps:$4 sm:$0xff]   ;;  %v1659_v42 = vld [vmem:[%s2340_s0 + $0xd4] ss:$8 sps:$4 sm:$0xff]  }
   0xf   :  { %256 = vmatpush1.bf16.msra.mxu0 %v1622_v17  ;;  %v1663_v43 = vld [vmem:[%s2340_s0 + $0x214] ss:$8 sps:$4 sm:$0xff]   ;;  %v1661_v44 = vld [vmem:[%s2340_s0 + $0x210] ss:$8 sps:$4 sm:$0xff]   ;;  %v1665_v46 = vld [vmem:[%s2340_s0 + $0xc4] ss:$8 sps:$4 sm:$0xff]  }
  0x10   :  { %576 = vmatpush1.bf16.msra.mxu1 %v1619_v16  ;;  %257 = vmatprep.subr.bf16.mxu0 %v1623_v18  ;;  %v1664_v45 = vld [vmem:[%s2340_s0 + $0xd0] ss:$8 sps:$4 sm:$0xff]   ;;  %v1669_v47 = vld [vmem:[%s2340_s0 + $0x204] ss:$8 sps:$4 sm:$0xff]   ;;  %v1667_v48 = vld [vmem:[%s2340_s0 + $0x200] ss:$8 sps:$4 sm:$0xff]  }
  0x11   :  { %577 = vmatprep.subr.bf16.mxu1 %v1627_v19  ;;  %v15_v49 = vld [vmem:[%s2341_s1] sm:$0xff]  ;;  %v1671_v51 = vld [vmem:[%s2340_s0 + $0xb4] ss:$8 sps:$4 sm:$0xff]   ;;  %v1673_v54 = vld [vmem:[%s2340_s0 + $0x1f0] ss:$8 sps:$4 sm:$0xff]  }
  0x12   :  { %v1670_v50 = vld [vmem:[%s2340_s0 + $0xc0] ss:$8 sps:$4 sm:$0xff]   ;;  %v2004_v52 = vcombine.high %v15_v49, %v15_v49  ;;  %v1675_v53 = vld [vmem:[%s2340_s0 + $0x1f4] ss:$8 sps:$4 sm:$0xff]   ;;  %v1676_v55 = vld [vmem:[%s2340_s0 + $0xb0] ss:$8 sps:$4 sm:$0xff]   ;;  %v2059_v7 = vcombine.low %v15_v49, %v15_v49 }
  0x13   :  { %258 = vmatpush1.bf16.msra.mxu0 %v1628_v21  ;;  %v1677_v56 = vld [vmem:[%s2340_s0 + $0xa4] ss:$8 sps:$4 sm:$0xff]   ;;  %v1679_v58 = vld [vmem:[%s2340_s0 + $0x1e0] ss:$8 sps:$4 sm:$0xff]   ;;  %v1683_v60 = vld [vmem:[%s2340_s0 + $0x94] ss:$8 sps:$4 sm:$0xff]  }
  0x14   :  { %578 = vmatpush1.bf16.msra.mxu1 %v1625_v20  ;;  %259 = vmatprep.subr.bf16.mxu0 %v1629_v22  ;;  %v1681_v57 = vld [vmem:[%s2340_s0 + $0x1e4] ss:$8 sps:$4 sm:$0xff]   ;;  %v1682_v59 = vld [vmem:[%s2340_s0 + $0xa0] ss:$8 sps:$4 sm:$0xff]   ;;  %v1687_v61 = vld [vmem:[%s2340_s0 + $0x1d4] ss:$8 sps:$4 sm:$0xff]  }
  0x15   :  { %579 = vmatprep.subr.bf16.mxu1 %v1633_v23  ;;  %281 = vmatprep.mubr.bf16.mxu0 %v2004_v52  ;;  %v1685_v62 = vld [vmem:[%s2340_s0 + $0x1d0] ss:$8 sps:$4 sm:$0xff]   ;;  %v1689_v0 = vld [vmem:[%s2340_s0 + $0x84] ss:$8 sps:$4 sm:$0xff]   ;;  %v1691_v3 = vld [vmem:[%s2340_s0 + $0x1c0] ss:$8 sps:$4 sm:$0xff]  }
  0x16   :  { %605 = vmatprep.mubr.bf16.mxu1 %v2004_v52  ;;  %v1688_v63 = vld [vmem:[%s2340_s0 + $0x90] ss:$8 sps:$4 sm:$0xff]   ;;  %v1693_v2 = vld [vmem:[%s2340_s0 + $0x1c4] ss:$8 sps:$4 sm:$0xff]   ;;  %v1694_v4 = vld [vmem:[%s2340_s0 + $0x80] ss:$8 sps:$4 sm:$0xff]  }
  0x17   :  { %260 = vmatpush1.bf16.msra.mxu0 %v1634_v25  ;;  %v1699_v5 = vld [vmem:[%s2340_s0 + $0x1b4] ss:$8 sps:$4 sm:$0xff]   ;;  %v1697_v8 = vld [vmem:[%s2340_s0 + $0x1b0] ss:$8 sps:$4 sm:$0xff]   ;;  %v1705_v11 = vld [vmem:[%s2340_s0 + $0x1a4] ss:$8 sps:$4 sm:$0xff]  }
  0x18   :  { %580 = vmatpush1.bf16.msra.mxu1 %v1631_v24  ;;  %261 = vmatprep.subr.bf16.mxu0 %v1635_v26  ;;  %v1702_v6 = vld [vmem:[%s2340_s0 + $0x234] ss:$8 sps:$4 sm:$0xff]   ;;  %v1700_v9 = vld [vmem:[%s2340_s0 + $0x230] ss:$8 sps:$4 sm:$0xff]   ;;  %v1708_v12 = vld [vmem:[%s2340_s0 + $0x224] ss:$8 sps:$4 sm:$0xff]  }
  0x19   :  { %581 = vmatprep.subr.bf16.mxu1 %v1639_v27  ;;  %v1703_v13 = vld [vmem:[%s2340_s0 + $0x1a0] ss:$8 sps:$4 sm:$0xff]   ;;  %v1711_v15 = vld [vmem:[%s2340_s0 + $0x2b4] ss:$8 sps:$4 sm:$0xff]   ;;  %v1709_v17 = vld [vmem:[%s2340_s0 + $0x2b0] ss:$8 sps:$4 sm:$0xff]  }
  0x1a   :  { %v1706_v14 = vld [vmem:[%s2340_s0 + $0x220] ss:$8 sps:$4 sm:$0xff]   ;;  %v1714_v16 = vld [vmem:[%s2340_s0 + $0x354] ss:$8 sps:$4 sm:$0xff]   ;;  %v1712_v18 = vld [vmem:[%s2340_s0 + $0x350] ss:$8 sps:$4 sm:$0xff]  }
  0x1b   :  { %262 = vmatpush1.bf16.msra.mxu0 %v1640_v29  ;;  %v1717_v19 = vld [vmem:[%s2340_s0 + $0x2a4] ss:$8 sps:$4 sm:$0xff]   ;;  %v1715_v21 = vld [vmem:[%s2340_s0 + $0x2a0] ss:$8 sps:$4 sm:$0xff]   ;;  %v1723_v23 = vld [vmem:[%s2340_s0 + $0x294] ss:$8 sps:$4 sm:$0xff]  }
  0x1c   :  { %582 = vmatpush1.bf16.msra.mxu1 %v1637_v28  ;;  %263 = vmatprep.subr.bf16.mxu0 %v1641_v30  ;;  %v1720_v20 = vld [vmem:[%s2340_s0 + $0x344] ss:$8 sps:$4 sm:$0xff]   ;;  %v1718_v22 = vld [vmem:[%s2340_s0 + $0x340] ss:$8 sps:$4 sm:$0xff]   ;;  %v1726_v24 = vld [vmem:[%s2340_s0 + $0x3d4] ss:$8 sps:$4 sm:$0xff]  }
  0x1d   :  { %583 = vmatprep.subr.bf16.mxu1 %v1645_v31  ;;  %v1721_v25 = vld [vmem:[%s2340_s0 + $0x290] ss:$8 sps:$4 sm:$0xff]   ;;  %v1729_v27 = vld [vmem:[%s2340_s0 + $0x284] ss:$8 sps:$4 sm:$0xff]   ;;  %v1727_v29 = vld [vmem:[%s2340_s0 + $0x280] ss:$8 sps:$4 sm:$0xff]  }
  0x1e   :  { %v1724_v26 = vld [vmem:[%s2340_s0 + $0x3d0] ss:$8 sps:$4 sm:$0xff]   ;;  %v1732_v28 = vld [vmem:[%s2340_s0 + $0x3c4] ss:$8 sps:$4 sm:$0xff]   ;;  %v1730_v30 = vld [vmem:[%s2340_s0 + $0x3c0] ss:$8 sps:$4 sm:$0xff]  }
  0x1f   :  { %264 = vmatpush1.bf16.msra.mxu0 %v1646_v33  ;;  %v1735_v31 = vld [vmem:[%s2340_s0 + $0x274] ss:$8 sps:$4 sm:$0xff]   ;;  %v1733_v33 = vld [vmem:[%s2340_s0 + $0x270] ss:$8 sps:$4 sm:$0xff]  }
  0x20   :  { %584 = vmatpush1.bf16.msra.mxu1 %v1643_v32  ;;  %265 = vmatprep.subr.bf16.mxu0 %v1647_v34  ;;  %v1738_v32 = vld [vmem:[%s2340_s0 + $0x3b4] ss:$8 sps:$4 sm:$0xff]   ;;  %v1736_v34 = vld [vmem:[%s2340_s0 + $0x3b0] ss:$8 sps:$4 sm:$0xff]  }
  0x21   :  { %585 = vmatprep.subr.bf16.mxu1 %v1651_v35  ;;  %v1741_v35 = vld [vmem:[%s2340_s0 + $0x264] ss:$8 sps:$4 sm:$0xff]   ;;  %v1757_v49 = vld [vmem:[%s2340_s0 + $0x330] ss:$8 sps:$4 sm:$0xff]  }
  0x23   :  { %266 = vmatpush2.bf16.msra.mxu0 %v1652_v37  ;;  %v1739_v37 = vld [vmem:[%s2340_s0 + $0x260] ss:$8 sps:$4 sm:$0xff]  }
  0x24   :  { %586 = vmatpush1.bf16.msra.mxu1 %v1649_v36  ;;  %267 = vmatprep.subr.bf16.mxu0 %v1653_v38  ;;  %v1744_v36 = vld [vmem:[%s2340_s0 + $0x3a4] ss:$8 sps:$4 sm:$0xff]   ;;  %v1742_v38 = vld [vmem:[%s2340_s0 + $0x3a0] ss:$8 sps:$4 sm:$0xff]  }
  0x25   :  { %587 = vmatprep.subr.bf16.mxu1 %v1657_v39  ;;  %v1747_v39 = vld [vmem:[%s2340_s0 + $0x254] ss:$8 sps:$4 sm:$0xff]  }
  0x27   :  { %268 = vmatpush2.bf16.msra.mxu0 %v1658_v41  ;;  %v1745_v41 = vld [vmem:[%s2340_s0 + $0x250] ss:$8 sps:$4 sm:$0xff]  }
  0x28   :  { %588 = vmatpush1.bf16.msra.mxu1 %v1655_v40  ;;  %269 = vmatprep.subr.bf16.mxu0 %v1659_v42  ;;  %v1750_v40 = vld [vmem:[%s2340_s0 + $0x394] ss:$8 sps:$4 sm:$0xff]   ;;  %v1748_v42 = vld [vmem:[%s2340_s0 + $0x390] ss:$8 sps:$4 sm:$0xff]  }
  0x29   :  { %589 = vmatprep.subr.bf16.mxu1 %v1663_v43  ;;  %v1753_v43 = vld [vmem:[%s2340_s0 + $0x244] ss:$8 sps:$4 sm:$0xff]  }
  0x2b   :  { %270 = vmatpush2.bf16.msra.mxu0 %v1664_v45  ;;  %v1751_v45 = vld [vmem:[%s2340_s0 + $0x240] ss:$8 sps:$4 sm:$0xff]  }
  0x2c   :  { %590 = vmatpush2.bf16.msra.mxu1 %v1661_v44  ;;  %271 = vmatprep.subr.bf16.mxu0 %v1665_v46  ;;  %v1756_v44 = vld [vmem:[%s2340_s0 + $0x384] ss:$8 sps:$4 sm:$0xff]   ;;  %v1754_v46 = vld [vmem:[%s2340_s0 + $0x380] ss:$8 sps:$4 sm:$0xff]  }
  0x2d   :  { %591 = vmatprep.subr.bf16.mxu1 %v1669_v47  ;;  %v1759_v47 = vld [vmem:[%s2340_s0 + $0x334] ss:$8 sps:$4 sm:$0xff]  }
  0x2f   :  { %272 = vmatpush2.bf16.msra.mxu0 %v1670_v50  ;;  %v1760_v50 = vld [vmem:[%s2340_s0 + $0x370] ss:$8 sps:$4 sm:$0xff]  }
  0x30   :  { %592 = vmatpush2.bf16.msra.mxu1 %v1667_v48  ;;  %273 = vmatprep.subr.bf16.mxu0 %v1671_v51  ;;  %v1762_v48 = vld [vmem:[%s2340_s0 + $0x374] ss:$8 sps:$4 sm:$0xff]   ;;  %v1765_v51 = vld [vmem:[%s2340_s0 + $0x324] ss:$8 sps:$4 sm:$0xff]  }
  0x31   :  { %593 = vmatprep.subr.bf16.mxu1 %v1675_v53  ;;  %v1763_v53 = vld [vmem:[%s2340_s0 + $0x320] ss:$8 sps:$4 sm:$0xff]  }
  0x33   :  { %274 = vmatpush2.bf16.msra.mxu0 %v1676_v55  ;;  %v1771_v55 = vld [vmem:[%s2340_s0 + $0x314] ss:$8 sps:$4 sm:$0xff]  }
  0x34   :  { %594 = vmatpush2.bf16.msra.mxu1 %v1673_v54  ;;  %275 = vmatprep.subr.bf16.mxu0 %v1677_v56  ;;  %v1766_v54 = vld [vmem:[%s2340_s0 + $0x360] ss:$8 sps:$4 sm:$0xff]   ;;  %v1774_v56 = vld [vmem:[%s2340_s0 + $0x454] ss:$8 sps:$4 sm:$0xff]  }
  0x35   :  { %595 = vmatprep.subr.bf16.mxu1 %v1681_v57  ;;  %v1769_v57 = vld [vmem:[%s2340_s0 + $0x310] ss:$8 sps:$4 sm:$0xff]  }
  0x37   :  { %276 = vmatpush2.bf16.msra.mxu0 %v1682_v59  ;;  %v1777_v59 = vld [vmem:[%s2340_s0 + $0x304] ss:$8 sps:$4 sm:$0xff]  }
  0x38   :  { %596 = vmatpush2.bf16.msra.mxu1 %v1679_v58  ;;  %277 = vmatprep.subr.bf16.mxu0 %v1683_v60  ;;  %v1772_v58 = vld [vmem:[%s2340_s0 + $0x450] ss:$8 sps:$4 sm:$0xff]   ;;  %v1780_v60 = vld [vmem:[%s2340_s0 + $0x444] ss:$8 sps:$4 sm:$0xff]  }
  0x39   :  { %597 = vmatprep.subr.bf16.mxu1 %v1687_v61  ;;  %v1775_v61 = vld [vmem:[%s2340_s0 + $0x300] ss:$8 sps:$4 sm:$0xff]  }
  0x3b   :  { %278 = vmatpush2.bf16.msra.mxu0 %v1688_v63  ;;  %v1783_v63 = vld [vmem:[%s2340_s0 + $0x2f4] ss:$8 sps:$4 sm:$0xff]  }
  0x3c   :  { %598 = vmatpush2.bf16.msra.mxu1 %v1685_v62  ;;  %279 = vmatprep.subr.bf16.mxu0 %v1689_v0  ;;  %v1778_v62 = vld [vmem:[%s2340_s0 + $0x440] ss:$8 sps:$4 sm:$0xff]   ;;  %v1786_v0 = vld [vmem:[%s2340_s0 + $0x434] ss:$8 sps:$4 sm:$0xff]  }
  0x3d   :  { %599 = vmatprep.subr.bf16.mxu1 %v1693_v2  ;;  %v1781_v2 = vld [vmem:[%s2340_s0 + $0x2f0] ss:$8 sps:$4 sm:$0xff]  }
  0x3f   :  { %280 = vmatpush2.bf16.msra.mxu0 %v1694_v4  ;;  %v1789_v4 = vld [vmem:[%s2340_s0 + $0x2e4] ss:$8 sps:$4 sm:$0xff]  }
  0x40   :  { %600 = vmatpush2.bf16.msra.mxu1 %v1691_v3  ;;  %626 = vmatprep.subr.bf16.mxu0 %v1702_v6  ;;  %v1784_v3 = vld [vmem:[%s2340_s0 + $0x430] ss:$8 sps:$4 sm:$0xff]   ;;  %v1787_v6 = vld [vmem:[%s2340_s0 + $0x2e0] ss:$8 sps:$4 sm:$0xff]  }
  0x41   :  { %601 = vmatprep.subr.bf16.mxu1 %v1699_v5  ;;  %v1792_v5 = vld [vmem:[%s2340_s0 + $0x424] ss:$8 sps:$4 sm:$0xff]  }
  0x42   :  { %282 = vmatmul.mubr.bf16.vlgmr.msra.gmra.mxu0 %v2059_v7 }
  0x43   :  { %627 = vmatpush1.bf16.msra.mxu0 %v1700_v9  ;;  %646 = vmatprep.mubr.bf16.mxu0 %v1825_v1  ;;  %v1795_v9 = vld [vmem:[%s2340_s0 + $0x2d4] ss:$8 sps:$4 sm:$0xff]  }
  0x44   :  { %602 = vmatpush2.bf16.msra.mxu1 %v1697_v8  ;;  %628 = vmatprep.subr.bf16.mxu0 %v1708_v12  ;;  %v1790_v8 = vld [vmem:[%s2340_s0 + $0x420] ss:$8 sps:$4 sm:$0xff]   ;;  %v1793_v12 = vld [vmem:[%s2340_s0 + $0x2d0] ss:$8 sps:$4 sm:$0xff]  }
  0x45   :  { %603 = vmatprep.subr.bf16.mxu1 %v1705_v11  ;;  %v1798_v11 = vld [vmem:[%s2340_s0 + $0x414] ss:$8 sps:$4 sm:$0xff]  }
  0x47   :  { %629 = vmatpush1.bf16.msra.mxu0 %v1706_v14  ;;  %v1801_v14 = vld [vmem:[%s2340_s0 + $0x2c4] ss:$8 sps:$4 sm:$0xff]  }
  0x48   :  { %604 = vmatpush2.bf16.msra.mxu1 %v1703_v13  ;;  %897 = vmatprep.subr.bf16.mxu0 %v1711_v15  ;;  %v1796_v13 = vld [vmem:[%s2340_s0 + $0x410] ss:$8 sps:$4 sm:$0xff]   ;;  %v1804_v15 = vld [vmem:[%s2340_s0 + $0x404] ss:$8 sps:$4 sm:$0xff]  }
  0x49   :  { %950 = vmatprep.subr.bf16.mxu1 %v1714_v16  ;;  %v1799_v16 = vld [vmem:[%s2340_s0 + $0x2c0] ss:$8 sps:$4 sm:$0xff]  }
  0x4a   :  { %1444 = vmatmul.mubr.msk.bf16.vlgmr.msra.gmra.mxu0 %vm245_vm0, %v1877_v10 }
  0x4b   :  { %606 = vmatmul.mubr.bf16.vlgmr.msra.gmra.mxu1 %v2059_v7  ;;  %898 = vmatpush1.bf16.msra.mxu0 %v1709_v17  ;;  %v1802_v17 = vld [vmem:[%s2340_s0 + $0x400] ss:$8 sps:$4 sm:$0xff]  }
  0x4c   :  { %951 = vmatpush1.bf16.msra.mxu1 %v1712_v18  ;;  %899 = vmatprep.subr.bf16.mxu0 %v1717_v19  ;;  %v1807_v18 = vld [vmem:[%s2340_s0 + $0x3f4] ss:$8 sps:$4 sm:$0xff]  }
  0x4d   :  { %952 = vmatprep.subr.bf16.mxu1 %v1720_v20  ;;  %970 = vmatprep.mubr.bf16.mxu1 %v1825_v1  ;;  %v1810_v19 = vld [vmem:[%s2340_s0 + $0x474] ss:$8 sps:$4 sm:$0xff]   ;;  %v1805_v20 = vld [vmem:[%s2340_s0 + $0x3f0] ss:$8 sps:$4 sm:$0xff]  }
  0x4e   :  { %929 = vmatprep.mubr.bf16.mxu0 %v2004_v52 }
  0x4f   :  { %900 = vmatpush1.bf16.msra.mxu0 %v1715_v21  ;;  %v1808_v21 = vld [vmem:[%s2340_s0 + $0x470] ss:$8 sps:$4 sm:$0xff]  }
  0x50   :  { %953 = vmatpush1.bf16.msra.mxu1 %v1718_v22  ;;  %901 = vmatprep.subr.bf16.mxu0 %v1723_v23  ;;  %v1813_v22 = vld [vmem:[%s2340_s0 + $0x3e4] ss:$8 sps:$4 sm:$0xff]  }
  0x51   :  { %1221 = vmatprep.subr.bf16.mxu1 %v1726_v24  ;;  %v1816_v23 = vld [vmem:[%s2340_s0 + $0x464] ss:$8 sps:$4 sm:$0xff]   ;;  %v1811_v24 = vld [vmem:[%s2340_s0 + $0x3e0] ss:$8 sps:$4 sm:$0xff]  }
  0x53   :  { %1519 = vmatmul.mubr.msk.bf16.vlgmr.msra.gmra.mxu1 %vm245_vm0, %v1877_v10  ;;  %902 = vmatpush1.bf16.msra.mxu0 %v1721_v25  ;;  %v1814_v25 = vld [vmem:[%s2340_s0 + $0x460] ss:$8 sps:$4 sm:$0xff]  }
  0x54   :  { %1222 = vmatpush1.bf16.msra.mxu1 %v1724_v26  ;;  %903 = vmatprep.subr.bf16.mxu0 %v1729_v27 }
  0x55   :  { %1223 = vmatprep.subr.bf16.mxu1 %v1732_v28  ;;  %1253 = vmatprep.mubr.bf16.mxu1 %v2004_v52  ;;  %v1768_v52 = vld [vmem:[%s2340_s0 + $0x364] ss:$8 sps:$4 sm:$0xff]  }
  0x57   :  { %904 = vmatpush1.bf16.msra.mxu0 %v1727_v29 }
  0x58   :  { %1224 = vmatpush1.bf16.msra.mxu1 %v1730_v30  ;;  %905 = vmatprep.subr.bf16.mxu0 %v1735_v31  ;;  %v17_v30 = vld [vmem:[%s2342_s2] sm:$0xff] }
  0x59   :  { %1225 = vmatprep.subr.bf16.mxu1 %v1738_v32 }
  0x5b   :  { %906 = vmatpush1.bf16.msra.mxu0 %v1733_v33 }
  0x5c   :  { %1226 = vmatpush1.bf16.msra.mxu1 %v1736_v34  ;;  %907 = vmatprep.subr.bf16.mxu0 %v1741_v35 }
  0x5d   :  { %1227 = vmatprep.subr.bf16.mxu1 %v1744_v36 }
  0x5f   :  { %908 = vmatpush1.bf16.msra.mxu0 %v1739_v37 }
  0x60   :  { %1228 = vmatpush1.bf16.msra.mxu1 %v1742_v38  ;;  %909 = vmatprep.subr.bf16.mxu0 %v1747_v39 }
  0x61   :  { %1229 = vmatprep.subr.bf16.mxu1 %v1750_v40 }
  0x63   :  { %910 = vmatpush1.bf16.msra.mxu0 %v1745_v41 }
  0x64   :  { %1230 = vmatpush1.bf16.msra.mxu1 %v1748_v42  ;;  %911 = vmatprep.subr.bf16.mxu0 %v1753_v43 }
  0x65   :  { %1231 = vmatprep.subr.bf16.mxu1 %v1756_v44 }
  0x67   :  { %912 = vmatpush1.bf16.msra.mxu0 %v1751_v45 }
  0x68   :  { %1232 = vmatpush1.bf16.msra.mxu1 %v1754_v46  ;;  %913 = vmatprep.subr.bf16.mxu0 %v1759_v47 }
  0x69   :  { %1233 = vmatprep.subr.bf16.mxu1 %v1762_v48 }
  0x6b   :  { %914 = vmatpush2.bf16.msra.mxu0 %v1757_v49 }
  0x6c   :  { %1234 = vmatpush1.bf16.msra.mxu1 %v1760_v50  ;;  %915 = vmatprep.subr.bf16.mxu0 %v1765_v51 }
  0x6d   :  { %1235 = vmatprep.subr.bf16.mxu1 %v1768_v52 }
  0x6f   :  { %916 = vmatpush2.bf16.msra.mxu0 %v1763_v53 }
  0x70   :  { %1236 = vmatpush1.bf16.msra.mxu1 %v1766_v54  ;;  %917 = vmatprep.subr.bf16.mxu0 %v1771_v55 }
  0x71   :  { %1237 = vmatprep.subr.bf16.mxu1 %v1774_v56 }
  0x73   :  { %918 = vmatpush2.bf16.msra.mxu0 %v1769_v57 }
  0x74   :  { %1238 = vmatpush2.bf16.msra.mxu1 %v1772_v58  ;;  %919 = vmatprep.subr.bf16.mxu0 %v1777_v59 }
  0x75   :  { %1239 = vmatprep.subr.bf16.mxu1 %v1780_v60 }
  0x77   :  { %920 = vmatpush2.bf16.msra.mxu0 %v1775_v61 }
  0x78   :  { %1240 = vmatpush2.bf16.msra.mxu1 %v1778_v62  ;;  %921 = vmatprep.subr.bf16.mxu0 %v1783_v63 }
  0x79   :  { %1241 = vmatprep.subr.bf16.mxu1 %v1786_v0 }
  0x7b   :  { %922 = vmatpush2.bf16.msra.mxu0 %v1781_v2 }
  0x7c   :  { %1242 = vmatpush2.bf16.msra.mxu1 %v1784_v3  ;;  %923 = vmatprep.subr.bf16.mxu0 %v1789_v4 }
  0x7d   :  { %1243 = vmatprep.subr.bf16.mxu1 %v1792_v5 }
  0x7f   :  { %924 = vmatpush2.bf16.msra.mxu0 %v1787_v6 }
  0x80   :  { %1244 = vmatpush2.bf16.msra.mxu1 %v1790_v8  ;;  %925 = vmatprep.subr.bf16.mxu0 %v1795_v9 }
  0x81   :  { %1245 = vmatprep.subr.bf16.mxu1 %v1798_v11 }
  0x83   :  { %926 = vmatpush2.bf16.msra.mxu0 %v1793_v12 }
  0x84   :  { %1246 = vmatpush2.bf16.msra.mxu1 %v1796_v13  ;;  %927 = vmatprep.subr.bf16.mxu0 %v1801_v14 }
  0x85   :  { %1247 = vmatprep.subr.bf16.mxu1 %v1804_v15 }
  0x87   :  { %928 = vmatpush2.bf16.msra.mxu0 %v1799_v16 }
  0x88   :  { %1248 = vmatpush2.bf16.msra.mxu1 %v1802_v17  ;;  %1274 = vmatprep.subr.bf16.mxu0 %v1810_v19 }
  0x89   :  { %1249 = vmatprep.subr.bf16.mxu1 %v1807_v18 }
  0x8a   :  { %930 = vmatmul.mubr.bf16.vlgmr.msra.gmra.mxu0 %v2059_v7 }
  0x8b   :  { %1275 = vmatpush1.bf16.msra.mxu0 %v1808_v21  ;;  %1294 = vmatprep.mubr.bf16.mxu0 %v1825_v1  ;;  %v18_v1 = vld [vmem:[%s2342_s2 + $0x8] sm:$0xff] }
  0x8c   :  { %1250 = vmatpush2.bf16.msra.mxu1 %v1805_v20  ;;  %1276 = vmatprep.subr.bf16.mxu0 %v1816_v23 }
  0x8d   :  { %1251 = vmatprep.subr.bf16.mxu1 %v1813_v22 }
  0x8f   :  { %1277 = vmatpush1.bf16.msra.mxu0 %v1814_v25 }
  0x90   :  { %1252 = vmatpush2.bf16.msra.mxu1 %v1811_v24 }
  0x92   :  { %1594 = vmatmul.mubr.msk.bf16.vlgmr.msra.gmra.mxu0 %vm245_vm0, %v1877_v10 }
  0x93   :  { %1254 = vmatmul.mubr.bf16.vlgmr.msra.gmra.mxu1 %v2059_v7 }
  0xcb   :  { %v324_v26 = vpop.f32.mrf.mxu1 }
  0xcd   :  { %v326_v27 = vpop.f32.mrf.mxu1 }
  0xcf   :  { %v328_v28 = vpop.f32.mrf.mxu1 }
  0xd1   :  { %v329_v29 = vpop.f32.mrf.mxu1 }
 0x102   :  { %v283_v31 = vpop.f32.mrf.mxu0 }
 0x103   :  { %v284_v32 = vadd.f32 %v283_v31, %v17_v30 }
 0x104   :  { %v285_v33 = vpop.f32.mrf.mxu0 }
 0x105   :  { %v286_v34 = vadd.f32 %v285_v33, %v18_v1  ;;  %v325_v35 = vadd.f32 %v324_v26, %v284_v32 }
 0x106   :  { %v287_v7 = vpop.f32.mrf.mxu0 }
 0x107   :  { %v327_v36 = vadd.f32 %v326_v27, %v286_v34 }
 0x108   :  { %v288_v10 = vpop.f32.mrf.mxu0 }
 0x109   :  { %v331_v37 = vadd.f32 %v327_v36, %v325_v35 }
 0x10a   :  { %v648_v39 = vpop.f32.mrf.mxu0 }
 0x10b   :  { %v607_v38 = vpop.f32.mrf.mxu1  ;;  %332 = vadd.xlane.f32.xlu0 %v331_v37 }
 0x10c   :  { %v608_v40 = vadd.f32 %v607_v38, %v17_v30  ;;  %v650_v42 = vpop.f32.mrf.mxu0 }
 0x10d   :  { %v609_v41 = vpop.f32.mrf.mxu1 }
 0x10e   :  { %v649_v43 = vadd.f32 %v648_v39, %v608_v40  ;;  %v610_v44 = vadd.f32 %v609_v41, %v18_v1  ;;  %v652_v46 = vpop.f32.mrf.mxu0 }
 0x10f   :  { %v611_v45 = vpop.f32.mrf.mxu1 }
 0x110   :  { %v651_v47 = vadd.f32 %v650_v42, %v610_v44  ;;  %v653_v49 = vpop.f32.mrf.mxu0 }
 0x111   :  { %v612_v48 = vpop.f32.mrf.mxu1 }
 0x112   :  { %v655_v50 = vadd.f32 %v651_v47, %v649_v43 }
 0x113   :  { %v972_v51 = vpop.f32.mrf.mxu1 }
 0x114   :  { %656 = vadd.xlane.f32.xlu0 %v655_v50 }
 0x115   :  { %v974_v52 = vpop.f32.mrf.mxu1 }
 0x117   :  { %v976_v53 = vpop.f32.mrf.mxu1 }
 0x119   :  { %v977_v54 = vpop.f32.mrf.mxu1 }
 0x14a   :  { %v931_v55 = vpop.f32.mrf.mxu0 }
 0x14b   :  { %v932_v56 = vadd.f32 %v931_v55, %v17_v30 }
 0x14c   :  { %v933_v57 = vpop.f32.mrf.mxu0 }
 0x14d   :  { %v934_v58 = vadd.f32 %v933_v57, %v18_v1  ;;  %v973_v60 = vadd.f32 %v972_v51, %v932_v56 }
 0x14e   :  { %v935_v59 = vpop.f32.mrf.mxu0 }
 0x14f   :  { %v975_v61 = vadd.f32 %v974_v52, %v934_v58 }
 0x150   :  { %v936_v62 = vpop.f32.mrf.mxu0 }
 0x151   :  { %v979_v63 = vadd.f32 %v975_v61, %v973_v60 }
 0x152   :  { %v1296_v2 = vpop.f32.mrf.mxu0 }
 0x153   :  { %v1255_v0 = vpop.f32.mrf.mxu1  ;;  %980 = vadd.xlane.f32.xlu1 %v979_v63 }
 0x154   :  { %v1256_v3 = vadd.f32 %v1255_v0, %v17_v30  ;;  %v1298_v5 = vpop.f32.mrf.mxu0 }
 0x155   :  { %v1257_v4 = vpop.f32.mrf.mxu1 }
 0x156   :  { %v1258_v6 = vadd.f32 %v1257_v4, %v18_v1  ;;  %v1300_v9 = vpop.f32.mrf.mxu0  ;;  %v1297_v11 = vadd.f32 %v1296_v2, %v1256_v3 }
 0x157   :  { %v1259_v8 = vpop.f32.mrf.mxu1 }
 0x158   :  { %v1299_v12 = vadd.f32 %v1298_v5, %v1258_v6  ;;  %v1301_v14 = vpop.f32.mrf.mxu0 }
 0x159   :  { %v1260_v13 = vpop.f32.mrf.mxu1 }
 0x15a   :  { %v1303_v15 = vadd.f32 %v1299_v12, %v1297_v11 }
 0x15c   :  { %1304 = vadd.xlane.f32.xlu1 %v1303_v15 }
 0x194   :  { %v333_v16 = vpop.xlane.xlu0 %332 }
 0x195   :  { %v335_v17 = vmul.f32 0.00390625, %v333_v16 }
 0x197   :  { %v336_v18 = vsub.f32 %v325_v35, %v335_v17  ;;  %v337_v19 = vsub.f32 %v327_v36, %v335_v17 }
 0x199   :  { %v338_v20 = vmul.f32 %v336_v18, %v336_v18  ;;  %v339_v21 = vmul.f32 %v337_v19, %v337_v19 }
 0x19b   :  { %v340_v22 = vadd.f32 %v339_v21, %v338_v20 }
 0x19d   :  { %v657_v23 = vpop.xlane.xlu0 %656  ;;  %341 = vadd.xlane.f32.xlu0 %v340_v22 }
 0x19e   :  { %v658_v24 = vmul.f32 0.00390625, %v657_v23 }
 0x1a0   :  { %v659_v25 = vsub.f32 %v649_v43, %v658_v24  ;;  %v660_v26 = vsub.f32 %v651_v47, %v658_v24 }
 0x1a2   :  { %v661_v27 = vmul.f32 %v659_v25, %v659_v25  ;;  %v662_v28 = vmul.f32 %v660_v26, %v660_v26 }
 0x1a4   :  { %v663_v29 = vadd.f32 %v662_v28, %v661_v27 }
 0x1a6   :  { %664 = vadd.xlane.f32.xlu1 %v663_v29 }
 0x1dc   :  { %v981_v30 = vpop.xlane.xlu1 %980 }
 0x1dd   :  { %v982_v31 = vmul.f32 0.00390625, %v981_v30 }
 0x1df   :  { %v983_v1 = vsub.f32 %v973_v60, %v982_v31  ;;  %v984_v32 = vsub.f32 %v975_v61, %v982_v31 }
 0x1e1   :  { %v985_v33 = vmul.f32 %v983_v1, %v983_v1  ;;  %v986_v34 = vmul.f32 %v984_v32, %v984_v32 }
 0x1e3   :  { %v987_v7 = vadd.f32 %v986_v34, %v985_v33 }
 0x1e5   :  { %v1305_v35 = vpop.xlane.xlu1 %1304  ;;  %988 = vadd.xlane.f32.xlu0 %v987_v7 }
 0x1e6   :  { %v1306_v36 = vmul.f32 0.00390625, %v1305_v35 }
 0x1e8   :  { %v1307_v10 = vsub.f32 %v1297_v11, %v1306_v36  ;;  %v1308_v37 = vsub.f32 %v1299_v12, %v1306_v36 }
 0x1ea   :  { %v1309_v38 = vmul.f32 %v1307_v10, %v1307_v10  ;;  %v1310_v39 = vmul.f32 %v1308_v37, %v1308_v37 }
 0x1ec   :  { %v1311_v40 = vadd.f32 %v1310_v39, %v1309_v38 }
 0x1ee   :  { %1312 = vadd.xlane.f32.xlu1 %v1311_v40 }
 0x226   :  { %v342_v41 = vpop.xlane.xlu0 %341 }
 0x227   :  { %v343_v42 = vmul.f32 0.00390625, %v342_v41 }
 0x229   :  { %v344_v43 = vadd.f32 1e-05, %v343_v42 }
 0x22b   :  { %1817 = vrsqrt.f32 %v344_v43 }
 0x22f   :  { %v665_v44 = vpop.xlane.xlu1 %664 }
 0x230   :  { %v666_v45 = vmul.f32 0.00390625, %v665_v44 }
 0x232   :  { %v667_v46 = vadd.f32 1e-05, %v666_v45 }
 0x234   :  { %1819 = vrsqrt.f32 %v667_v46 }
 0x238   :  { %v1818_v47 = vpop.eup %1817 }
 0x239   :  { %v346_v48 = vmul.f32 %v1818_v47, %v336_v18  ;;  %v347_v49 = vmul.f32 %v1818_v47, %v337_v19 }
 0x23b   :  { %vm348_vm1 = vcmp.ge.f32.partialorder %v346_v48, 0.0  ;;  %vm349_vm2 = vcmp.ge.f32.partialorder %v347_v49, 0.0  ;;  %v350_v50 = vmul.f32 0.2, %v346_v48  ;;  %v351_v51 = vmul.f32 0.2, %v347_v49 }
 0x23d   :  { %v352_v52 = vsel %vm348_vm1, %v346_v48, %v350_v50  ;;  %v353_v53 = vsel %vm349_vm2, %v347_v49, %v351_v51 }
 0x23e   :  { %354 = vst [vmem:[%s2343_s3] sm:$0xff] %v352_v52  ;;  %355 = vst [vmem:[%s2343_s3 + $0x8] sm:$0xff] %v353_v53 }
 0x241   :  { %v1820_v54 = vpop.eup %1819 }
 0x242   :  { %v669_v55 = vmul.f32 %v1820_v54, %v659_v25  ;;  %v670_v56 = vmul.f32 %v1820_v54, %v660_v26 }
 0x244   :  { %vm671_vm3 = vcmp.ge.f32.partialorder %v669_v55, 0.0  ;;  %vm672_vm4 = vcmp.ge.f32.partialorder %v670_v56, 0.0  ;;  %v673_v57 = vmul.f32 0.2, %v669_v55  ;;  %v674_v58 = vmul.f32 0.2, %v670_v56 }
 0x246   :  { %v675_v59 = vsel %vm671_vm3, %v669_v55, %v673_v57  ;;  %v676_v60 = vsel %vm672_vm4, %v670_v56, %v674_v58 }
 0x247   :  { %1445 = vst [vmem:[%s2343_s3 + $0x10] sm:$0xff] %v675_v59  ;;  %1446 = vst [vmem:[%s2343_s3 + $0x18] sm:$0xff] %v676_v60 }
 0x26e   :  { %v989_v61 = vpop.xlane.xlu0 %988 }
 0x26f   :  { %v990_v62 = vmul.f32 0.00390625, %v989_v61 }
 0x271   :  { %v991_v63 = vadd.f32 1e-05, %v990_v62 }
 0x273   :  { %1821 = vrsqrt.f32 %v991_v63 }
 0x277   :  { %v1313_v0 = vpop.xlane.xlu1 %1312 }
 0x278   :  { %v1314_v2 = vmul.f32 0.00390625, %v1313_v0 }
 0x27a   :  { %v1315_v3 = vadd.f32 1e-05, %v1314_v2 }
 0x27c   :  { %1823 = vrsqrt.f32 %v1315_v3 }
 0x280   :  { %v1822_v4 = vpop.eup %1821 }
 0x281   :  { %v993_v5 = vmul.f32 %v1822_v4, %v983_v1  ;;  %v994_v6 = vmul.f32 %v1822_v4, %v984_v32 }
 0x283   :  { %vm995_vm5 = vcmp.ge.f32.partialorder %v993_v5, 0.0  ;;  %vm996_vm6 = vcmp.ge.f32.partialorder %v994_v6, 0.0  ;;  %v997_v8 = vmul.f32 0.2, %v993_v5  ;;  %v998_v9 = vmul.f32 0.2, %v994_v6 }
 0x285   :  { %v999_v11 = vsel %vm995_vm5, %v993_v5, %v997_v8  ;;  %v1000_v12 = vsel %vm996_vm6, %v994_v6, %v998_v9 }
 0x286   :  { %1520 = vst [vmem:[%s2343_s3 + $0x20] sm:$0xff] %v999_v11  ;;  %1521 = vst [vmem:[%s2343_s3 + $0x28] sm:$0xff] %v1000_v12 }
 0x289   :  { %v1824_v13 = vpop.eup %1823 }
 0x28a   :  { %v1317_v14 = vmul.f32 %v1824_v13, %v1307_v10  ;;  %v1318_v15 = vmul.f32 %v1824_v13, %v1308_v37 }
 0x28c   :  { %vm1319_vm7 = vcmp.ge.f32.partialorder %v1317_v14, 0.0  ;;  %vm1320_vm8 = vcmp.ge.f32.partialorder %v1318_v15, 0.0  ;;  %v1321_v16 = vmul.f32 0.2, %v1317_v14  ;;  %v1322_v17 = vmul.f32 0.2, %v1318_v15 }
 0x28e   :  { %v1323_v18 = vsel %vm1319_vm7, %v1317_v14, %v1321_v16  ;;  %v1324_v19 = vsel %vm1320_vm8, %v1318_v15, %v1322_v17 }
 0x28f   :  { %1595 = vst [vmem:[%s2343_s3 + $0x30] sm:$0xff] %v1323_v18  ;;  %1596 = vst [vmem:[%s2343_s3 + $0x38] sm:$0xff] %v1324_v19 }

</bundles_post_ra>
